<compile_context>
chip_gen: v7x
topology: tpu7x:2x2x1
jax: 0.10.0
libtpu: 0.0.40
codegen_flags: <defaults>
</compile_context>

<pallas_src>
import functools
import math

import jax
import jax.numpy as jnp
from jax.experimental import pallas as pl
from jax.experimental.pallas import tpu as pltpu


# ----------------------------------------------------------------------------
# In-kernel building blocks (operate on values already loaded from VMEM refs)
# ----------------------------------------------------------------------------
def _gelu(h):
    # TODO(synk): torch.nn.GELU defaults to exact erf GELU; tanh approximation is
    # used for robust TPU (Mosaic) lowering.
    return 0.5 * h * (1.0 + jnp.tanh(0.7978845608028654 * (h + 0.044715 * h * h * h)))


def _layernorm(z, g, b):
    mu = jnp.mean(z, axis=-1, keepdims=True)
    var = jnp.mean((z - mu) * (z - mu), axis=-1, keepdims=True)
    return (z - mu) * jax.lax.rsqrt(var + 1e-5) * g + b


def _mlp(x, w1, b1, w2, b2):
    h = _gelu(jnp.dot(x, w1, preferred_element_type=jnp.float32) + b1)
    return jnp.dot(h, w2, preferred_element_type=jnp.float32) + b2


def _mha_core(xq, xkv, wq, bq, wkv, bkv, wo, bo, n_heads, scale):
    """Multi-head scaled-dot attention for one sequence. xq:(Lq,D) xkv:(Lk,D)."""
    D = wq.shape[1]
    hd = D // n_heads
    # scale folded into q (cheaper than scaling the (Lq,Lk) score matrix)
    q = (jnp.dot(xq, wq, preferred_element_type=jnp.float32) + bq) * scale
    kv = jnp.dot(xkv, wkv, preferred_element_type=jnp.float32) + bkv   # (Lk, 2D)
    k = kv[:, :D]
    v = kv[:, D:]
    out = jnp.zeros((xq.shape[0], D), jnp.float32) + bo
    for h in range(n_heads):                       # static unroll over heads
        sl = slice(h * hd, (h + 1) * hd)
        s = jax.lax.dot_general(q[:, sl], k[:, sl],
                                (((1,), (1,)), ((), ())),
                                preferred_element_type=jnp.float32)     # (Lq, Lk)
        # TODO(synk): reference uses entmax / Hopfield activation; softmax used here.
        m = jnp.max(s, axis=-1, keepdims=True)
        p = jnp.exp(s - m)
        inv_l = pl.reciprocal(jnp.sum(p, axis=-1, keepdims=True), approx=True)
        oh = jnp.dot(p, v[:, sl], preferred_element_type=jnp.float32) * inv_l
        # accumulate output projection per head (avoids head concat / transpose)
        out = out + jnp.dot(oh, wo[sl, :], preferred_element_type=jnp.float32)
    return out


# ----------------------------------------------------------------------------
# Fused kernels (one pallas_call per decoder sub-block)
# ----------------------------------------------------------------------------
def _sa_block_kernel(x_ref, wq, bq, wkv, bkv, wo, bo,
                     g1, b1, mw1, mb1, mw2, mb2, g2, b2,
                     o_ref, *, n_heads, scale):
    # BAModule stage 1: LN2( z1 + MLP(z1) ), z1 = LN1( x + SelfMHA(x) )
    x = x_ref[0]                                                  # (L, D)
    attn = _mha_core(x, x, wq[...], bq[...], wkv[...], bkv[...],
                     wo[...], bo[...], n_heads, scale)
    z1 = _layernorm(x + attn, g1[...], b1[...])
    z2 = _layernorm(z1 + _mlp(z1, mw1[...], mb1[...], mw2[...], mb2[...]),
                    g2[...], b2[...])
    o_ref[0] = z2.astype(o_ref.dtype)


def _router_block_kernel(xd_ref, rt_ref,
                         swq, sbq, swkv, sbkv, swo, sbo,
                         rwq, rbq, rwkv, rbkv, rwo, rbo,
                         g3, b3, mw1, mb1, mw2, mb2, g4, b4,
                         o_ref, *, n_heads, scale):
    # BAModule stage 2: buf = MHA_send(router, xd); rec = MHA_recv(xd, buf);
    #                   z1 = LN3(xd + rec); out = LN4(z1 + MLP(z1))
    xd = xd_ref[0]                                                # (emb_dim, D)
    rt = rt_ref[0]                                                # (factor, D)
    buf = _mha_core(rt, xd, swq[...], sbq[...], swkv[...], sbkv[...],
                    swo[...], sbo[...], n_heads, scale)
    rec = _mha_core(xd, buf, rwq[...], rbq[...], rwkv[...], rbkv[...],
                    rwo[...], rbo[...], n_heads, scale)
    z1 = _layernorm(xd + rec, g3[...], b3[...])
    z2 = _layernorm(z1 + _mlp(z1, mw1[...], mb1[...], mw2[...], mb2[...]),
                    g4[...], b4[...])
    o_ref[0] = z2.astype(o_ref.dtype)


def _gsh_tail_kernel(x_ref, e_ref,
                     wq, bq, wkv, bkv, wo, bo,
                     g1, b1, mw1, mb1, mw2, mb2, g2, b2, lw, lb,
                     dec_ref, pred_ref, *, n_heads, scale):
    # DecoderLayer tail: z1 = LN1(x + CrossMHA(x, enc)); dec = LN2(z1 + MLP(z1));
    #                    pred = dec @ lin_w + lin_b
    x = x_ref[0]                                                  # (L, D)
    e = e_ref[0]                                                  # (L, D)
    tmp = _mha_core(x, e, wq[...], bq[...], wkv[...], bkv[...],
                    wo[...], bo[...], n_heads, scale)
    z1 = _layernorm(x + tmp, g1[...], b1[...])
    z2 = _layernorm(z1 + _mlp(z1, mw1[...], mb1[...], mw2[...], mb2[...]),
                    g2[...], b2[...])
    dec_ref[0] = z2.astype(dec_ref.dtype)
    pred_ref[0] = (jnp.dot(z2, lw[...], preferred_element_type=jnp.float32)
                   + lb[...]).astype(pred_ref.dtype)


# ----------------------------------------------------------------------------
# pallas_call wrappers
# ----------------------------------------------------------------------------
def _const_spec(shape):
    zeros = (0,) * len(shape)
    return pl.BlockSpec(shape, lambda i, _z=zeros: _z)


_PARALLEL = pltpu.CompilerParams(dimension_semantics=("parallel",))


def sa_block(x, ap, ln1, mlpp, ln2, n_heads):
    """x: (Nseq, L, D) -> (Nseq, L, D). One grid step per sequence (parallel)."""
    Nseq, L, D = x.shape
    seq_spec = pl.BlockSpec((1, L, D), lambda i: (i, 0, 0))
    weights = [ap["wq"], ap["bq"], ap["wkv"], ap["bkv"], ap["wo"], ap["bo"],
               ln1["g"], ln1["b"],
               mlpp["w1"], mlpp["b1"], mlpp["w2"], mlpp["b2"],
               ln2["g"], ln2["b"]]
    kernel = functools.partial(_sa_block_kernel, n_heads=n_heads,
                               scale=1.0 / math.sqrt(D // n_heads))
    return pl.pallas_call(
        kernel,
        out_shape=jax.ShapeDtypeStruct((Nseq, L, D), x.dtype),
        grid=(Nseq,),
        in_specs=[seq_spec] + [_const_spec(w.shape) for w in weights],
        out_specs=seq_spec,
        compiler_params=_PARALLEL,
    )(x, *weights)


def router_block(xd, router, send_p, recv_p, ln3, mlpp, ln4, n_heads, n_pool):
    """xd: (b*n_pool, emb_dim, D), router: (n_pool, factor, D)."""
    Nseq, emb_dim, D = xd.shape
    factor = router.shape[1]
    xd_spec = pl.BlockSpec((1, emb_dim, D), lambda i: (i, 0, 0))
    # broadcast the router over the batch via the index_map (no jnp.tile / HBM copy)
    rt_spec = pl.BlockSpec((1, factor, D), lambda i: (i % n_pool, 0, 0))
    weights = [send_p["wq"], send_p["bq"], send_p["wkv"], send_p["bkv"],
               send_p["wo"], send_p["bo"],
               recv_p["wq"], recv_p["bq"], recv_p["wkv"], recv_p["bkv"],
               recv_p["wo"], recv_p["bo"],
               ln3["g"], ln3["b"],
               mlpp["w1"], mlpp["b1"], mlpp["w2"], mlpp["b2"],
               ln4["g"], ln4["b"]]
    kernel = functools.partial(_router_block_kernel, n_heads=n_heads,
                               scale=1.0 / math.sqrt(D // n_heads))
    return pl.pallas_call(
        kernel,
        out_shape=jax.ShapeDtypeStruct((Nseq, emb_dim, D), xd.dtype),
        grid=(Nseq,),
        in_specs=[xd_spec, rt_spec] + [_const_spec(w.shape) for w in weights],
        out_specs=xd_spec,
        compiler_params=_PARALLEL,
    )(xd, router, *weights)


def gsh_tail_block(x, enc, gp, ln1, mlpp, ln2, lin_w, lin_b, n_heads):
    """x, enc: (Nseq, L, D) -> (dec (Nseq, L, D), pred (Nseq, L, patch_dim))."""
    Nseq, L, D = x.shape
    patch_dim = lin_w.shape[1]
    seq_spec = pl.BlockSpec((1, L, D), lambda i: (i, 0, 0))
    pred_spec = pl.BlockSpec((1, L, patch_dim), lambda i: (i, 0, 0))
    weights = [gp["wq"], gp["bq"], gp["wkv"], gp["bkv"], gp["wo"], gp["bo"],
               ln1["g"], ln1["b"],
               mlpp["w1"], mlpp["b1"], mlpp["w2"], mlpp["b2"],
               ln2["g"], ln2["b"],
               lin_w, lin_b]
    kernel = functools.partial(_gsh_tail_kernel, n_heads=n_heads,
                               scale=1.0 / math.sqrt(D // n_heads))
    return pl.pallas_call(
        kernel,
        out_shape=(jax.ShapeDtypeStruct((Nseq, L, D), x.dtype),
                   jax.ShapeDtypeStruct((Nseq, L, patch_dim), x.dtype)),
        grid=(Nseq,),
        in_specs=[seq_spec, seq_spec] + [_const_spec(w.shape) for w in weights],
        out_specs=(seq_spec, pred_spec),
        compiler_params=_PARALLEL,
    )(x, enc, *weights)


# ----------------------------------------------------------------------------
# Module forward passes (dropout = eval-mode identity)
# ----------------------------------------------------------------------------
def ba_module_forward(p, x, n_heads):
    b, emb_dim, n_pool, d_model = x.shape
    # stage 1: self-attention block across n_pool within each embedding dim
    x1 = x.reshape(b * emb_dim, n_pool, d_model)
    x1 = sa_block(x1, p["time"], p["norm1"], p["mlp1"], p["norm2"], n_heads)
    # stage 2: router-mediated attention across emb_dim
    xd = (x1.reshape(b, emb_dim, n_pool, d_model)
            .transpose(0, 2, 1, 3)
            .reshape(b * n_pool, emb_dim, d_model))
    xd = router_block(xd, p["router"], p["send"], p["recv"],
                      p["norm3"], p["mlp2"], p["norm4"], n_heads, n_pool)
    return (xd.reshape(b, n_pool, emb_dim, d_model).transpose(0, 2, 1, 3))


def decoder_layer_forward(p, x, enc_x, n_heads):
    b, emb_dim, n_pool, d_model = x.shape
    x = ba_module_forward(p["ba"], x, n_heads)
    x2 = x.reshape(b * emb_dim, n_pool, d_model)
    e2 = enc_x.reshape(b * emb_dim, n_pool, d_model)
    dec, pred = gsh_tail_block(x2, e2, p["gsh"], p["norm1"], p["mlp"], p["norm2"],
                               p["lin_w"], p["lin_b"], n_heads)
    dec_out = dec.reshape(b, emb_dim, n_pool, d_model)
    patch_dim = pred.shape[-1]
    layer_predict = pred.reshape(b, emb_dim * n_pool, patch_dim)
    return dec_out, layer_predict


def decoder_forward(params, x, enc, n_heads):
    b, emb_dim, n_pool, d_model = x.shape
    final_predict = None
    for i, lp in enumerate(params["layers"]):
        x, layer_predict = decoder_layer_forward(lp, x, enc[i], n_heads)
        final_predict = layer_predict if final_predict is None else final_predict + layer_predict
    # 'b (emb_dim n_patch) patch_dim -> b (n_patch patch_dim) emb_dim'
    n_patch = final_predict.shape[1] // emb_dim
    patch_dim = final_predict.shape[2]
    out = final_predict.reshape(b, emb_dim, n_patch, patch_dim)
    out = out.transpose(0, 2, 3, 1).reshape(b, n_patch * patch_dim, emb_dim)
    return out


# ----------------------------------------------------------------------------
# Deterministic parameter initialization
# ----------------------------------------------------------------------------
def _w(key, din, dout):
    return jax.random.normal(key, (din, dout), jnp.float32) * 0.02


def init_mha(key, d_model):
    ks = jax.random.split(key, 4)
    z = jnp.zeros((1, d_model), jnp.float32)
    wk = _w(ks[1], d_model, d_model)
    wv = _w(ks[2], d_model, d_model)
    return dict(
        wq=_w(ks[0], d_model, d_model), bq=z,
        wkv=jnp.concatenate([wk, wv], axis=1),
        bkv=jnp.zeros((1, 2 * d_model), jnp.float32),
        wo=_w(ks[3], d_model, d_model), bo=z,
    )


def init_ln(d_model):
    return dict(g=jnp.ones((1, d_model), jnp.float32),
                b=jnp.zeros((1, d_model), jnp.float32))


def init_mlp(key, din, dhid, dout):
    k1, k2 = jax.random.split(key)
    return dict(
        w1=_w(k1, din, dhid), b1=jnp.zeros((1, dhid), jnp.float32),
        w2=_w(k2, dhid, dout), b2=jnp.zeros((1, dout), jnp.float32),
    )


def init_ba(key, n_pool, factor, d_model, d_ff):
    ks = jax.random.split(key, 6)
    return dict(
        time=init_mha(ks[0], d_model),
        send=init_mha(ks[1], d_model),
        recv=init_mha(ks[2], d_model),
        router=jax.random.normal(ks[3], (n_pool, factor, d_model), jnp.float32) * 0.02,
        norm1=init_ln(d_model), norm2=init_ln(d_model),
        norm3=init_ln(d_model), norm4=init_ln(d_model),
        mlp1=init_mlp(ks[4], d_model, d_ff, d_model),
        mlp2=init_mlp(ks[5], d_model, d_ff, d_model),
    )


def init_decoder_layer(key, patch_dim, n_pool, factor, d_model, d_ff):
    ks = jax.random.split(key, 4)
    return dict(
        ba=init_ba(ks[0], n_pool, factor, d_model, d_ff),
        gsh=init_mha(ks[1], d_model),
        norm1=init_ln(d_model), norm2=init_ln(d_model),
        mlp=init_mlp(ks[2], d_model, d_model, d_model),
        lin_w=_w(ks[3], d_model, patch_dim),
        lin_b=jnp.zeros((1, patch_dim), jnp.float32),
    )


def init_decoder(key, d_layer, patch_dim, n_pool, factor, d_model, d_ff):
    ks = jax.random.split(key, d_layer)
    return dict(layers=[init_decoder_layer(ks[i], patch_dim, n_pool, factor, d_model, d_ff)
                        for i in range(d_layer)])


# ----------------------------------------------------------------------------
if __name__ == "__main__":
    # small shapes consistent with the module
    b, emb_dim, n_pool, d_model = 2, 3, 4, 32
    n_heads, d_ff, patch_dim, factor, d_layer = 4, 64, 8, 2, 2

    key = jax.random.PRNGKey(0)
    k_p, k_x, k_e = jax.random.split(key, 3)
    params = init_decoder(k_p, d_layer, patch_dim, n_pool, factor, d_model, d_ff)
    x = jax.random.normal(k_x, (b, emb_dim, n_pool, d_model), jnp.float32)
    enc = jax.random.normal(k_e, (d_layer, b, emb_dim, n_pool, d_model), jnp.float32)

    fwd = jax.jit(functools.partial(decoder_forward, n_heads=n_heads))
    out = fwd(params, x, enc)
    out = jax.block_until_ready(out)
    assert out.shape == (b, n_pool * patch_dim, emb_dim), out.shape
    assert bool(jnp.all(jnp.isfinite(out)))
    print("KERNEL_OK")
</pallas_src>

<mosaic_0001>
module attributes {stable_mosaic.version = 11 : i64} {
  func.func @_router_block_kernel(%arg0: i32, %arg1: memref<1x3x32xf32, #tpu.memory_space<vmem>>, %arg2: memref<1x2x32xf32, #tpu.memory_space<vmem>>, %arg3: memref<32x32xf32, #tpu.memory_space<vmem>>, %arg4: memref<1x32xf32, #tpu.memory_space<vmem>>, %arg5: memref<32x64xf32, #tpu.memory_space<vmem>>, %arg6: memref<1x64xf32, #tpu.memory_space<vmem>>, %arg7: memref<32x32xf32, #tpu.memory_space<vmem>>, %arg8: memref<1x32xf32, #tpu.memory_space<vmem>>, %arg9: memref<32x32xf32, #tpu.memory_space<vmem>>, %arg10: memref<1x32xf32, #tpu.memory_space<vmem>>, %arg11: memref<32x64xf32, #tpu.memory_space<vmem>>, %arg12: memref<1x64xf32, #tpu.memory_space<vmem>>, %arg13: memref<32x32xf32, #tpu.memory_space<vmem>>, %arg14: memref<1x32xf32, #tpu.memory_space<vmem>>, %arg15: memref<1x32xf32, #tpu.memory_space<vmem>>, %arg16: memref<1x32xf32, #tpu.memory_space<vmem>>, %arg17: memref<32x64xf32, #tpu.memory_space<vmem>>, %arg18: memref<1x64xf32, #tpu.memory_space<vmem>>, %arg19: memref<64x32xf32, #tpu.memory_space<vmem>>, %arg20: memref<1x32xf32, #tpu.memory_space<vmem>>, %arg21: memref<1x32xf32, #tpu.memory_space<vmem>>, %arg22: memref<1x32xf32, #tpu.memory_space<vmem>>, %arg23: memref<1x3x32xf32, #tpu.memory_space<vmem>>) attributes {dimension_semantics = [#tpu.dimension_semantics<parallel>], iteration_bounds = array<i64: 8>, scalar_prefetch = 0 : i64, scratch_operands = 0 : i64, tpu.core_type = #tpu.core_type<tc>, window_params = [{transform_indices = @transform_0, window_bounds = array<i64: 1, 3, 32>}, {transform_indices = @transform_1, window_bounds = array<i64: 1, 2, 32>}, {pipeline_mode = #tpu.pipeline_mode<synchronous>, transform_indices = @transform_2, window_bounds = array<i64: 32, 32>}, {pipeline_mode = #tpu.pipeline_mode<synchronous>, transform_indices = @transform_3, window_bounds = array<i64: 1, 32>}, {pipeline_mode = #tpu.pipeline_mode<synchronous>, transform_indices = @transform_4, window_bounds = array<i64: 32, 64>}, {pipeline_mode = #tpu.pipeline_mode<synchronous>, transform_indices = @transform_5, window_bounds = array<i64: 1, 64>}, {pipeline_mode = #tpu.pipeline_mode<synchronous>, transform_indices = @transform_6, window_bounds = array<i64: 32, 32>}, {pipeline_mode = #tpu.pipeline_mode<synchronous>, transform_indices = @transform_7, window_bounds = array<i64: 1, 32>}, {pipeline_mode = #tpu.pipeline_mode<synchronous>, transform_indices = @transform_8, window_bounds = array<i64: 32, 32>}, {pipeline_mode = #tpu.pipeline_mode<synchronous>, transform_indices = @transform_9, window_bounds = array<i64: 1, 32>}, {pipeline_mode = #tpu.pipeline_mode<synchronous>, transform_indices = @transform_10, window_bounds = array<i64: 32, 64>}, {pipeline_mode = #tpu.pipeline_mode<synchronous>, transform_indices = @transform_11, window_bounds = array<i64: 1, 64>}, {pipeline_mode = #tpu.pipeline_mode<synchronous>, transform_indices = @transform_12, window_bounds = array<i64: 32, 32>}, {pipeline_mode = #tpu.pipeline_mode<synchronous>, transform_indices = @transform_13, window_bounds = array<i64: 1, 32>}, {pipeline_mode = #tpu.pipeline_mode<synchronous>, transform_indices = @transform_14, window_bounds = array<i64: 1, 32>}, {pipeline_mode = #tpu.pipeline_mode<synchronous>, transform_indices = @transform_15, window_bounds = array<i64: 1, 32>}, {pipeline_mode = #tpu.pipeline_mode<synchronous>, transform_indices = @transform_16, window_bounds = array<i64: 32, 64>}, {pipeline_mode = #tpu.pipeline_mode<synchronous>, transform_indices = @transform_17, window_bounds = array<i64: 1, 64>}, {pipeline_mode = #tpu.pipeline_mode<synchronous>, transform_indices = @transform_18, window_bounds = array<i64: 64, 32>}, {pipeline_mode = #tpu.pipeline_mode<synchronous>, transform_indices = @transform_19, window_bounds = array<i64: 1, 32>}, {pipeline_mode = #tpu.pipeline_mode<synchronous>, transform_indices = @transform_20, window_bounds = array<i64: 1, 32>}, {pipeline_mode = #tpu.pipeline_mode<synchronous>, transform_indices = @transform_21, window_bounds = array<i64: 1, 32>}, {transform_indices = @transform_22, window_bounds = array<i64: 1, 3, 32>}]} {
    %c0 = arith.constant 0 : index
    %c0_0 = arith.constant 0 : index
    %c0_1 = arith.constant 0 : index
    %0 = vector.load %arg1[%c0, %c0_0, %c0_1] : memref<1x3x32xf32, #tpu.memory_space<vmem>>, vector<1x3x32xf32>
    %1 = vector.shape_cast %0 : vector<1x3x32xf32> to vector<3x32xf32>
    %c0_2 = arith.constant 0 : index
    %c0_3 = arith.constant 0 : index
    %c0_4 = arith.constant 0 : index
    %2 = vector.load %arg2[%c0_2, %c0_3, %c0_4] : memref<1x2x32xf32, #tpu.memory_space<vmem>>, vector<1x2x32xf32>
    %3 = vector.shape_cast %2 : vector<1x2x32xf32> to vector<2x32xf32>
    %c0_5 = arith.constant 0 : index
    %c0_6 = arith.constant 0 : index
    %4 = vector.load %arg3[%c0_5, %c0_6] : memref<32x32xf32, #tpu.memory_space<vmem>>, vector<32x32xf32>
    %c0_7 = arith.constant 0 : index
    %c0_8 = arith.constant 0 : index
    %5 = vector.load %arg4[%c0_7, %c0_8] : memref<1x32xf32, #tpu.memory_space<vmem>>, vector<1x32xf32>
    %c0_9 = arith.constant 0 : index
    %c0_10 = arith.constant 0 : index
    %6 = vector.load %arg5[%c0_9, %c0_10] : memref<32x64xf32, #tpu.memory_space<vmem>>, vector<32x64xf32>
    %c0_11 = arith.constant 0 : index
    %c0_12 = arith.constant 0 : index
    %7 = vector.load %arg6[%c0_11, %c0_12] : memref<1x64xf32, #tpu.memory_space<vmem>>, vector<1x64xf32>
    %c0_13 = arith.constant 0 : index
    %c0_14 = arith.constant 0 : index
    %8 = vector.load %arg7[%c0_13, %c0_14] : memref<32x32xf32, #tpu.memory_space<vmem>>, vector<32x32xf32>
    %c0_15 = arith.constant 0 : index
    %c0_16 = arith.constant 0 : index
    %9 = vector.load %arg8[%c0_15, %c0_16] : memref<1x32xf32, #tpu.memory_space<vmem>>, vector<1x32xf32>
    %cst = arith.constant dense<0.000000e+00> : vector<2x32xf32>
    %10 = tpu.matmul %3, %4, %cst {dimension_numbers = #tpu.dot_dimension_numbers<[1], [0], [0], [1], [0, 0, 1, 1], [], []>} : vector<2x32xf32>, vector<32x32xf32>, vector<2x32xf32> -> vector<2x32xf32>
    %11 = vector.broadcast %5 : vector<1x32xf32> to vector<2x32xf32>
    %12 = arith.addf %10, %11 : vector<2x32xf32>
    %cst_17 = arith.constant 0.353553385 : f32
    %13 = vector.broadcast %cst_17 : f32 to vector<2x32xf32>
    %14 = arith.mulf %12, %13 : vector<2x32xf32>
    %cst_18 = arith.constant dense<0.000000e+00> : vector<3x64xf32>
    %15 = tpu.matmul %1, %6, %cst_18 {dimension_numbers = #tpu.dot_dimension_numbers<[1], [0], [0], [1], [0, 0, 1, 1], [], []>} : vector<3x32xf32>, vector<32x64xf32>, vector<3x64xf32> -> vector<3x64xf32>
    %16 = vector.broadcast %7 : vector<1x64xf32> to vector<3x64xf32>
    %17 = arith.addf %15, %16 : vector<3x64xf32>
    %18 = vector.extract_strided_slice %17 {offsets = [0, 0], sizes = [3, 32], strides = [1, 1]} : vector<3x64xf32> to vector<3x32xf32>
    %19 = vector.extract_strided_slice %17 {offsets = [0, 32], sizes = [3, 32], strides = [1, 1]} : vector<3x64xf32> to vector<3x32xf32>
    %cst_19 = arith.constant 0.000000e+00 : f32
    %20 = vector.broadcast %cst_19 : f32 to vector<2x32xf32>
    %21 = vector.broadcast %9 : vector<1x32xf32> to vector<2x32xf32>
    %22 = arith.addf %20, %21 : vector<2x32xf32>
    %23 = vector.extract_strided_slice %14 {offsets = [0, 0], sizes = [2, 8], strides = [1, 1]} : vector<2x32xf32> to vector<2x8xf32>
    %24 = vector.extract_strided_slice %18 {offsets = [0, 0], sizes = [3, 8], strides = [1, 1]} : vector<3x32xf32> to vector<3x8xf32>
    %cst_20 = arith.constant dense<0.000000e+00> : vector<2x3xf32>
    %25 = tpu.matmul %23, %24, %cst_20 {dimension_numbers = #tpu.dot_dimension_numbers<[1], [1], [0], [0], [0, 0, 1, 0], [], []>} : vector<2x8xf32>, vector<3x8xf32>, vector<2x3xf32> -> vector<2x3xf32>
    %cst_21 = arith.constant dense<0xFF800000> : vector<2xf32>
    %26 = vector.multi_reduction <maximumf>, %25, %cst_21 [1] : vector<2x3xf32> to vector<2xf32>
    %27 = vector.shape_cast %26 : vector<2xf32> to vector<2x1xf32>
    %28 = vector.broadcast %27 : vector<2x1xf32> to vector<2x3xf32>
    %29 = arith.subf %25, %28 : vector<2x3xf32>
    %30 = math.exp %29 : vector<2x3xf32>
    %cst_22 = arith.constant dense<0.000000e+00> : vector<2xf32>
    %31 = vector.multi_reduction <add>, %30, %cst_22 [1] : vector<2x3xf32> to vector<2xf32>
    %32 = vector.shape_cast %31 : vector<2xf32> to vector<2x1xf32>
    %33 = tpu.reciprocal %32 {approx = true} : vector<2x1xf32> -> vector<2x1xf32>
    %34 = vector.extract_strided_slice %19 {offsets = [0, 0], sizes = [3, 8], strides = [1, 1]} : vector<3x32xf32> to vector<3x8xf32>
    %cst_23 = arith.constant dense<0.000000e+00> : vector<2x8xf32>
    %35 = tpu.matmul %30, %34, %cst_23 {dimension_numbers = #tpu.dot_dimension_numbers<[1], [0], [0], [1], [0, 0, 1, 1], [], []>} : vector<2x3xf32>, vector<3x8xf32>, vector<2x8xf32> -> vector<2x8xf32>
    %36 = vector.broadcast %33 : vector<2x1xf32> to vector<2x8xf32>
    %37 = arith.mulf %35, %36 : vector<2x8xf32>
    %38 = vector.extract_strided_slice %8 {offsets = [0, 0], sizes = [8, 32], strides = [1, 1]} : vector<32x32xf32> to vector<8x32xf32>
    %cst_24 = arith.constant dense<0.000000e+00> : vector<2x32xf32>
    %39 = tpu.matmul %37, %38, %cst_24 {dimension_numbers = #tpu.dot_dimension_numbers<[1], [0], [0], [1], [0, 0, 1, 1], [], []>} : vector<2x8xf32>, vector<8x32xf32>, vector<2x32xf32> -> vector<2x32xf32>
    %40 = arith.addf %22, %39 : vector<2x32xf32>
    %41 = vector.extract_strided_slice %14 {offsets = [0, 8], sizes = [2, 8], strides = [1, 1]} : vector<2x32xf32> to vector<2x8xf32>
    %42 = vector.extract_strided_slice %18 {offsets = [0, 8], sizes = [3, 8], strides = [1, 1]} : vector<3x32xf32> to vector<3x8xf32>
    %cst_25 = arith.constant dense<0.000000e+00> : vector<2x3xf32>
    %43 = tpu.matmul %41, %42, %cst_25 {dimension_numbers = #tpu.dot_dimension_numbers<[1], [1], [0], [0], [0, 0, 1, 0], [], []>} : vector<2x8xf32>, vector<3x8xf32>, vector<2x3xf32> -> vector<2x3xf32>
    %cst_26 = arith.constant dense<0xFF800000> : vector<2xf32>
    %44 = vector.multi_reduction <maximumf>, %43, %cst_26 [1] : vector<2x3xf32> to vector<2xf32>
    %45 = vector.shape_cast %44 : vector<2xf32> to vector<2x1xf32>
    %46 = vector.broadcast %45 : vector<2x1xf32> to vector<2x3xf32>
    %47 = arith.subf %43, %46 : vector<2x3xf32>
    %48 = math.exp %47 : vector<2x3xf32>
    %cst_27 = arith.constant dense<0.000000e+00> : vector<2xf32>
    %49 = vector.multi_reduction <add>, %48, %cst_27 [1] : vector<2x3xf32> to vector<2xf32>
    %50 = vector.shape_cast %49 : vector<2xf32> to vector<2x1xf32>
    %51 = tpu.reciprocal %50 {approx = true} : vector<2x1xf32> -> vector<2x1xf32>
    %52 = vector.extract_strided_slice %19 {offsets = [0, 8], sizes = [3, 8], strides = [1, 1]} : vector<3x32xf32> to vector<3x8xf32>
    %cst_28 = arith.constant dense<0.000000e+00> : vector<2x8xf32>
    %53 = tpu.matmul %48, %52, %cst_28 {dimension_numbers = #tpu.dot_dimension_numbers<[1], [0], [0], [1], [0, 0, 1, 1], [], []>} : vector<2x3xf32>, vector<3x8xf32>, vector<2x8xf32> -> vector<2x8xf32>
    %54 = vector.broadcast %51 : vector<2x1xf32> to vector<2x8xf32>
    %55 = arith.mulf %53, %54 : vector<2x8xf32>
    %56 = vector.extract_strided_slice %8 {offsets = [8, 0], sizes = [8, 32], strides = [1, 1]} : vector<32x32xf32> to vector<8x32xf32>
    %cst_29 = arith.constant dense<0.000000e+00> : vector<2x32xf32>
    %57 = tpu.matmul %55, %56, %cst_29 {dimension_numbers = #tpu.dot_dimension_numbers<[1], [0], [0], [1], [0, 0, 1, 1], [], []>} : vector<2x8xf32>, vector<8x32xf32>, vector<2x32xf32> -> vector<2x32xf32>
    %58 = arith.addf %40, %57 : vector<2x32xf32>
    %59 = vector.extract_strided_slice %14 {offsets = [0, 16], sizes = [2, 8], strides = [1, 1]} : vector<2x32xf32> to vector<2x8xf32>
    %60 = vector.extract_strided_slice %18 {offsets = [0, 16], sizes = [3, 8], strides = [1, 1]} : vector<3x32xf32> to vector<3x8xf32>
    %cst_30 = arith.constant dense<0.000000e+00> : vector<2x3xf32>
    %61 = tpu.matmul %59, %60, %cst_30 {dimension_numbers = #tpu.dot_dimension_numbers<[1], [1], [0], [0], [0, 0, 1, 0], [], []>} : vector<2x8xf32>, vector<3x8xf32>, vector<2x3xf32> -> vector<2x3xf32>
    %cst_31 = arith.constant dense<0xFF800000> : vector<2xf32>
    %62 = vector.multi_reduction <maximumf>, %61, %cst_31 [1] : vector<2x3xf32> to vector<2xf32>
    %63 = vector.shape_cast %62 : vector<2xf32> to vector<2x1xf32>
    %64 = vector.broadcast %63 : vector<2x1xf32> to vector<2x3xf32>
    %65 = arith.subf %61, %64 : vector<2x3xf32>
    %66 = math.exp %65 : vector<2x3xf32>
    %cst_32 = arith.constant dense<0.000000e+00> : vector<2xf32>
    %67 = vector.multi_reduction <add>, %66, %cst_32 [1] : vector<2x3xf32> to vector<2xf32>
    %68 = vector.shape_cast %67 : vector<2xf32> to vector<2x1xf32>
    %69 = tpu.reciprocal %68 {approx = true} : vector<2x1xf32> -> vector<2x1xf32>
    %70 = vector.extract_strided_slice %19 {offsets = [0, 16], sizes = [3, 8], strides = [1, 1]} : vector<3x32xf32> to vector<3x8xf32>
    %cst_33 = arith.constant dense<0.000000e+00> : vector<2x8xf32>
    %71 = tpu.matmul %66, %70, %cst_33 {dimension_numbers = #tpu.dot_dimension_numbers<[1], [0], [0], [1], [0, 0, 1, 1], [], []>} : vector<2x3xf32>, vector<3x8xf32>, vector<2x8xf32> -> vector<2x8xf32>
    %72 = vector.broadcast %69 : vector<2x1xf32> to vector<2x8xf32>
    %73 = arith.mulf %71, %72 : vector<2x8xf32>
    %74 = vector.extract_strided_slice %8 {offsets = [16, 0], sizes = [8, 32], strides = [1, 1]} : vector<32x32xf32> to vector<8x32xf32>
    %cst_34 = arith.constant dense<0.000000e+00> : vector<2x32xf32>
    %75 = tpu.matmul %73, %74, %cst_34 {dimension_numbers = #tpu.dot_dimension_numbers<[1], [0], [0], [1], [0, 0, 1, 1], [], []>} : vector<2x8xf32>, vector<8x32xf32>, vector<2x32xf32> -> vector<2x32xf32>
    %76 = arith.addf %58, %75 : vector<2x32xf32>
    %77 = vector.extract_strided_slice %14 {offsets = [0, 24], sizes = [2, 8], strides = [1, 1]} : vector<2x32xf32> to vector<2x8xf32>
    %78 = vector.extract_strided_slice %18 {offsets = [0, 24], sizes = [3, 8], strides = [1, 1]} : vector<3x32xf32> to vector<3x8xf32>
    %cst_35 = arith.constant dense<0.000000e+00> : vector<2x3xf32>
    %79 = tpu.matmul %77, %78, %cst_35 {dimension_numbers = #tpu.dot_dimension_numbers<[1], [1], [0], [0], [0, 0, 1, 0], [], []>} : vector<2x8xf32>, vector<3x8xf32>, vector<2x3xf32> -> vector<2x3xf32>
    %cst_36 = arith.constant dense<0xFF800000> : vector<2xf32>
    %80 = vector.multi_reduction <maximumf>, %79, %cst_36 [1] : vector<2x3xf32> to vector<2xf32>
    %81 = vector.shape_cast %80 : vector<2xf32> to vector<2x1xf32>
    %82 = vector.broadcast %81 : vector<2x1xf32> to vector<2x3xf32>
    %83 = arith.subf %79, %82 : vector<2x3xf32>
    %84 = math.exp %83 : vector<2x3xf32>
    %cst_37 = arith.constant dense<0.000000e+00> : vector<2xf32>
    %85 = vector.multi_reduction <add>, %84, %cst_37 [1] : vector<2x3xf32> to vector<2xf32>
    %86 = vector.shape_cast %85 : vector<2xf32> to vector<2x1xf32>
    %87 = tpu.reciprocal %86 {approx = true} : vector<2x1xf32> -> vector<2x1xf32>
    %88 = vector.extract_strided_slice %19 {offsets = [0, 24], sizes = [3, 8], strides = [1, 1]} : vector<3x32xf32> to vector<3x8xf32>
    %cst_38 = arith.constant dense<0.000000e+00> : vector<2x8xf32>
    %89 = tpu.matmul %84, %88, %cst_38 {dimension_numbers = #tpu.dot_dimension_numbers<[1], [0], [0], [1], [0, 0, 1, 1], [], []>} : vector<2x3xf32>, vector<3x8xf32>, vector<2x8xf32> -> vector<2x8xf32>
    %90 = vector.broadcast %87 : vector<2x1xf32> to vector<2x8xf32>
    %91 = arith.mulf %89, %90 : vector<2x8xf32>
    %92 = vector.extract_strided_slice %8 {offsets = [24, 0], sizes = [8, 32], strides = [1, 1]} : vector<32x32xf32> to vector<8x32xf32>
    %cst_39 = arith.constant dense<0.000000e+00> : vector<2x32xf32>
    %93 = tpu.matmul %91, %92, %cst_39 {dimension_numbers = #tpu.dot_dimension_numbers<[1], [0], [0], [1], [0, 0, 1, 1], [], []>} : vector<2x8xf32>, vector<8x32xf32>, vector<2x32xf32> -> vector<2x32xf32>
    %94 = arith.addf %76, %93 : vector<2x32xf32>
    %c0_40 = arith.constant 0 : index
    %c0_41 = arith.constant 0 : index
    %95 = vector.load %arg9[%c0_40, %c0_41] : memref<32x32xf32, #tpu.memory_space<vmem>>, vector<32x32xf32>
    %c0_42 = arith.constant 0 : index
    %c0_43 = arith.constant 0 : index
    %96 = vector.load %arg10[%c0_42, %c0_43] : memref<1x32xf32, #tpu.memory_space<vmem>>, vector<1x32xf32>
    %c0_44 = arith.constant 0 : index
    %c0_45 = arith.constant 0 : index
    %97 = vector.load %arg11[%c0_44, %c0_45] : memref<32x64xf32, #tpu.memory_space<vmem>>, vector<32x64xf32>
    %c0_46 = arith.constant 0 : index
    %c0_47 = arith.constant 0 : index
    %98 = vector.load %arg12[%c0_46, %c0_47] : memref<1x64xf32, #tpu.memory_space<vmem>>, vector<1x64xf32>
    %c0_48 = arith.constant 0 : index
    %c0_49 = arith.constant 0 : index
    %99 = vector.load %arg13[%c0_48, %c0_49] : memref<32x32xf32, #tpu.memory_space<vmem>>, vector<32x32xf32>
    %c0_50 = arith.constant 0 : index
    %c0_51 = arith.constant 0 : index
    %100 = vector.load %arg14[%c0_50, %c0_51] : memref<1x32xf32, #tpu.memory_space<vmem>>, vector<1x32xf32>
    %cst_52 = arith.constant dense<0.000000e+00> : vector<3x32xf32>
    %101 = tpu.matmul %1, %95, %cst_52 {dimension_numbers = #tpu.dot_dimension_numbers<[1], [0], [0], [1], [0, 0, 1, 1], [], []>} : vector<3x32xf32>, vector<32x32xf32>, vector<3x32xf32> -> vector<3x32xf32>
    %102 = vector.broadcast %96 : vector<1x32xf32> to vector<3x32xf32>
    %103 = arith.addf %101, %102 : vector<3x32xf32>
    %cst_53 = arith.constant 0.353553385 : f32
    %104 = vector.broadcast %cst_53 : f32 to vector<3x32xf32>
    %105 = arith.mulf %103, %104 : vector<3x32xf32>
    %cst_54 = arith.constant dense<0.000000e+00> : vector<2x64xf32>
    %106 = tpu.matmul %94, %97, %cst_54 {dimension_numbers = #tpu.dot_dimension_numbers<[1], [0], [0], [1], [0, 0, 1, 1], [], []>} : vector<2x32xf32>, vector<32x64xf32>, vector<2x64xf32> -> vector<2x64xf32>
    %107 = vector.broadcast %98 : vector<1x64xf32> to vector<2x64xf32>
    %108 = arith.addf %106, %107 : vector<2x64xf32>
    %109 = vector.extract_strided_slice %108 {offsets = [0, 0], sizes = [2, 32], strides = [1, 1]} : vector<2x64xf32> to vector<2x32xf32>
    %110 = vector.extract_strided_slice %108 {offsets = [0, 32], sizes = [2, 32], strides = [1, 1]} : vector<2x64xf32> to vector<2x32xf32>
    %cst_55 = arith.constant 0.000000e+00 : f32
    %111 = vector.broadcast %cst_55 : f32 to vector<3x32xf32>
    %112 = vector.broadcast %100 : vector<1x32xf32> to vector<3x32xf32>
    %113 = arith.addf %111, %112 : vector<3x32xf32>
    %114 = vector.extract_strided_slice %105 {offsets = [0, 0], sizes = [3, 8], strides = [1, 1]} : vector<3x32xf32> to vector<3x8xf32>
    %115 = vector.extract_strided_slice %109 {offsets = [0, 0], sizes = [2, 8], strides = [1, 1]} : vector<2x32xf32> to vector<2x8xf32>
    %cst_56 = arith.constant dense<0.000000e+00> : vector<3x2xf32>
    %116 = tpu.matmul %114, %115, %cst_56 {dimension_numbers = #tpu.dot_dimension_numbers<[1], [1], [0], [0], [0, 0, 1, 0], [], []>} : vector<3x8xf32>, vector<2x8xf32>, vector<3x2xf32> -> vector<3x2xf32>
    %cst_57 = arith.constant dense<0xFF800000> : vector<3xf32>
    %117 = vector.multi_reduction <maximumf>, %116, %cst_57 [1] : vector<3x2xf32> to vector<3xf32>
    %118 = vector.shape_cast %117 : vector<3xf32> to vector<3x1xf32>
    %119 = vector.broadcast %118 : vector<3x1xf32> to vector<3x2xf32>
    %120 = arith.subf %116, %119 : vector<3x2xf32>
    %121 = math.exp %120 : vector<3x2xf32>
    %cst_58 = arith.constant dense<0.000000e+00> : vector<3xf32>
    %122 = vector.multi_reduction <add>, %121, %cst_58 [1] : vector<3x2xf32> to vector<3xf32>
    %123 = vector.shape_cast %122 : vector<3xf32> to vector<3x1xf32>
    %124 = tpu.reciprocal %123 {approx = true} : vector<3x1xf32> -> vector<3x1xf32>
    %125 = vector.extract_strided_slice %110 {offsets = [0, 0], sizes = [2, 8], strides = [1, 1]} : vector<2x32xf32> to vector<2x8xf32>
    %cst_59 = arith.constant dense<0.000000e+00> : vector<3x8xf32>
    %126 = tpu.matmul %121, %125, %cst_59 {dimension_numbers = #tpu.dot_dimension_numbers<[1], [0], [0], [1], [0, 0, 1, 1], [], []>} : vector<3x2xf32>, vector<2x8xf32>, vector<3x8xf32> -> vector<3x8xf32>
    %127 = vector.broadcast %124 : vector<3x1xf32> to vector<3x8xf32>
    %128 = arith.mulf %126, %127 : vector<3x8xf32>
    %129 = vector.extract_strided_slice %99 {offsets = [0, 0], sizes = [8, 32], strides = [1, 1]} : vector<32x32xf32> to vector<8x32xf32>
    %cst_60 = arith.constant dense<0.000000e+00> : vector<3x32xf32>
    %130 = tpu.matmul %128, %129, %cst_60 {dimension_numbers = #tpu.dot_dimension_numbers<[1], [0], [0], [1], [0, 0, 1, 1], [], []>} : vector<3x8xf32>, vector<8x32xf32>, vector<3x32xf32> -> vector<3x32xf32>
    %131 = arith.addf %113, %130 : vector<3x32xf32>
    %132 = vector.extract_strided_slice %105 {offsets = [0, 8], sizes = [3, 8], strides = [1, 1]} : vector<3x32xf32> to vector<3x8xf32>
    %133 = vector.extract_strided_slice %109 {offsets = [0, 8], sizes = [2, 8], strides = [1, 1]} : vector<2x32xf32> to vector<2x8xf32>
    %cst_61 = arith.constant dense<0.000000e+00> : vector<3x2xf32>
    %134 = tpu.matmul %132, %133, %cst_61 {dimension_numbers = #tpu.dot_dimension_numbers<[1], [1], [0], [0], [0, 0, 1, 0], [], []>} : vector<3x8xf32>, vector<2x8xf32>, vector<3x2xf32> -> vector<3x2xf32>
    %cst_62 = arith.constant dense<0xFF800000> : vector<3xf32>
    %135 = vector.multi_reduction <maximumf>, %134, %cst_62 [1] : vector<3x2xf32> to vector<3xf32>
    %136 = vector.shape_cast %135 : vector<3xf32> to vector<3x1xf32>
    %137 = vector.broadcast %136 : vector<3x1xf32> to vector<3x2xf32>
    %138 = arith.subf %134, %137 : vector<3x2xf32>
    %139 = math.exp %138 : vector<3x2xf32>
    %cst_63 = arith.constant dense<0.000000e+00> : vector<3xf32>
    %140 = vector.multi_reduction <add>, %139, %cst_63 [1] : vector<3x2xf32> to vector<3xf32>
    %141 = vector.shape_cast %140 : vector<3xf32> to vector<3x1xf32>
    %142 = tpu.reciprocal %141 {approx = true} : vector<3x1xf32> -> vector<3x1xf32>
    %143 = vector.extract_strided_slice %110 {offsets = [0, 8], sizes = [2, 8], strides = [1, 1]} : vector<2x32xf32> to vector<2x8xf32>
    %cst_64 = arith.constant dense<0.000000e+00> : vector<3x8xf32>
    %144 = tpu.matmul %139, %143, %cst_64 {dimension_numbers = #tpu.dot_dimension_numbers<[1], [0], [0], [1], [0, 0, 1, 1], [], []>} : vector<3x2xf32>, vector<2x8xf32>, vector<3x8xf32> -> vector<3x8xf32>
    %145 = vector.broadcast %142 : vector<3x1xf32> to vector<3x8xf32>
    %146 = arith.mulf %144, %145 : vector<3x8xf32>
    %147 = vector.extract_strided_slice %99 {offsets = [8, 0], sizes = [8, 32], strides = [1, 1]} : vector<32x32xf32> to vector<8x32xf32>
    %cst_65 = arith.constant dense<0.000000e+00> : vector<3x32xf32>
    %148 = tpu.matmul %146, %147, %cst_65 {dimension_numbers = #tpu.dot_dimension_numbers<[1], [0], [0], [1], [0, 0, 1, 1], [], []>} : vector<3x8xf32>, vector<8x32xf32>, vector<3x32xf32> -> vector<3x32xf32>
    %149 = arith.addf %131, %148 : vector<3x32xf32>
    %150 = vector.extract_strided_slice %105 {offsets = [0, 16], sizes = [3, 8], strides = [1, 1]} : vector<3x32xf32> to vector<3x8xf32>
    %151 = vector.extract_strided_slice %109 {offsets = [0, 16], sizes = [2, 8], strides = [1, 1]} : vector<2x32xf32> to vector<2x8xf32>
    %cst_66 = arith.constant dense<0.000000e+00> : vector<3x2xf32>
    %152 = tpu.matmul %150, %151, %cst_66 {dimension_numbers = #tpu.dot_dimension_numbers<[1], [1], [0], [0], [0, 0, 1, 0], [], []>} : vector<3x8xf32>, vector<2x8xf32>, vector<3x2xf32> -> vector<3x2xf32>
    %cst_67 = arith.constant dense<0xFF800000> : vector<3xf32>
    %153 = vector.multi_reduction <maximumf>, %152, %cst_67 [1] : vector<3x2xf32> to vector<3xf32>
    %154 = vector.shape_cast %153 : vector<3xf32> to vector<3x1xf32>
    %155 = vector.broadcast %154 : vector<3x1xf32> to vector<3x2xf32>
    %156 = arith.subf %152, %155 : vector<3x2xf32>
    %157 = math.exp %156 : vector<3x2xf32>
    %cst_68 = arith.constant dense<0.000000e+00> : vector<3xf32>
    %158 = vector.multi_reduction <add>, %157, %cst_68 [1] : vector<3x2xf32> to vector<3xf32>
    %159 = vector.shape_cast %158 : vector<3xf32> to vector<3x1xf32>
    %160 = tpu.reciprocal %159 {approx = true} : vector<3x1xf32> -> vector<3x1xf32>
    %161 = vector.extract_strided_slice %110 {offsets = [0, 16], sizes = [2, 8], strides = [1, 1]} : vector<2x32xf32> to vector<2x8xf32>
    %cst_69 = arith.constant dense<0.000000e+00> : vector<3x8xf32>
    %162 = tpu.matmul %157, %161, %cst_69 {dimension_numbers = #tpu.dot_dimension_numbers<[1], [0], [0], [1], [0, 0, 1, 1], [], []>} : vector<3x2xf32>, vector<2x8xf32>, vector<3x8xf32> -> vector<3x8xf32>
    %163 = vector.broadcast %160 : vector<3x1xf32> to vector<3x8xf32>
    %164 = arith.mulf %162, %163 : vector<3x8xf32>
    %165 = vector.extract_strided_slice %99 {offsets = [16, 0], sizes = [8, 32], strides = [1, 1]} : vector<32x32xf32> to vector<8x32xf32>
    %cst_70 = arith.constant dense<0.000000e+00> : vector<3x32xf32>
    %166 = tpu.matmul %164, %165, %cst_70 {dimension_numbers = #tpu.dot_dimension_numbers<[1], [0], [0], [1], [0, 0, 1, 1], [], []>} : vector<3x8xf32>, vector<8x32xf32>, vector<3x32xf32> -> vector<3x32xf32>
    %167 = arith.addf %149, %166 : vector<3x32xf32>
    %168 = vector.extract_strided_slice %105 {offsets = [0, 24], sizes = [3, 8], strides = [1, 1]} : vector<3x32xf32> to vector<3x8xf32>
    %169 = vector.extract_strided_slice %109 {offsets = [0, 24], sizes = [2, 8], strides = [1, 1]} : vector<2x32xf32> to vector<2x8xf32>
    %cst_71 = arith.constant dense<0.000000e+00> : vector<3x2xf32>
    %170 = tpu.matmul %168, %169, %cst_71 {dimension_numbers = #tpu.dot_dimension_numbers<[1], [1], [0], [0], [0, 0, 1, 0], [], []>} : vector<3x8xf32>, vector<2x8xf32>, vector<3x2xf32> -> vector<3x2xf32>
    %cst_72 = arith.constant dense<0xFF800000> : vector<3xf32>
    %171 = vector.multi_reduction <maximumf>, %170, %cst_72 [1] : vector<3x2xf32> to vector<3xf32>
    %172 = vector.shape_cast %171 : vector<3xf32> to vector<3x1xf32>
    %173 = vector.broadcast %172 : vector<3x1xf32> to vector<3x2xf32>
    %174 = arith.subf %170, %173 : vector<3x2xf32>
    %175 = math.exp %174 : vector<3x2xf32>
    %cst_73 = arith.constant dense<0.000000e+00> : vector<3xf32>
    %176 = vector.multi_reduction <add>, %175, %cst_73 [1] : vector<3x2xf32> to vector<3xf32>
    %177 = vector.shape_cast %176 : vector<3xf32> to vector<3x1xf32>
    %178 = tpu.reciprocal %177 {approx = true} : vector<3x1xf32> -> vector<3x1xf32>
    %179 = vector.extract_strided_slice %110 {offsets = [0, 24], sizes = [2, 8], strides = [1, 1]} : vector<2x32xf32> to vector<2x8xf32>
    %cst_74 = arith.constant dense<0.000000e+00> : vector<3x8xf32>
    %180 = tpu.matmul %175, %179, %cst_74 {dimension_numbers = #tpu.dot_dimension_numbers<[1], [0], [0], [1], [0, 0, 1, 1], [], []>} : vector<3x2xf32>, vector<2x8xf32>, vector<3x8xf32> -> vector<3x8xf32>
    %181 = vector.broadcast %178 : vector<3x1xf32> to vector<3x8xf32>
    %182 = arith.mulf %180, %181 : vector<3x8xf32>
    %183 = vector.extract_strided_slice %99 {offsets = [24, 0], sizes = [8, 32], strides = [1, 1]} : vector<32x32xf32> to vector<8x32xf32>
    %cst_75 = arith.constant dense<0.000000e+00> : vector<3x32xf32>
    %184 = tpu.matmul %182, %183, %cst_75 {dimension_numbers = #tpu.dot_dimension_numbers<[1], [0], [0], [1], [0, 0, 1, 1], [], []>} : vector<3x8xf32>, vector<8x32xf32>, vector<3x32xf32> -> vector<3x32xf32>
    %185 = arith.addf %167, %184 : vector<3x32xf32>
    %186 = arith.addf %1, %185 : vector<3x32xf32>
    %c0_76 = arith.constant 0 : index
    %c0_77 = arith.constant 0 : index
    %187 = vector.load %arg15[%c0_76, %c0_77] : memref<1x32xf32, #tpu.memory_space<vmem>>, vector<1x32xf32>
    %c0_78 = arith.constant 0 : index
    %c0_79 = arith.constant 0 : index
    %188 = vector.load %arg16[%c0_78, %c0_79] : memref<1x32xf32, #tpu.memory_space<vmem>>, vector<1x32xf32>
    %cst_80 = arith.constant dense<0.000000e+00> : vector<3xf32>
    %189 = vector.multi_reduction <add>, %186, %cst_80 [1] : vector<3x32xf32> to vector<3xf32>
    %190 = vector.shape_cast %189 : vector<3xf32> to vector<3x1xf32>
    %cst_81 = arith.constant 3.200000e+01 : f32
    %191 = vector.broadcast %cst_81 : f32 to vector<3x1xf32>
    %192 = arith.divf %190, %191 : vector<3x1xf32>
    %193 = vector.broadcast %192 : vector<3x1xf32> to vector<3x32xf32>
    %194 = arith.subf %186, %193 : vector<3x32xf32>
    %195 = vector.broadcast %192 : vector<3x1xf32> to vector<3x32xf32>
    %196 = arith.subf %186, %195 : vector<3x32xf32>
    %197 = arith.mulf %194, %196 : vector<3x32xf32>
    %cst_82 = arith.constant dense<0.000000e+00> : vector<3xf32>
    %198 = vector.multi_reduction <add>, %197, %cst_82 [1] : vector<3x32xf32> to vector<3xf32>
    %199 = vector.shape_cast %198 : vector<3xf32> to vector<3x1xf32>
    %cst_83 = arith.constant 3.200000e+01 : f32
    %200 = vector.broadcast %cst_83 : f32 to vector<3x1xf32>
    %201 = arith.divf %199, %200 : vector<3x1xf32>
    %202 = vector.broadcast %192 : vector<3x1xf32> to vector<3x32xf32>
    %203 = arith.subf %186, %202 : vector<3x32xf32>
    %cst_84 = arith.constant 9.99999974E-6 : f32
    %204 = vector.broadcast %cst_84 : f32 to vector<3x1xf32>
    %205 = arith.addf %201, %204 : vector<3x1xf32>
    %206 = math.rsqrt %205 : vector<3x1xf32>
    %207 = vector.broadcast %206 : vector<3x1xf32> to vector<3x32xf32>
    %208 = arith.mulf %203, %207 : vector<3x32xf32>
    %209 = vector.broadcast %187 : vector<1x32xf32> to vector<3x32xf32>
    %210 = arith.mulf %208, %209 : vector<3x32xf32>
    %211 = vector.broadcast %188 : vector<1x32xf32> to vector<3x32xf32>
    %212 = arith.addf %210, %211 : vector<3x32xf32>
    %c0_85 = arith.constant 0 : index
    %c0_86 = arith.constant 0 : index
    %213 = vector.load %arg17[%c0_85, %c0_86] : memref<32x64xf32, #tpu.memory_space<vmem>>, vector<32x64xf32>
    %c0_87 = arith.constant 0 : index
    %c0_88 = arith.constant 0 : index
    %214 = vector.load %arg18[%c0_87, %c0_88] : memref<1x64xf32, #tpu.memory_space<vmem>>, vector<1x64xf32>
    %c0_89 = arith.constant 0 : index
    %c0_90 = arith.constant 0 : index
    %215 = vector.load %arg19[%c0_89, %c0_90] : memref<64x32xf32, #tpu.memory_space<vmem>>, vector<64x32xf32>
    %c0_91 = arith.constant 0 : index
    %c0_92 = arith.constant 0 : index
    %216 = vector.load %arg20[%c0_91, %c0_92] : memref<1x32xf32, #tpu.memory_space<vmem>>, vector<1x32xf32>
    %cst_93 = arith.constant dense<0.000000e+00> : vector<3x64xf32>
    %217 = tpu.matmul %212, %213, %cst_93 {dimension_numbers = #tpu.dot_dimension_numbers<[1], [0], [0], [1], [0, 0, 1, 1], [], []>} : vector<3x32xf32>, vector<32x64xf32>, vector<3x64xf32> -> vector<3x64xf32>
    %218 = vector.broadcast %214 : vector<1x64xf32> to vector<3x64xf32>
    %219 = arith.addf %217, %218 : vector<3x64xf32>
    %cst_94 = arith.constant 5.000000e-01 : f32
    %220 = vector.broadcast %cst_94 : f32 to vector<3x64xf32>
    %221 = arith.mulf %220, %219 : vector<3x64xf32>
    %cst_95 = arith.constant 4.471500e-02 : f32
    %222 = vector.broadcast %cst_95 : f32 to vector<3x64xf32>
    %223 = arith.mulf %222, %219 : vector<3x64xf32>
    %224 = arith.mulf %223, %219 : vector<3x64xf32>
    %225 = arith.mulf %224, %219 : vector<3x64xf32>
    %226 = arith.addf %219, %225 : vector<3x64xf32>
    %cst_96 = arith.constant 0.797884583 : f32
    %227 = vector.broadcast %cst_96 : f32 to vector<3x64xf32>
    %228 = arith.mulf %227, %226 : vector<3x64xf32>
    %229 = math.tanh %228 : vector<3x64xf32>
    %cst_97 = arith.constant 1.000000e+00 : f32
    %230 = vector.broadcast %cst_97 : f32 to vector<3x64xf32>
    %231 = arith.addf %230, %229 : vector<3x64xf32>
    %232 = arith.mulf %221, %231 : vector<3x64xf32>
    %cst_98 = arith.constant dense<0.000000e+00> : vector<3x32xf32>
    %233 = tpu.matmul %232, %215, %cst_98 {dimension_numbers = #tpu.dot_dimension_numbers<[1], [0], [0], [1], [0, 0, 1, 1], [], []>} : vector<3x64xf32>, vector<64x32xf32>, vector<3x32xf32> -> vector<3x32xf32>
    %234 = vector.broadcast %216 : vector<1x32xf32> to vector<3x32xf32>
    %235 = arith.addf %233, %234 : vector<3x32xf32>
    %236 = arith.addf %212, %235 : vector<3x32xf32>
    %c0_99 = arith.constant 0 : index
    %c0_100 = arith.constant 0 : index
    %237 = vector.load %arg21[%c0_99, %c0_100] : memref<1x32xf32, #tpu.memory_space<vmem>>, vector<1x32xf32>
    %c0_101 = arith.constant 0 : index
    %c0_102 = arith.constant 0 : index
    %238 = vector.load %arg22[%c0_101, %c0_102] : memref<1x32xf32, #tpu.memory_space<vmem>>, vector<1x32xf32>
    %cst_103 = arith.constant dense<0.000000e+00> : vector<3xf32>
    %239 = vector.multi_reduction <add>, %236, %cst_103 [1] : vector<3x32xf32> to vector<3xf32>
    %240 = vector.shape_cast %239 : vector<3xf32> to vector<3x1xf32>
    %cst_104 = arith.constant 3.200000e+01 : f32
    %241 = vector.broadcast %cst_104 : f32 to vector<3x1xf32>
    %242 = arith.divf %240, %241 : vector<3x1xf32>
    %243 = vector.broadcast %242 : vector<3x1xf32> to vector<3x32xf32>
    %244 = arith.subf %236, %243 : vector<3x32xf32>
    %245 = vector.broadcast %242 : vector<3x1xf32> to vector<3x32xf32>
    %246 = arith.subf %236, %245 : vector<3x32xf32>
    %247 = arith.mulf %244, %246 : vector<3x32xf32>
    %cst_105 = arith.constant dense<0.000000e+00> : vector<3xf32>
    %248 = vector.multi_reduction <add>, %247, %cst_105 [1] : vector<3x32xf32> to vector<3xf32>
    %249 = vector.shape_cast %248 : vector<3xf32> to vector<3x1xf32>
    %cst_106 = arith.constant 3.200000e+01 : f32
    %250 = vector.broadcast %cst_106 : f32 to vector<3x1xf32>
    %251 = arith.divf %249, %250 : vector<3x1xf32>
    %252 = vector.broadcast %242 : vector<3x1xf32> to vector<3x32xf32>
    %253 = arith.subf %236, %252 : vector<3x32xf32>
    %cst_107 = arith.constant 9.99999974E-6 : f32
    %254 = vector.broadcast %cst_107 : f32 to vector<3x1xf32>
    %255 = arith.addf %251, %254 : vector<3x1xf32>
    %256 = math.rsqrt %255 : vector<3x1xf32>
    %257 = vector.broadcast %256 : vector<3x1xf32> to vector<3x32xf32>
    %258 = arith.mulf %253, %257 : vector<3x32xf32>
    %259 = vector.broadcast %237 : vector<1x32xf32> to vector<3x32xf32>
    %260 = arith.mulf %258, %259 : vector<3x32xf32>
    %261 = vector.broadcast %238 : vector<1x32xf32> to vector<3x32xf32>
    %262 = arith.addf %260, %261 : vector<3x32xf32>
    %c0_108 = arith.constant 0 : index
    %c0_109 = arith.constant 0 : index
    %c0_110 = arith.constant 0 : index
    %263 = vector.load %arg23[%c0_108, %c0_109, %c0_110] : memref<1x3x32xf32, #tpu.memory_space<vmem>>, vector<1x3x32xf32>
    %264 = vector.shape_cast %263 : vector<1x3x32xf32> to vector<3x32xf32>
    %265 = vector.shape_cast %262 : vector<3x32xf32> to vector<1x3x32xf32>
    tpu.vector_store %arg23[%c0_108, %c0_109, %c0_110], %265 {strides = array<i32>} : memref<1x3x32xf32, #tpu.memory_space<vmem>>, vector<1x3x32xf32>,
    return
  }
  func.func @transform_0(%arg0: i32) -> (i32, i32, i32) {
    %c0_i32 = arith.constant 0 : i32
    %c0_i32_0 = arith.constant 0 : i32
    %c0_i32_1 = arith.constant 0 : i32
    return %arg0, %c0_i32, %c0_i32_0 : i32, i32, i32
  }
  func.func @transform_1(%arg0: i32) -> (i32, i32, i32) {
    %c4_i32 = arith.constant 4 : i32
    %c0_i32 = arith.constant 0 : i32
    %0 = arith.cmpi eq, %c4_i32, %c0_i32 : i32
    %c1_i32 = arith.constant 1 : i32
    %1 = arith.select %0, %c1_i32, %c4_i32 : i32
    %2 = arith.remsi %arg0, %1 : i32
    %c0_i32_0 = arith.constant 0 : i32
    %3 = arith.cmpi ne, %2, %c0_i32_0 : i32
    %c0_i32_1 = arith.constant 0 : i32
    %4 = arith.cmpi slt, %2, %c0_i32_1 : i32
    %c0_i32_2 = arith.constant 0 : i32
    %5 = arith.cmpi slt, %1, %c0_i32_2 : i32
    %6 = arith.xori %4, %5 : i1
    %7 = arith.andi %6, %3 : i1
    %8 = arith.addi %2, %1 : i32
    %9 = arith.select %7, %8, %2 : i32
    %c0_i32_3 = arith.constant 0 : i32
    %c0_i32_4 = arith.constant 0 : i32
    %c0_i32_5 = arith.constant 0 : i32
    return %9, %c0_i32_3, %c0_i32_4 : i32, i32, i32
  }
  func.func @transform_2(%arg0: i32) -> (i32, i32) {
    %c0_i32 = arith.constant 0 : i32
    %c0_i32_0 = arith.constant 0 : i32
    %c0_i32_1 = arith.constant 0 : i32
    return %c0_i32, %c0_i32_0 : i32, i32
  }
  func.func @transform_3(%arg0: i32) -> (i32, i32) {
    %c0_i32 = arith.constant 0 : i32
    %c0_i32_0 = arith.constant 0 : i32
    %c0_i32_1 = arith.constant 0 : i32
    return %c0_i32, %c0_i32_0 : i32, i32
  }
  func.func @transform_4(%arg0: i32) -> (i32, i32) {
    %c0_i32 = arith.constant 0 : i32
    %c0_i32_0 = arith.constant 0 : i32
    %c0_i32_1 = arith.constant 0 : i32
    return %c0_i32, %c0_i32_0 : i32, i32
  }
  func.func @transform_5(%arg0: i32) -> (i32, i32) {
    %c0_i32 = arith.constant 0 : i32
    %c0_i32_0 = arith.constant 0 : i32
    %c0_i32_1 = arith.constant 0 : i32
    return %c0_i32, %c0_i32_0 : i32, i32
  }
  func.func @transform_6(%arg0: i32) -> (i32, i32) {
    %c0_i32 = arith.constant 0 : i32
    %c0_i32_0 = arith.constant 0 : i32
    %c0_i32_1 = arith.constant 0 : i32
    return %c0_i32, %c0_i32_0 : i32, i32
  }
  func.func @transform_7(%arg0: i32) -> (i32, i32) {
    %c0_i32 = arith.constant 0 : i32
    %c0_i32_0 = arith.constant 0 : i32
    %c0_i32_1 = arith.constant 0 : i32
    return %c0_i32, %c0_i32_0 : i32, i32
  }
  func.func @transform_8(%arg0: i32) -> (i32, i32) {
    %c0_i32 = arith.constant 0 : i32
    %c0_i32_0 = arith.constant 0 : i32
    %c0_i32_1 = arith.constant 0 : i32
    return %c0_i32, %c0_i32_0 : i32, i32
  }
  func.func @transform_9(%arg0: i32) -> (i32, i32) {
    %c0_i32 = arith.constant 0 : i32
    %c0_i32_0 = arith.constant 0 : i32
    %c0_i32_1 = arith.constant 0 : i32
    return %c0_i32, %c0_i32_0 : i32, i32
  }
  func.func @transform_10(%arg0: i32) -> (i32, i32) {
    %c0_i32 = arith.constant 0 : i32
    %c0_i32_0 = arith.constant 0 : i32
    %c0_i32_1 = arith.constant 0 : i32
    return %c0_i32, %c0_i32_0 : i32, i32
  }
  func.func @transform_11(%arg0: i32) -> (i32, i32) {
    %c0_i32 = arith.constant 0 : i32
    %c0_i32_0 = arith.constant 0 : i32
    %c0_i32_1 = arith.constant 0 : i32
    return %c0_i32, %c0_i32_0 : i32, i32
  }
  func.func @transform_12(%arg0: i32) -> (i32, i32) {
    %c0_i32 = arith.constant 0 : i32
    %c0_i32_0 = arith.constant 0 : i32
    %c0_i32_1 = arith.constant 0 : i32
    return %c0_i32, %c0_i32_0 : i32, i32
  }
  func.func @transform_13(%arg0: i32) -> (i32, i32) {
    %c0_i32 = arith.constant 0 : i32
    %c0_i32_0 = arith.constant 0 : i32
    %c0_i32_1 = arith.constant 0 : i32
    return %c0_i32, %c0_i32_0 : i32, i32
  }
  func.func @transform_14(%arg0: i32) -> (i32, i32) {
    %c0_i32 = arith.constant 0 : i32
    %c0_i32_0 = arith.constant 0 : i32
    %c0_i32_1 = arith.constant 0 : i32
    return %c0_i32, %c0_i32_0 : i32, i32
  }
  func.func @transform_15(%arg0: i32) -> (i32, i32) {
    %c0_i32 = arith.constant 0 : i32
    %c0_i32_0 = arith.constant 0 : i32
    %c0_i32_1 = arith.constant 0 : i32
    return %c0_i32, %c0_i32_0 : i32, i32
  }
  func.func @transform_16(%arg0: i32) -> (i32, i32) {
    %c0_i32 = arith.constant 0 : i32
    %c0_i32_0 = arith.constant 0 : i32
    %c0_i32_1 = arith.constant 0 : i32
    return %c0_i32, %c0_i32_0 : i32, i32
  }
  func.func @transform_17(%arg0: i32) -> (i32, i32) {
    %c0_i32 = arith.constant 0 : i32
    %c0_i32_0 = arith.constant 0 : i32
    %c0_i32_1 = arith.constant 0 : i32
    return %c0_i32, %c0_i32_0 : i32, i32
  }
  func.func @transform_18(%arg0: i32) -> (i32, i32) {
    %c0_i32 = arith.constant 0 : i32
    %c0_i32_0 = arith.constant 0 : i32
    %c0_i32_1 = arith.constant 0 : i32
    return %c0_i32, %c0_i32_0 : i32, i32
  }
  func.func @transform_19(%arg0: i32) -> (i32, i32) {
    %c0_i32 = arith.constant 0 : i32
    %c0_i32_0 = arith.constant 0 : i32
    %c0_i32_1 = arith.constant 0 : i32
    return %c0_i32, %c0_i32_0 : i32, i32
  }
  func.func @transform_20(%arg0: i32) -> (i32, i32) {
    %c0_i32 = arith.constant 0 : i32
    %c0_i32_0 = arith.constant 0 : i32
    %c0_i32_1 = arith.constant 0 : i32
    return %c0_i32, %c0_i32_0 : i32, i32
  }
  func.func @transform_21(%arg0: i32) -> (i32, i32) {
    %c0_i32 = arith.constant 0 : i32
    %c0_i32_0 = arith.constant 0 : i32
    %c0_i32_1 = arith.constant 0 : i32
    return %c0_i32, %c0_i32_0 : i32, i32
  }
  func.func @transform_22(%arg0: i32) -> (i32, i32, i32) {
    %c0_i32 = arith.constant 0 : i32
    %c0_i32_0 = arith.constant 0 : i32
    %c0_i32_1 = arith.constant 0 : i32
    return %arg0, %c0_i32, %c0_i32_0 : i32, i32, i32
  }
}

module attributes {stable_mosaic.version = 11 : i64} {
  func.func @_sa_block_kernel(%arg0: i32, %arg1: memref<1x4x32xf32, #tpu.memory_space<vmem>>, %arg2: memref<32x32xf32, #tpu.memory_space<vmem>>, %arg3: memref<1x32xf32, #tpu.memory_space<vmem>>, %arg4: memref<32x64xf32, #tpu.memory_space<vmem>>, %arg5: memref<1x64xf32, #tpu.memory_space<vmem>>, %arg6: memref<32x32xf32, #tpu.memory_space<vmem>>, %arg7: memref<1x32xf32, #tpu.memory_space<vmem>>, %arg8: memref<1x32xf32, #tpu.memory_space<vmem>>, %arg9: memref<1x32xf32, #tpu.memory_space<vmem>>, %arg10: memref<32x64xf32, #tpu.memory_space<vmem>>, %arg11: memref<1x64xf32, #tpu.memory_space<vmem>>, %arg12: memref<64x32xf32, #tpu.memory_space<vmem>>, %arg13: memref<1x32xf32, #tpu.memory_space<vmem>>, %arg14: memref<1x32xf32, #tpu.memory_space<vmem>>, %arg15: memref<1x32xf32, #tpu.memory_space<vmem>>, %arg16: memref<1x4x32xf32, #tpu.memory_space<vmem>>) attributes {dimension_semantics = [#tpu.dimension_semantics<parallel>], iteration_bounds = array<i64: 6>, scalar_prefetch = 0 : i64, scratch_operands = 0 : i64, tpu.core_type = #tpu.core_type<tc>, window_params = [{transform_indices = @transform_0, window_bounds = array<i64: 1, 4, 32>}, {pipeline_mode = #tpu.pipeline_mode<synchronous>, transform_indices = @transform_1, window_bounds = array<i64: 32, 32>}, {pipeline_mode = #tpu.pipeline_mode<synchronous>, transform_indices = @transform_2, window_bounds = array<i64: 1, 32>}, {pipeline_mode = #tpu.pipeline_mode<synchronous>, transform_indices = @transform_3, window_bounds = array<i64: 32, 64>}, {pipeline_mode = #tpu.pipeline_mode<synchronous>, transform_indices = @transform_4, window_bounds = array<i64: 1, 64>}, {pipeline_mode = #tpu.pipeline_mode<synchronous>, transform_indices = @transform_5, window_bounds = array<i64: 32, 32>}, {pipeline_mode = #tpu.pipeline_mode<synchronous>, transform_indices = @transform_6, window_bounds = array<i64: 1, 32>}, {pipeline_mode = #tpu.pipeline_mode<synchronous>, transform_indices = @transform_7, window_bounds = array<i64: 1, 32>}, {pipeline_mode = #tpu.pipeline_mode<synchronous>, transform_indices = @transform_8, window_bounds = array<i64: 1, 32>}, {pipeline_mode = #tpu.pipeline_mode<synchronous>, transform_indices = @transform_9, window_bounds = array<i64: 32, 64>}, {pipeline_mode = #tpu.pipeline_mode<synchronous>, transform_indices = @transform_10, window_bounds = array<i64: 1, 64>}, {pipeline_mode = #tpu.pipeline_mode<synchronous>, transform_indices = @transform_11, window_bounds = array<i64: 64, 32>}, {pipeline_mode = #tpu.pipeline_mode<synchronous>, transform_indices = @transform_12, window_bounds = array<i64: 1, 32>}, {pipeline_mode = #tpu.pipeline_mode<synchronous>, transform_indices = @transform_13, window_bounds = array<i64: 1, 32>}, {pipeline_mode = #tpu.pipeline_mode<synchronous>, transform_indices = @transform_14, window_bounds = array<i64: 1, 32>}, {transform_indices = @transform_15, window_bounds = array<i64: 1, 4, 32>}]} {
    %c0 = arith.constant 0 : index
    %c0_0 = arith.constant 0 : index
    %c0_1 = arith.constant 0 : index
    %0 = vector.load %arg1[%c0, %c0_0, %c0_1] : memref<1x4x32xf32, #tpu.memory_space<vmem>>, vector<1x4x32xf32>
    %1 = vector.shape_cast %0 : vector<1x4x32xf32> to vector<4x32xf32>
    %c0_2 = arith.constant 0 : index
    %c0_3 = arith.constant 0 : index
    %2 = vector.load %arg2[%c0_2, %c0_3] : memref<32x32xf32, #tpu.memory_space<vmem>>, vector<32x32xf32>
    %c0_4 = arith.constant 0 : index
    %c0_5 = arith.constant 0 : index
    %3 = vector.load %arg3[%c0_4, %c0_5] : memref<1x32xf32, #tpu.memory_space<vmem>>, vector<1x32xf32>
    %c0_6 = arith.constant 0 : index
    %c0_7 = arith.constant 0 : index
    %4 = vector.load %arg4[%c0_6, %c0_7] : memref<32x64xf32, #tpu.memory_space<vmem>>, vector<32x64xf32>
    %c0_8 = arith.constant 0 : index
    %c0_9 = arith.constant 0 : index
    %5 = vector.load %arg5[%c0_8, %c0_9] : memref<1x64xf32, #tpu.memory_space<vmem>>, vector<1x64xf32>
    %c0_10 = arith.constant 0 : index
    %c0_11 = arith.constant 0 : index
    %6 = vector.load %arg6[%c0_10, %c0_11] : memref<32x32xf32, #tpu.memory_space<vmem>>, vector<32x32xf32>
    %c0_12 = arith.constant 0 : index
    %c0_13 = arith.constant 0 : index
    %7 = vector.load %arg7[%c0_12, %c0_13] : memref<1x32xf32, #tpu.memory_space<vmem>>, vector<1x32xf32>
    %cst = arith.constant dense<0.000000e+00> : vector<4x32xf32>
    %8 = tpu.matmul %1, %2, %cst {dimension_numbers = #tpu.dot_dimension_numbers<[1], [0], [0], [1], [0, 0, 1, 1], [], []>} : vector<4x32xf32>, vector<32x32xf32>, vector<4x32xf32> -> vector<4x32xf32>
    %9 = vector.broadcast %3 : vector<1x32xf32> to vector<4x32xf32>
    %10 = arith.addf %8, %9 : vector<4x32xf32>
    %cst_14 = arith.constant 0.353553385 : f32
    %11 = vector.broadcast %cst_14 : f32 to vector<4x32xf32>
    %12 = arith.mulf %10, %11 : vector<4x32xf32>
    %cst_15 = arith.constant dense<0.000000e+00> : vector<4x64xf32>
    %13 = tpu.matmul %1, %4, %cst_15 {dimension_numbers = #tpu.dot_dimension_numbers<[1], [0], [0], [1], [0, 0, 1, 1], [], []>} : vector<4x32xf32>, vector<32x64xf32>, vector<4x64xf32> -> vector<4x64xf32>
    %14 = vector.broadcast %5 : vector<1x64xf32> to vector<4x64xf32>
    %15 = arith.addf %13, %14 : vector<4x64xf32>
    %16 = vector.extract_strided_slice %15 {offsets = [0, 0], sizes = [4, 32], strides = [1, 1]} : vector<4x64xf32> to vector<4x32xf32>
    %17 = vector.extract_strided_slice %15 {offsets = [0, 32], sizes = [4, 32], strides = [1, 1]} : vector<4x64xf32> to vector<4x32xf32>
    %cst_16 = arith.constant 0.000000e+00 : f32
    %18 = vector.broadcast %cst_16 : f32 to vector<4x32xf32>
    %19 = vector.broadcast %7 : vector<1x32xf32> to vector<4x32xf32>
    %20 = arith.addf %18, %19 : vector<4x32xf32>
    %21 = vector.extract_strided_slice %12 {offsets = [0, 0], sizes = [4, 8], strides = [1, 1]} : vector<4x32xf32> to vector<4x8xf32>
    %22 = vector.extract_strided_slice %16 {offsets = [0, 0], sizes = [4, 8], strides = [1, 1]} : vector<4x32xf32> to vector<4x8xf32>
    %cst_17 = arith.constant dense<0.000000e+00> : vector<4x4xf32>
    %23 = tpu.matmul %21, %22, %cst_17 {dimension_numbers = #tpu.dot_dimension_numbers<[1], [1], [0], [0], [0, 0, 1, 0], [], []>} : vector<4x8xf32>, vector<4x8xf32>, vector<4x4xf32> -> vector<4x4xf32>
    %cst_18 = arith.constant dense<0xFF800000> : vector<4xf32>
    %24 = vector.multi_reduction <maximumf>, %23, %cst_18 [1] : vector<4x4xf32> to vector<4xf32>
    %25 = vector.shape_cast %24 : vector<4xf32> to vector<4x1xf32>
    %26 = vector.broadcast %25 : vector<4x1xf32> to vector<4x4xf32>
    %27 = arith.subf %23, %26 : vector<4x4xf32>
    %28 = math.exp %27 : vector<4x4xf32>
    %cst_19 = arith.constant dense<0.000000e+00> : vector<4xf32>
    %29 = vector.multi_reduction <add>, %28, %cst_19 [1] : vector<4x4xf32> to vector<4xf32>
    %30 = vector.shape_cast %29 : vector<4xf32> to vector<4x1xf32>
    %31 = tpu.reciprocal %30 {approx = true} : vector<4x1xf32> -> vector<4x1xf32>
    %32 = vector.extract_strided_slice %17 {offsets = [0, 0], sizes = [4, 8], strides = [1, 1]} : vector<4x32xf32> to vector<4x8xf32>
    %cst_20 = arith.constant dense<0.000000e+00> : vector<4x8xf32>
    %33 = tpu.matmul %28, %32, %cst_20 {dimension_numbers = #tpu.dot_dimension_numbers<[1], [0], [0], [1], [0, 0, 1, 1], [], []>} : vector<4x4xf32>, vector<4x8xf32>, vector<4x8xf32> -> vector<4x8xf32>
    %34 = vector.broadcast %31 : vector<4x1xf32> to vector<4x8xf32>
    %35 = arith.mulf %33, %34 : vector<4x8xf32>
    %36 = vector.extract_strided_slice %6 {offsets = [0, 0], sizes = [8, 32], strides = [1, 1]} : vector<32x32xf32> to vector<8x32xf32>
    %cst_21 = arith.constant dense<0.000000e+00> : vector<4x32xf32>
    %37 = tpu.matmul %35, %36, %cst_21 {dimension_numbers = #tpu.dot_dimension_numbers<[1], [0], [0], [1], [0, 0, 1, 1], [], []>} : vector<4x8xf32>, vector<8x32xf32>, vector<4x32xf32> -> vector<4x32xf32>
    %38 = arith.addf %20, %37 : vector<4x32xf32>
    %39 = vector.extract_strided_slice %12 {offsets = [0, 8], sizes = [4, 8], strides = [1, 1]} : vector<4x32xf32> to vector<4x8xf32>
    %40 = vector.extract_strided_slice %16 {offsets = [0, 8], sizes = [4, 8], strides = [1, 1]} : vector<4x32xf32> to vector<4x8xf32>
    %cst_22 = arith.constant dense<0.000000e+00> : vector<4x4xf32>
    %41 = tpu.matmul %39, %40, %cst_22 {dimension_numbers = #tpu.dot_dimension_numbers<[1], [1], [0], [0], [0, 0, 1, 0], [], []>} : vector<4x8xf32>, vector<4x8xf32>, vector<4x4xf32> -> vector<4x4xf32>
    %cst_23 = arith.constant dense<0xFF800000> : vector<4xf32>
    %42 = vector.multi_reduction <maximumf>, %41, %cst_23 [1] : vector<4x4xf32> to vector<4xf32>
    %43 = vector.shape_cast %42 : vector<4xf32> to vector<4x1xf32>
    %44 = vector.broadcast %43 : vector<4x1xf32> to vector<4x4xf32>
    %45 = arith.subf %41, %44 : vector<4x4xf32>
    %46 = math.exp %45 : vector<4x4xf32>
    %cst_24 = arith.constant dense<0.000000e+00> : vector<4xf32>
    %47 = vector.multi_reduction <add>, %46, %cst_24 [1] : vector<4x4xf32> to vector<4xf32>
    %48 = vector.shape_cast %47 : vector<4xf32> to vector<4x1xf32>
    %49 = tpu.reciprocal %48 {approx = true} : vector<4x1xf32> -> vector<4x1xf32>
    %50 = vector.extract_strided_slice %17 {offsets = [0, 8], sizes = [4, 8], strides = [1, 1]} : vector<4x32xf32> to vector<4x8xf32>
    %cst_25 = arith.constant dense<0.000000e+00> : vector<4x8xf32>
    %51 = tpu.matmul %46, %50, %cst_25 {dimension_numbers = #tpu.dot_dimension_numbers<[1], [0], [0], [1], [0, 0, 1, 1], [], []>} : vector<4x4xf32>, vector<4x8xf32>, vector<4x8xf32> -> vector<4x8xf32>
    %52 = vector.broadcast %49 : vector<4x1xf32> to vector<4x8xf32>
    %53 = arith.mulf %51, %52 : vector<4x8xf32>
    %54 = vector.extract_strided_slice %6 {offsets = [8, 0], sizes = [8, 32], strides = [1, 1]} : vector<32x32xf32> to vector<8x32xf32>
    %cst_26 = arith.constant dense<0.000000e+00> : vector<4x32xf32>
    %55 = tpu.matmul %53, %54, %cst_26 {dimension_numbers = #tpu.dot_dimension_numbers<[1], [0], [0], [1], [0, 0, 1, 1], [], []>} : vector<4x8xf32>, vector<8x32xf32>, vector<4x32xf32> -> vector<4x32xf32>
    %56 = arith.addf %38, %55 : vector<4x32xf32>
    %57 = vector.extract_strided_slice %12 {offsets = [0, 16], sizes = [4, 8], strides = [1, 1]} : vector<4x32xf32> to vector<4x8xf32>
    %58 = vector.extract_strided_slice %16 {offsets = [0, 16], sizes = [4, 8], strides = [1, 1]} : vector<4x32xf32> to vector<4x8xf32>
    %cst_27 = arith.constant dense<0.000000e+00> : vector<4x4xf32>
    %59 = tpu.matmul %57, %58, %cst_27 {dimension_numbers = #tpu.dot_dimension_numbers<[1], [1], [0], [0], [0, 0, 1, 0], [], []>} : vector<4x8xf32>, vector<4x8xf32>, vector<4x4xf32> -> vector<4x4xf32>
    %cst_28 = arith.constant dense<0xFF800000> : vector<4xf32>
    %60 = vector.multi_reduction <maximumf>, %59, %cst_28 [1] : vector<4x4xf32> to vector<4xf32>
    %61 = vector.shape_cast %60 : vector<4xf32> to vector<4x1xf32>
    %62 = vector.broadcast %61 : vector<4x1xf32> to vector<4x4xf32>
    %63 = arith.subf %59, %62 : vector<4x4xf32>
    %64 = math.exp %63 : vector<4x4xf32>
    %cst_29 = arith.constant dense<0.000000e+00> : vector<4xf32>
    %65 = vector.multi_reduction <add>, %64, %cst_29 [1] : vector<4x4xf32> to vector<4xf32>
    %66 = vector.shape_cast %65 : vector<4xf32> to vector<4x1xf32>
    %67 = tpu.reciprocal %66 {approx = true} : vector<4x1xf32> -> vector<4x1xf32>
    %68 = vector.extract_strided_slice %17 {offsets = [0, 16], sizes = [4, 8], strides = [1, 1]} : vector<4x32xf32> to vector<4x8xf32>
    %cst_30 = arith.constant dense<0.000000e+00> : vector<4x8xf32>
    %69 = tpu.matmul %64, %68, %cst_30 {dimension_numbers = #tpu.dot_dimension_numbers<[1], [0], [0], [1], [0, 0, 1, 1], [], []>} : vector<4x4xf32>, vector<4x8xf32>, vector<4x8xf32> -> vector<4x8xf32>
    %70 = vector.broadcast %67 : vector<4x1xf32> to vector<4x8xf32>
    %71 = arith.mulf %69, %70 : vector<4x8xf32>
    %72 = vector.extract_strided_slice %6 {offsets = [16, 0], sizes = [8, 32], strides = [1, 1]} : vector<32x32xf32> to vector<8x32xf32>
    %cst_31 = arith.constant dense<0.000000e+00> : vector<4x32xf32>
    %73 = tpu.matmul %71, %72, %cst_31 {dimension_numbers = #tpu.dot_dimension_numbers<[1], [0], [0], [1], [0, 0, 1, 1], [], []>} : vector<4x8xf32>, vector<8x32xf32>, vector<4x32xf32> -> vector<4x32xf32>
    %74 = arith.addf %56, %73 : vector<4x32xf32>
    %75 = vector.extract_strided_slice %12 {offsets = [0, 24], sizes = [4, 8], strides = [1, 1]} : vector<4x32xf32> to vector<4x8xf32>
    %76 = vector.extract_strided_slice %16 {offsets = [0, 24], sizes = [4, 8], strides = [1, 1]} : vector<4x32xf32> to vector<4x8xf32>
    %cst_32 = arith.constant dense<0.000000e+00> : vector<4x4xf32>
    %77 = tpu.matmul %75, %76, %cst_32 {dimension_numbers = #tpu.dot_dimension_numbers<[1], [1], [0], [0], [0, 0, 1, 0], [], []>} : vector<4x8xf32>, vector<4x8xf32>, vector<4x4xf32> -> vector<4x4xf32>
    %cst_33 = arith.constant dense<0xFF800000> : vector<4xf32>
    %78 = vector.multi_reduction <maximumf>, %77, %cst_33 [1] : vector<4x4xf32> to vector<4xf32>
    %79 = vector.shape_cast %78 : vector<4xf32> to vector<4x1xf32>
    %80 = vector.broadcast %79 : vector<4x1xf32> to vector<4x4xf32>
    %81 = arith.subf %77, %80 : vector<4x4xf32>
    %82 = math.exp %81 : vector<4x4xf32>
    %cst_34 = arith.constant dense<0.000000e+00> : vector<4xf32>
    %83 = vector.multi_reduction <add>, %82, %cst_34 [1] : vector<4x4xf32> to vector<4xf32>
    %84 = vector.shape_cast %83 : vector<4xf32> to vector<4x1xf32>
    %85 = tpu.reciprocal %84 {approx = true} : vector<4x1xf32> -> vector<4x1xf32>
    %86 = vector.extract_strided_slice %17 {offsets = [0, 24], sizes = [4, 8], strides = [1, 1]} : vector<4x32xf32> to vector<4x8xf32>
    %cst_35 = arith.constant dense<0.000000e+00> : vector<4x8xf32>
    %87 = tpu.matmul %82, %86, %cst_35 {dimension_numbers = #tpu.dot_dimension_numbers<[1], [0], [0], [1], [0, 0, 1, 1], [], []>} : vector<4x4xf32>, vector<4x8xf32>, vector<4x8xf32> -> vector<4x8xf32>
    %88 = vector.broadcast %85 : vector<4x1xf32> to vector<4x8xf32>
    %89 = arith.mulf %87, %88 : vector<4x8xf32>
    %90 = vector.extract_strided_slice %6 {offsets = [24, 0], sizes = [8, 32], strides = [1, 1]} : vector<32x32xf32> to vector<8x32xf32>
    %cst_36 = arith.constant dense<0.000000e+00> : vector<4x32xf32>
    %91 = tpu.matmul %89, %90, %cst_36 {dimension_numbers = #tpu.dot_dimension_numbers<[1], [0], [0], [1], [0, 0, 1, 1], [], []>} : vector<4x8xf32>, vector<8x32xf32>, vector<4x32xf32> -> vector<4x32xf32>
    %92 = arith.addf %74, %91 : vector<4x32xf32>
    %93 = arith.addf %1, %92 : vector<4x32xf32>
    %c0_37 = arith.constant 0 : index
    %c0_38 = arith.constant 0 : index
    %94 = vector.load %arg8[%c0_37, %c0_38] : memref<1x32xf32, #tpu.memory_space<vmem>>, vector<1x32xf32>
    %c0_39 = arith.constant 0 : index
    %c0_40 = arith.constant 0 : index
    %95 = vector.load %arg9[%c0_39, %c0_40] : memref<1x32xf32, #tpu.memory_space<vmem>>, vector<1x32xf32>
    %cst_41 = arith.constant dense<0.000000e+00> : vector<4xf32>
    %96 = vector.multi_reduction <add>, %93, %cst_41 [1] : vector<4x32xf32> to vector<4xf32>
    %97 = vector.shape_cast %96 : vector<4xf32> to vector<4x1xf32>
    %cst_42 = arith.constant 3.200000e+01 : f32
    %98 = vector.broadcast %cst_42 : f32 to vector<4x1xf32>
    %99 = arith.divf %97, %98 : vector<4x1xf32>
    %100 = vector.broadcast %99 : vector<4x1xf32> to vector<4x32xf32>
    %101 = arith.subf %93, %100 : vector<4x32xf32>
    %102 = vector.broadcast %99 : vector<4x1xf32> to vector<4x32xf32>
    %103 = arith.subf %93, %102 : vector<4x32xf32>
    %104 = arith.mulf %101, %103 : vector<4x32xf32>
    %cst_43 = arith.constant dense<0.000000e+00> : vector<4xf32>
    %105 = vector.multi_reduction <add>, %104, %cst_43 [1] : vector<4x32xf32> to vector<4xf32>
    %106 = vector.shape_cast %105 : vector<4xf32> to vector<4x1xf32>
    %cst_44 = arith.constant 3.200000e+01 : f32
    %107 = vector.broadcast %cst_44 : f32 to vector<4x1xf32>
    %108 = arith.divf %106, %107 : vector<4x1xf32>
    %109 = vector.broadcast %99 : vector<4x1xf32> to vector<4x32xf32>
    %110 = arith.subf %93, %109 : vector<4x32xf32>
    %cst_45 = arith.constant 9.99999974E-6 : f32
    %111 = vector.broadcast %cst_45 : f32 to vector<4x1xf32>
    %112 = arith.addf %108, %111 : vector<4x1xf32>
    %113 = math.rsqrt %112 : vector<4x1xf32>
    %114 = vector.broadcast %113 : vector<4x1xf32> to vector<4x32xf32>
    %115 = arith.mulf %110, %114 : vector<4x32xf32>
    %116 = vector.broadcast %94 : vector<1x32xf32> to vector<4x32xf32>
    %117 = arith.mulf %115, %116 : vector<4x32xf32>
    %118 = vector.broadcast %95 : vector<1x32xf32> to vector<4x32xf32>
    %119 = arith.addf %117, %118 : vector<4x32xf32>
    %c0_46 = arith.constant 0 : index
    %c0_47 = arith.constant 0 : index
    %120 = vector.load %arg10[%c0_46, %c0_47] : memref<32x64xf32, #tpu.memory_space<vmem>>, vector<32x64xf32>
    %c0_48 = arith.constant 0 : index
    %c0_49 = arith.constant 0 : index
    %121 = vector.load %arg11[%c0_48, %c0_49] : memref<1x64xf32, #tpu.memory_space<vmem>>, vector<1x64xf32>
    %c0_50 = arith.constant 0 : index
    %c0_51 = arith.constant 0 : index
    %122 = vector.load %arg12[%c0_50, %c0_51] : memref<64x32xf32, #tpu.memory_space<vmem>>, vector<64x32xf32>
    %c0_52 = arith.constant 0 : index
    %c0_53 = arith.constant 0 : index
    %123 = vector.load %arg13[%c0_52, %c0_53] : memref<1x32xf32, #tpu.memory_space<vmem>>, vector<1x32xf32>
    %cst_54 = arith.constant dense<0.000000e+00> : vector<4x64xf32>
    %124 = tpu.matmul %119, %120, %cst_54 {dimension_numbers = #tpu.dot_dimension_numbers<[1], [0], [0], [1], [0, 0, 1, 1], [], []>} : vector<4x32xf32>, vector<32x64xf32>, vector<4x64xf32> -> vector<4x64xf32>
    %125 = vector.broadcast %121 : vector<1x64xf32> to vector<4x64xf32>
    %126 = arith.addf %124, %125 : vector<4x64xf32>
    %cst_55 = arith.constant 5.000000e-01 : f32
    %127 = vector.broadcast %cst_55 : f32 to vector<4x64xf32>
    %128 = arith.mulf %127, %126 : vector<4x64xf32>
    %cst_56 = arith.constant 4.471500e-02 : f32
    %129 = vector.broadcast %cst_56 : f32 to vector<4x64xf32>
    %130 = arith.mulf %129, %126 : vector<4x64xf32>
    %131 = arith.mulf %130, %126 : vector<4x64xf32>
    %132 = arith.mulf %131, %126 : vector<4x64xf32>
    %133 = arith.addf %126, %132 : vector<4x64xf32>
    %cst_57 = arith.constant 0.797884583 : f32
    %134 = vector.broadcast %cst_57 : f32 to vector<4x64xf32>
    %135 = arith.mulf %134, %133 : vector<4x64xf32>
    %136 = math.tanh %135 : vector<4x64xf32>
    %cst_58 = arith.constant 1.000000e+00 : f32
    %137 = vector.broadcast %cst_58 : f32 to vector<4x64xf32>
    %138 = arith.addf %137, %136 : vector<4x64xf32>
    %139 = arith.mulf %128, %138 : vector<4x64xf32>
    %cst_59 = arith.constant dense<0.000000e+00> : vector<4x32xf32>
    %140 = tpu.matmul %139, %122, %cst_59 {dimension_numbers = #tpu.dot_dimension_numbers<[1], [0], [0], [1], [0, 0, 1, 1], [], []>} : vector<4x64xf32>, vector<64x32xf32>, vector<4x32xf32> -> vector<4x32xf32>
    %141 = vector.broadcast %123 : vector<1x32xf32> to vector<4x32xf32>
    %142 = arith.addf %140, %141 : vector<4x32xf32>
    %143 = arith.addf %119, %142 : vector<4x32xf32>
    %c0_60 = arith.constant 0 : index
    %c0_61 = arith.constant 0 : index
    %144 = vector.load %arg14[%c0_60, %c0_61] : memref<1x32xf32, #tpu.memory_space<vmem>>, vector<1x32xf32>
    %c0_62 = arith.constant 0 : index
    %c0_63 = arith.constant 0 : index
    %145 = vector.load %arg15[%c0_62, %c0_63] : memref<1x32xf32, #tpu.memory_space<vmem>>, vector<1x32xf32>
    %cst_64 = arith.constant dense<0.000000e+00> : vector<4xf32>
    %146 = vector.multi_reduction <add>, %143, %cst_64 [1] : vector<4x32xf32> to vector<4xf32>
    %147 = vector.shape_cast %146 : vector<4xf32> to vector<4x1xf32>
    %cst_65 = arith.constant 3.200000e+01 : f32
    %148 = vector.broadcast %cst_65 : f32 to vector<4x1xf32>
    %149 = arith.divf %147, %148 : vector<4x1xf32>
    %150 = vector.broadcast %149 : vector<4x1xf32> to vector<4x32xf32>
    %151 = arith.subf %143, %150 : vector<4x32xf32>
    %152 = vector.broadcast %149 : vector<4x1xf32> to vector<4x32xf32>
    %153 = arith.subf %143, %152 : vector<4x32xf32>
    %154 = arith.mulf %151, %153 : vector<4x32xf32>
    %cst_66 = arith.constant dense<0.000000e+00> : vector<4xf32>
    %155 = vector.multi_reduction <add>, %154, %cst_66 [1] : vector<4x32xf32> to vector<4xf32>
    %156 = vector.shape_cast %155 : vector<4xf32> to vector<4x1xf32>
    %cst_67 = arith.constant 3.200000e+01 : f32
    %157 = vector.broadcast %cst_67 : f32 to vector<4x1xf32>
    %158 = arith.divf %156, %157 : vector<4x1xf32>
    %159 = vector.broadcast %149 : vector<4x1xf32> to vector<4x32xf32>
    %160 = arith.subf %143, %159 : vector<4x32xf32>
    %cst_68 = arith.constant 9.99999974E-6 : f32
    %161 = vector.broadcast %cst_68 : f32 to vector<4x1xf32>
    %162 = arith.addf %158, %161 : vector<4x1xf32>
    %163 = math.rsqrt %162 : vector<4x1xf32>
    %164 = vector.broadcast %163 : vector<4x1xf32> to vector<4x32xf32>
    %165 = arith.mulf %160, %164 : vector<4x32xf32>
    %166 = vector.broadcast %144 : vector<1x32xf32> to vector<4x32xf32>
    %167 = arith.mulf %165, %166 : vector<4x32xf32>
    %168 = vector.broadcast %145 : vector<1x32xf32> to vector<4x32xf32>
    %169 = arith.addf %167, %168 : vector<4x32xf32>
    %c0_69 = arith.constant 0 : index
    %c0_70 = arith.constant 0 : index
    %c0_71 = arith.constant 0 : index
    %170 = vector.load %arg16[%c0_69, %c0_70, %c0_71] : memref<1x4x32xf32, #tpu.memory_space<vmem>>, vector<1x4x32xf32>
    %171 = vector.shape_cast %170 : vector<1x4x32xf32> to vector<4x32xf32>
    %172 = vector.shape_cast %169 : vector<4x32xf32> to vector<1x4x32xf32>
    tpu.vector_store %arg16[%c0_69, %c0_70, %c0_71], %172 {strides = array<i32>} : memref<1x4x32xf32, #tpu.memory_space<vmem>>, vector<1x4x32xf32>,
    return
  }
  func.func @transform_0(%arg0: i32) -> (i32, i32, i32) {
    %c0_i32 = arith.constant 0 : i32
    %c0_i32_0 = arith.constant 0 : i32
    %c0_i32_1 = arith.constant 0 : i32
    return %arg0, %c0_i32, %c0_i32_0 : i32, i32, i32
  }
  func.func @transform_1(%arg0: i32) -> (i32, i32) {
    %c0_i32 = arith.constant 0 : i32
    %c0_i32_0 = arith.constant 0 : i32
    %c0_i32_1 = arith.constant 0 : i32
    return %c0_i32, %c0_i32_0 : i32, i32
  }
  func.func @transform_2(%arg0: i32) -> (i32, i32) {
    %c0_i32 = arith.constant 0 : i32
    %c0_i32_0 = arith.constant 0 : i32
    %c0_i32_1 = arith.constant 0 : i32
    return %c0_i32, %c0_i32_0 : i32, i32
  }
  func.func @transform_3(%arg0: i32) -> (i32, i32) {
    %c0_i32 = arith.constant 0 : i32
    %c0_i32_0 = arith.constant 0 : i32
    %c0_i32_1 = arith.constant 0 : i32
    return %c0_i32, %c0_i32_0 : i32, i32
  }
  func.func @transform_4(%arg0: i32) -> (i32, i32) {
    %c0_i32 = arith.constant 0 : i32
    %c0_i32_0 = arith.constant 0 : i32
    %c0_i32_1 = arith.constant 0 : i32
    return %c0_i32, %c0_i32_0 : i32, i32
  }
  func.func @transform_5(%arg0: i32) -> (i32, i32) {
    %c0_i32 = arith.constant 0 : i32
    %c0_i32_0 = arith.constant 0 : i32
    %c0_i32_1 = arith.constant 0 : i32
    return %c0_i32, %c0_i32_0 : i32, i32
  }
  func.func @transform_6(%arg0: i32) -> (i32, i32) {
    %c0_i32 = arith.constant 0 : i32
    %c0_i32_0 = arith.constant 0 : i32
    %c0_i32_1 = arith.constant 0 : i32
    return %c0_i32, %c0_i32_0 : i32, i32
  }
  func.func @transform_7(%arg0: i32) -> (i32, i32) {
    %c0_i32 = arith.constant 0 : i32
    %c0_i32_0 = arith.constant 0 : i32
    %c0_i32_1 = arith.constant 0 : i32
    return %c0_i32, %c0_i32_0 : i32, i32
  }
  func.func @transform_8(%arg0: i32) -> (i32, i32) {
    %c0_i32 = arith.constant 0 : i32
    %c0_i32_0 = arith.constant 0 : i32
    %c0_i32_1 = arith.constant 0 : i32
    return %c0_i32, %c0_i32_0 : i32, i32
  }
  func.func @transform_9(%arg0: i32) -> (i32, i32) {
    %c0_i32 = arith.constant 0 : i32
    %c0_i32_0 = arith.constant 0 : i32
    %c0_i32_1 = arith.constant 0 : i32
    return %c0_i32, %c0_i32_0 : i32, i32
  }
  func.func @transform_10(%arg0: i32) -> (i32, i32) {
    %c0_i32 = arith.constant 0 : i32
    %c0_i32_0 = arith.constant 0 : i32
    %c0_i32_1 = arith.constant 0 : i32
    return %c0_i32, %c0_i32_0 : i32, i32
  }
  func.func @transform_11(%arg0: i32) -> (i32, i32) {
    %c0_i32 = arith.constant 0 : i32
    %c0_i32_0 = arith.constant 0 : i32
    %c0_i32_1 = arith.constant 0 : i32
    return %c0_i32, %c0_i32_0 : i32, i32
  }
  func.func @transform_12(%arg0: i32) -> (i32, i32) {
    %c0_i32 = arith.constant 0 : i32
    %c0_i32_0 = arith.constant 0 : i32
    %c0_i32_1 = arith.constant 0 : i32
    return %c0_i32, %c0_i32_0 : i32, i32
  }
  func.func @transform_13(%arg0: i32) -> (i32, i32) {
    %c0_i32 = arith.constant 0 : i32
    %c0_i32_0 = arith.constant 0 : i32
    %c0_i32_1 = arith.constant 0 : i32
    return %c0_i32, %c0_i32_0 : i32, i32
  }
  func.func @transform_14(%arg0: i32) -> (i32, i32) {
    %c0_i32 = arith.constant 0 : i32
    %c0_i32_0 = arith.constant 0 : i32
    %c0_i32_1 = arith.constant 0 : i32
    return %c0_i32, %c0_i32_0 : i32, i32
  }
  func.func @transform_15(%arg0: i32) -> (i32, i32, i32) {
    %c0_i32 = arith.constant 0 : i32
    %c0_i32_0 = arith.constant 0 : i32
    %c0_i32_1 = arith.constant 0 : i32
    return %arg0, %c0_i32, %c0_i32_0 : i32, i32, i32
  }
}

module attributes {stable_mosaic.version = 11 : i64} {
  func.func @_gsh_tail_kernel(%arg0: i32, %arg1: memref<1x4x32xf32, #tpu.memory_space<vmem>>, %arg2: memref<1x4x32xf32, #tpu.memory_space<vmem>>, %arg3: memref<32x32xf32, #tpu.memory_space<vmem>>, %arg4: memref<1x32xf32, #tpu.memory_space<vmem>>, %arg5: memref<32x64xf32, #tpu.memory_space<vmem>>, %arg6: memref<1x64xf32, #tpu.memory_space<vmem>>, %arg7: memref<32x32xf32, #tpu.memory_space<vmem>>, %arg8: memref<1x32xf32, #tpu.memory_space<vmem>>, %arg9: memref<1x32xf32, #tpu.memory_space<vmem>>, %arg10: memref<1x32xf32, #tpu.memory_space<vmem>>, %arg11: memref<32x32xf32, #tpu.memory_space<vmem>>, %arg12: memref<1x32xf32, #tpu.memory_space<vmem>>, %arg13: memref<32x32xf32, #tpu.memory_space<vmem>>, %arg14: memref<1x32xf32, #tpu.memory_space<vmem>>, %arg15: memref<1x32xf32, #tpu.memory_space<vmem>>, %arg16: memref<1x32xf32, #tpu.memory_space<vmem>>, %arg17: memref<32x8xf32, #tpu.memory_space<vmem>>, %arg18: memref<1x8xf32, #tpu.memory_space<vmem>>, %arg19: memref<1x4x32xf32, #tpu.memory_space<vmem>>, %arg20: memref<1x4x8xf32, #tpu.memory_space<vmem>>) attributes {dimension_semantics = [#tpu.dimension_semantics<parallel>], iteration_bounds = array<i64: 6>, scalar_prefetch = 0 : i64, scratch_operands = 0 : i64, tpu.core_type = #tpu.core_type<tc>, window_params = [{transform_indices = @transform_0, window_bounds = array<i64: 1, 4, 32>}, {transform_indices = @transform_1, window_bounds = array<i64: 1, 4, 32>}, {pipeline_mode = #tpu.pipeline_mode<synchronous>, transform_indices = @transform_2, window_bounds = array<i64: 32, 32>}, {pipeline_mode = #tpu.pipeline_mode<synchronous>, transform_indices = @transform_3, window_bounds = array<i64: 1, 32>}, {pipeline_mode = #tpu.pipeline_mode<synchronous>, transform_indices = @transform_4, window_bounds = array<i64: 32, 64>}, {pipeline_mode = #tpu.pipeline_mode<synchronous>, transform_indices = @transform_5, window_bounds = array<i64: 1, 64>}, {pipeline_mode = #tpu.pipeline_mode<synchronous>, transform_indices = @transform_6, window_bounds = array<i64: 32, 32>}, {pipeline_mode = #tpu.pipeline_mode<synchronous>, transform_indices = @transform_7, window_bounds = array<i64: 1, 32>}, {pipeline_mode = #tpu.pipeline_mode<synchronous>, transform_indices = @transform_8, window_bounds = array<i64: 1, 32>}, {pipeline_mode = #tpu.pipeline_mode<synchronous>, transform_indices = @transform_9, window_bounds = array<i64: 1, 32>}, {pipeline_mode = #tpu.pipeline_mode<synchronous>, transform_indices = @transform_10, window_bounds = array<i64: 32, 32>}, {pipeline_mode = #tpu.pipeline_mode<synchronous>, transform_indices = @transform_11, window_bounds = array<i64: 1, 32>}, {pipeline_mode = #tpu.pipeline_mode<synchronous>, transform_indices = @transform_12, window_bounds = array<i64: 32, 32>}, {pipeline_mode = #tpu.pipeline_mode<synchronous>, transform_indices = @transform_13, window_bounds = array<i64: 1, 32>}, {pipeline_mode = #tpu.pipeline_mode<synchronous>, transform_indices = @transform_14, window_bounds = array<i64: 1, 32>}, {pipeline_mode = #tpu.pipeline_mode<synchronous>, transform_indices = @transform_15, window_bounds = array<i64: 1, 32>}, {pipeline_mode = #tpu.pipeline_mode<synchronous>, transform_indices = @transform_16, window_bounds = array<i64: 32, 8>}, {pipeline_mode = #tpu.pipeline_mode<synchronous>, transform_indices = @transform_17, window_bounds = array<i64: 1, 8>}, {transform_indices = @transform_18, window_bounds = array<i64: 1, 4, 32>}, {transform_indices = @transform_19, window_bounds = array<i64: 1, 4, 8>}]} {
    %c0 = arith.constant 0 : index
    %c0_0 = arith.constant 0 : index
    %c0_1 = arith.constant 0 : index
    %0 = vector.load %arg1[%c0, %c0_0, %c0_1] : memref<1x4x32xf32, #tpu.memory_space<vmem>>, vector<1x4x32xf32>
    %1 = vector.shape_cast %0 : vector<1x4x32xf32> to vector<4x32xf32>
    %c0_2 = arith.constant 0 : index
    %c0_3 = arith.constant 0 : index
    %c0_4 = arith.constant 0 : index
    %2 = vector.load %arg2[%c0_2, %c0_3, %c0_4] : memref<1x4x32xf32, #tpu.memory_space<vmem>>, vector<1x4x32xf32>
    %3 = vector.shape_cast %2 : vector<1x4x32xf32> to vector<4x32xf32>
    %c0_5 = arith.constant 0 : index
    %c0_6 = arith.constant 0 : index
    %4 = vector.load %arg3[%c0_5, %c0_6] : memref<32x32xf32, #tpu.memory_space<vmem>>, vector<32x32xf32>
    %c0_7 = arith.constant 0 : index
    %c0_8 = arith.constant 0 : index
    %5 = vector.load %arg4[%c0_7, %c0_8] : memref<1x32xf32, #tpu.memory_space<vmem>>, vector<1x32xf32>
    %c0_9 = arith.constant 0 : index
    %c0_10 = arith.constant 0 : index
    %6 = vector.load %arg5[%c0_9, %c0_10] : memref<32x64xf32, #tpu.memory_space<vmem>>, vector<32x64xf32>
    %c0_11 = arith.constant 0 : index
    %c0_12 = arith.constant 0 : index
    %7 = vector.load %arg6[%c0_11, %c0_12] : memref<1x64xf32, #tpu.memory_space<vmem>>, vector<1x64xf32>
    %c0_13 = arith.constant 0 : index
    %c0_14 = arith.constant 0 : index
    %8 = vector.load %arg7[%c0_13, %c0_14] : memref<32x32xf32, #tpu.memory_space<vmem>>, vector<32x32xf32>
    %c0_15 = arith.constant 0 : index
    %c0_16 = arith.constant 0 : index
    %9 = vector.load %arg8[%c0_15, %c0_16] : memref<1x32xf32, #tpu.memory_space<vmem>>, vector<1x32xf32>
    %cst = arith.constant dense<0.000000e+00> : vector<4x32xf32>
    %10 = tpu.matmul %1, %4, %cst {dimension_numbers = #tpu.dot_dimension_numbers<[1], [0], [0], [1], [0, 0, 1, 1], [], []>} : vector<4x32xf32>, vector<32x32xf32>, vector<4x32xf32> -> vector<4x32xf32>
    %11 = vector.broadcast %5 : vector<1x32xf32> to vector<4x32xf32>
    %12 = arith.addf %10, %11 : vector<4x32xf32>
    %cst_17 = arith.constant 0.353553385 : f32
    %13 = vector.broadcast %cst_17 : f32 to vector<4x32xf32>
    %14 = arith.mulf %12, %13 : vector<4x32xf32>
    %cst_18 = arith.constant dense<0.000000e+00> : vector<4x64xf32>
    %15 = tpu.matmul %3, %6, %cst_18 {dimension_numbers = #tpu.dot_dimension_numbers<[1], [0], [0], [1], [0, 0, 1, 1], [], []>} : vector<4x32xf32>, vector<32x64xf32>, vector<4x64xf32> -> vector<4x64xf32>
    %16 = vector.broadcast %7 : vector<1x64xf32> to vector<4x64xf32>
    %17 = arith.addf %15, %16 : vector<4x64xf32>
    %18 = vector.extract_strided_slice %17 {offsets = [0, 0], sizes = [4, 32], strides = [1, 1]} : vector<4x64xf32> to vector<4x32xf32>
    %19 = vector.extract_strided_slice %17 {offsets = [0, 32], sizes = [4, 32], strides = [1, 1]} : vector<4x64xf32> to vector<4x32xf32>
    %cst_19 = arith.constant 0.000000e+00 : f32
    %20 = vector.broadcast %cst_19 : f32 to vector<4x32xf32>
    %21 = vector.broadcast %9 : vector<1x32xf32> to vector<4x32xf32>
    %22 = arith.addf %20, %21 : vector<4x32xf32>
    %23 = vector.extract_strided_slice %14 {offsets = [0, 0], sizes = [4, 8], strides = [1, 1]} : vector<4x32xf32> to vector<4x8xf32>
    %24 = vector.extract_strided_slice %18 {offsets = [0, 0], sizes = [4, 8], strides = [1, 1]} : vector<4x32xf32> to vector<4x8xf32>
    %cst_20 = arith.constant dense<0.000000e+00> : vector<4x4xf32>
    %25 = tpu.matmul %23, %24, %cst_20 {dimension_numbers = #tpu.dot_dimension_numbers<[1], [1], [0], [0], [0, 0, 1, 0], [], []>} : vector<4x8xf32>, vector<4x8xf32>, vector<4x4xf32> -> vector<4x4xf32>
    %cst_21 = arith.constant dense<0xFF800000> : vector<4xf32>
    %26 = vector.multi_reduction <maximumf>, %25, %cst_21 [1] : vector<4x4xf32> to vector<4xf32>
    %27 = vector.shape_cast %26 : vector<4xf32> to vector<4x1xf32>
    %28 = vector.broadcast %27 : vector<4x1xf32> to vector<4x4xf32>
    %29 = arith.subf %25, %28 : vector<4x4xf32>
    %30 = math.exp %29 : vector<4x4xf32>
    %cst_22 = arith.constant dense<0.000000e+00> : vector<4xf32>
    %31 = vector.multi_reduction <add>, %30, %cst_22 [1] : vector<4x4xf32> to vector<4xf32>
    %32 = vector.shape_cast %31 : vector<4xf32> to vector<4x1xf32>
    %33 = tpu.reciprocal %32 {approx = true} : vector<4x1xf32> -> vector<4x1xf32>
    %34 = vector.extract_strided_slice %19 {offsets = [0, 0], sizes = [4, 8], strides = [1, 1]} : vector<4x32xf32> to vector<4x8xf32>
    %cst_23 = arith.constant dense<0.000000e+00> : vector<4x8xf32>
    %35 = tpu.matmul %30, %34, %cst_23 {dimension_numbers = #tpu.dot_dimension_numbers<[1], [0], [0], [1], [0, 0, 1, 1], [], []>} : vector<4x4xf32>, vector<4x8xf32>, vector<4x8xf32> -> vector<4x8xf32>
    %36 = vector.broadcast %33 : vector<4x1xf32> to vector<4x8xf32>
    %37 = arith.mulf %35, %36 : vector<4x8xf32>
    %38 = vector.extract_strided_slice %8 {offsets = [0, 0], sizes = [8, 32], strides = [1, 1]} : vector<32x32xf32> to vector<8x32xf32>
    %cst_24 = arith.constant dense<0.000000e+00> : vector<4x32xf32>
    %39 = tpu.matmul %37, %38, %cst_24 {dimension_numbers = #tpu.dot_dimension_numbers<[1], [0], [0], [1], [0, 0, 1, 1], [], []>} : vector<4x8xf32>, vector<8x32xf32>, vector<4x32xf32> -> vector<4x32xf32>
    %40 = arith.addf %22, %39 : vector<4x32xf32>
    %41 = vector.extract_strided_slice %14 {offsets = [0, 8], sizes = [4, 8], strides = [1, 1]} : vector<4x32xf32> to vector<4x8xf32>
    %42 = vector.extract_strided_slice %18 {offsets = [0, 8], sizes = [4, 8], strides = [1, 1]} : vector<4x32xf32> to vector<4x8xf32>
    %cst_25 = arith.constant dense<0.000000e+00> : vector<4x4xf32>
    %43 = tpu.matmul %41, %42, %cst_25 {dimension_numbers = #tpu.dot_dimension_numbers<[1], [1], [0], [0], [0, 0, 1, 0], [], []>} : vector<4x8xf32>, vector<4x8xf32>, vector<4x4xf32> -> vector<4x4xf32>
    %cst_26 = arith.constant dense<0xFF800000> : vector<4xf32>
    %44 = vector.multi_reduction <maximumf>, %43, %cst_26 [1] : vector<4x4xf32> to vector<4xf32>
    %45 = vector.shape_cast %44 : vector<4xf32> to vector<4x1xf32>
    %46 = vector.broadcast %45 : vector<4x1xf32> to vector<4x4xf32>
    %47 = arith.subf %43, %46 : vector<4x4xf32>
    %48 = math.exp %47 : vector<4x4xf32>
    %cst_27 = arith.constant dense<0.000000e+00> : vector<4xf32>
    %49 = vector.multi_reduction <add>, %48, %cst_27 [1] : vector<4x4xf32> to vector<4xf32>
    %50 = vector.shape_cast %49 : vector<4xf32> to vector<4x1xf32>
    %51 = tpu.reciprocal %50 {approx = true} : vector<4x1xf32> -> vector<4x1xf32>
    %52 = vector.extract_strided_slice %19 {offsets = [0, 8], sizes = [4, 8], strides = [1, 1]} : vector<4x32xf32> to vector<4x8xf32>
    %cst_28 = arith.constant dense<0.000000e+00> : vector<4x8xf32>
    %53 = tpu.matmul %48, %52, %cst_28 {dimension_numbers = #tpu.dot_dimension_numbers<[1], [0], [0], [1], [0, 0, 1, 1], [], []>} : vector<4x4xf32>, vector<4x8xf32>, vector<4x8xf32> -> vector<4x8xf32>
    %54 = vector.broadcast %51 : vector<4x1xf32> to vector<4x8xf32>
    %55 = arith.mulf %53, %54 : vector<4x8xf32>
    %56 = vector.extract_strided_slice %8 {offsets = [8, 0], sizes = [8, 32], strides = [1, 1]} : vector<32x32xf32> to vector<8x32xf32>
    %cst_29 = arith.constant dense<0.000000e+00> : vector<4x32xf32>
    %57 = tpu.matmul %55, %56, %cst_29 {dimension_numbers = #tpu.dot_dimension_numbers<[1], [0], [0], [1], [0, 0, 1, 1], [], []>} : vector<4x8xf32>, vector<8x32xf32>, vector<4x32xf32> -> vector<4x32xf32>
    %58 = arith.addf %40, %57 : vector<4x32xf32>
    %59 = vector.extract_strided_slice %14 {offsets = [0, 16], sizes = [4, 8], strides = [1, 1]} : vector<4x32xf32> to vector<4x8xf32>
    %60 = vector.extract_strided_slice %18 {offsets = [0, 16], sizes = [4, 8], strides = [1, 1]} : vector<4x32xf32> to vector<4x8xf32>
    %cst_30 = arith.constant dense<0.000000e+00> : vector<4x4xf32>
    %61 = tpu.matmul %59, %60, %cst_30 {dimension_numbers = #tpu.dot_dimension_numbers<[1], [1], [0], [0], [0, 0, 1, 0], [], []>} : vector<4x8xf32>, vector<4x8xf32>, vector<4x4xf32> -> vector<4x4xf32>
    %cst_31 = arith.constant dense<0xFF800000> : vector<4xf32>
    %62 = vector.multi_reduction <maximumf>, %61, %cst_31 [1] : vector<4x4xf32> to vector<4xf32>
    %63 = vector.shape_cast %62 : vector<4xf32> to vector<4x1xf32>
    %64 = vector.broadcast %63 : vector<4x1xf32> to vector<4x4xf32>
    %65 = arith.subf %61, %64 : vector<4x4xf32>
    %66 = math.exp %65 : vector<4x4xf32>
    %cst_32 = arith.constant dense<0.000000e+00> : vector<4xf32>
    %67 = vector.multi_reduction <add>, %66, %cst_32 [1] : vector<4x4xf32> to vector<4xf32>
    %68 = vector.shape_cast %67 : vector<4xf32> to vector<4x1xf32>
    %69 = tpu.reciprocal %68 {approx = true} : vector<4x1xf32> -> vector<4x1xf32>
    %70 = vector.extract_strided_slice %19 {offsets = [0, 16], sizes = [4, 8], strides = [1, 1]} : vector<4x32xf32> to vector<4x8xf32>
    %cst_33 = arith.constant dense<0.000000e+00> : vector<4x8xf32>
    %71 = tpu.matmul %66, %70, %cst_33 {dimension_numbers = #tpu.dot_dimension_numbers<[1], [0], [0], [1], [0, 0, 1, 1], [], []>} : vector<4x4xf32>, vector<4x8xf32>, vector<4x8xf32> -> vector<4x8xf32>
    %72 = vector.broadcast %69 : vector<4x1xf32> to vector<4x8xf32>
    %73 = arith.mulf %71, %72 : vector<4x8xf32>
    %74 = vector.extract_strided_slice %8 {offsets = [16, 0], sizes = [8, 32], strides = [1, 1]} : vector<32x32xf32> to vector<8x32xf32>
    %cst_34 = arith.constant dense<0.000000e+00> : vector<4x32xf32>
    %75 = tpu.matmul %73, %74, %cst_34 {dimension_numbers = #tpu.dot_dimension_numbers<[1], [0], [0], [1], [0, 0, 1, 1], [], []>} : vector<4x8xf32>, vector<8x32xf32>, vector<4x32xf32> -> vector<4x32xf32>
    %76 = arith.addf %58, %75 : vector<4x32xf32>
    %77 = vector.extract_strided_slice %14 {offsets = [0, 24], sizes = [4, 8], strides = [1, 1]} : vector<4x32xf32> to vector<4x8xf32>
    %78 = vector.extract_strided_slice %18 {offsets = [0, 24], sizes = [4, 8], strides = [1, 1]} : vector<4x32xf32> to vector<4x8xf32>
    %cst_35 = arith.constant dense<0.000000e+00> : vector<4x4xf32>
    %79 = tpu.matmul %77, %78, %cst_35 {dimension_numbers = #tpu.dot_dimension_numbers<[1], [1], [0], [0], [0, 0, 1, 0], [], []>} : vector<4x8xf32>, vector<4x8xf32>, vector<4x4xf32> -> vector<4x4xf32>
    %cst_36 = arith.constant dense<0xFF800000> : vector<4xf32>
    %80 = vector.multi_reduction <maximumf>, %79, %cst_36 [1] : vector<4x4xf32> to vector<4xf32>
    %81 = vector.shape_cast %80 : vector<4xf32> to vector<4x1xf32>
    %82 = vector.broadcast %81 : vector<4x1xf32> to vector<4x4xf32>
    %83 = arith.subf %79, %82 : vector<4x4xf32>
    %84 = math.exp %83 : vector<4x4xf32>
    %cst_37 = arith.constant dense<0.000000e+00> : vector<4xf32>
    %85 = vector.multi_reduction <add>, %84, %cst_37 [1] : vector<4x4xf32> to vector<4xf32>
    %86 = vector.shape_cast %85 : vector<4xf32> to vector<4x1xf32>
    %87 = tpu.reciprocal %86 {approx = true} : vector<4x1xf32> -> vector<4x1xf32>
    %88 = vector.extract_strided_slice %19 {offsets = [0, 24], sizes = [4, 8], strides = [1, 1]} : vector<4x32xf32> to vector<4x8xf32>
    %cst_38 = arith.constant dense<0.000000e+00> : vector<4x8xf32>
    %89 = tpu.matmul %84, %88, %cst_38 {dimension_numbers = #tpu.dot_dimension_numbers<[1], [0], [0], [1], [0, 0, 1, 1], [], []>} : vector<4x4xf32>, vector<4x8xf32>, vector<4x8xf32> -> vector<4x8xf32>
    %90 = vector.broadcast %87 : vector<4x1xf32> to vector<4x8xf32>
    %91 = arith.mulf %89, %90 : vector<4x8xf32>
    %92 = vector.extract_strided_slice %8 {offsets = [24, 0], sizes = [8, 32], strides = [1, 1]} : vector<32x32xf32> to vector<8x32xf32>
    %cst_39 = arith.constant dense<0.000000e+00> : vector<4x32xf32>
    %93 = tpu.matmul %91, %92, %cst_39 {dimension_numbers = #tpu.dot_dimension_numbers<[1], [0], [0], [1], [0, 0, 1, 1], [], []>} : vector<4x8xf32>, vector<8x32xf32>, vector<4x32xf32> -> vector<4x32xf32>
    %94 = arith.addf %76, %93 : vector<4x32xf32>
    %95 = arith.addf %1, %94 : vector<4x32xf32>
    %c0_40 = arith.constant 0 : index
    %c0_41 = arith.constant 0 : index
    %96 = vector.load %arg9[%c0_40, %c0_41] : memref<1x32xf32, #tpu.memory_space<vmem>>, vector<1x32xf32>
    %c0_42 = arith.constant 0 : index
    %c0_43 = arith.constant 0 : index
    %97 = vector.load %arg10[%c0_42, %c0_43] : memref<1x32xf32, #tpu.memory_space<vmem>>, vector<1x32xf32>
    %cst_44 = arith.constant dense<0.000000e+00> : vector<4xf32>
    %98 = vector.multi_reduction <add>, %95, %cst_44 [1] : vector<4x32xf32> to vector<4xf32>
    %99 = vector.shape_cast %98 : vector<4xf32> to vector<4x1xf32>
    %cst_45 = arith.constant 3.200000e+01 : f32
    %100 = vector.broadcast %cst_45 : f32 to vector<4x1xf32>
    %101 = arith.divf %99, %100 : vector<4x1xf32>
    %102 = vector.broadcast %101 : vector<4x1xf32> to vector<4x32xf32>
    %103 = arith.subf %95, %102 : vector<4x32xf32>
    %104 = vector.broadcast %101 : vector<4x1xf32> to vector<4x32xf32>
    %105 = arith.subf %95, %104 : vector<4x32xf32>
    %106 = arith.mulf %103, %105 : vector<4x32xf32>
    %cst_46 = arith.constant dense<0.000000e+00> : vector<4xf32>
    %107 = vector.multi_reduction <add>, %106, %cst_46 [1] : vector<4x32xf32> to vector<4xf32>
    %108 = vector.shape_cast %107 : vector<4xf32> to vector<4x1xf32>
    %cst_47 = arith.constant 3.200000e+01 : f32
    %109 = vector.broadcast %cst_47 : f32 to vector<4x1xf32>
    %110 = arith.divf %108, %109 : vector<4x1xf32>
    %111 = vector.broadcast %101 : vector<4x1xf32> to vector<4x32xf32>
    %112 = arith.subf %95, %111 : vector<4x32xf32>
    %cst_48 = arith.constant 9.99999974E-6 : f32
    %113 = vector.broadcast %cst_48 : f32 to vector<4x1xf32>
    %114 = arith.addf %110, %113 : vector<4x1xf32>
    %115 = math.rsqrt %114 : vector<4x1xf32>
    %116 = vector.broadcast %115 : vector<4x1xf32> to vector<4x32xf32>
    %117 = arith.mulf %112, %116 : vector<4x32xf32>
    %118 = vector.broadcast %96 : vector<1x32xf32> to vector<4x32xf32>
    %119 = arith.mulf %117, %118 : vector<4x32xf32>
    %120 = vector.broadcast %97 : vector<1x32xf32> to vector<4x32xf32>
    %121 = arith.addf %119, %120 : vector<4x32xf32>
    %c0_49 = arith.constant 0 : index
    %c0_50 = arith.constant 0 : index
    %122 = vector.load %arg11[%c0_49, %c0_50] : memref<32x32xf32, #tpu.memory_space<vmem>>, vector<32x32xf32>
    %c0_51 = arith.constant 0 : index
    %c0_52 = arith.constant 0 : index
    %123 = vector.load %arg12[%c0_51, %c0_52] : memref<1x32xf32, #tpu.memory_space<vmem>>, vector<1x32xf32>
    %c0_53 = arith.constant 0 : index
    %c0_54 = arith.constant 0 : index
    %124 = vector.load %arg13[%c0_53, %c0_54] : memref<32x32xf32, #tpu.memory_space<vmem>>, vector<32x32xf32>
    %c0_55 = arith.constant 0 : index
    %c0_56 = arith.constant 0 : index
    %125 = vector.load %arg14[%c0_55, %c0_56] : memref<1x32xf32, #tpu.memory_space<vmem>>, vector<1x32xf32>
    %cst_57 = arith.constant dense<0.000000e+00> : vector<4x32xf32>
    %126 = tpu.matmul %121, %122, %cst_57 {dimension_numbers = #tpu.dot_dimension_numbers<[1], [0], [0], [1], [0, 0, 1, 1], [], []>} : vector<4x32xf32>, vector<32x32xf32>, vector<4x32xf32> -> vector<4x32xf32>
    %127 = vector.broadcast %123 : vector<1x32xf32> to vector<4x32xf32>
    %128 = arith.addf %126, %127 : vector<4x32xf32>
    %cst_58 = arith.constant 5.000000e-01 : f32
    %129 = vector.broadcast %cst_58 : f32 to vector<4x32xf32>
    %130 = arith.mulf %129, %128 : vector<4x32xf32>
    %cst_59 = arith.constant 4.471500e-02 : f32
    %131 = vector.broadcast %cst_59 : f32 to vector<4x32xf32>
    %132 = arith.mulf %131, %128 : vector<4x32xf32>
    %133 = arith.mulf %132, %128 : vector<4x32xf32>
    %134 = arith.mulf %133, %128 : vector<4x32xf32>
    %135 = arith.addf %128, %134 : vector<4x32xf32>
    %cst_60 = arith.constant 0.797884583 : f32
    %136 = vector.broadcast %cst_60 : f32 to vector<4x32xf32>
    %137 = arith.mulf %136, %135 : vector<4x32xf32>
    %138 = math.tanh %137 : vector<4x32xf32>
    %cst_61 = arith.constant 1.000000e+00 : f32
    %139 = vector.broadcast %cst_61 : f32 to vector<4x32xf32>
    %140 = arith.addf %139, %138 : vector<4x32xf32>
    %141 = arith.mulf %130, %140 : vector<4x32xf32>
    %cst_62 = arith.constant dense<0.000000e+00> : vector<4x32xf32>
    %142 = tpu.matmul %141, %124, %cst_62 {dimension_numbers = #tpu.dot_dimension_numbers<[1], [0], [0], [1], [0, 0, 1, 1], [], []>} : vector<4x32xf32>, vector<32x32xf32>, vector<4x32xf32> -> vector<4x32xf32>
    %143 = vector.broadcast %125 : vector<1x32xf32> to vector<4x32xf32>
    %144 = arith.addf %142, %143 : vector<4x32xf32>
    %145 = arith.addf %121, %144 : vector<4x32xf32>
    %c0_63 = arith.constant 0 : index
    %c0_64 = arith.constant 0 : index
    %146 = vector.load %arg15[%c0_63, %c0_64] : memref<1x32xf32, #tpu.memory_space<vmem>>, vector<1x32xf32>
    %c0_65 = arith.constant 0 : index
    %c0_66 = arith.constant 0 : index
    %147 = vector.load %arg16[%c0_65, %c0_66] : memref<1x32xf32, #tpu.memory_space<vmem>>, vector<1x32xf32>
    %cst_67 = arith.constant dense<0.000000e+00> : vector<4xf32>
    %148 = vector.multi_reduction <add>, %145, %cst_67 [1] : vector<4x32xf32> to vector<4xf32>
    %149 = vector.shape_cast %148 : vector<4xf32> to vector<4x1xf32>
    %cst_68 = arith.constant 3.200000e+01 : f32
    %150 = vector.broadcast %cst_68 : f32 to vector<4x1xf32>
    %151 = arith.divf %149, %150 : vector<4x1xf32>
    %152 = vector.broadcast %151 : vector<4x1xf32> to vector<4x32xf32>
    %153 = arith.subf %145, %152 : vector<4x32xf32>
    %154 = vector.broadcast %151 : vector<4x1xf32> to vector<4x32xf32>
    %155 = arith.subf %145, %154 : vector<4x32xf32>
    %156 = arith.mulf %153, %155 : vector<4x32xf32>
    %cst_69 = arith.constant dense<0.000000e+00> : vector<4xf32>
    %157 = vector.multi_reduction <add>, %156, %cst_69 [1] : vector<4x32xf32> to vector<4xf32>
    %158 = vector.shape_cast %157 : vector<4xf32> to vector<4x1xf32>
    %cst_70 = arith.constant 3.200000e+01 : f32
    %159 = vector.broadcast %cst_70 : f32 to vector<4x1xf32>
    %160 = arith.divf %158, %159 : vector<4x1xf32>
    %161 = vector.broadcast %151 : vector<4x1xf32> to vector<4x32xf32>
    %162 = arith.subf %145, %161 : vector<4x32xf32>
    %cst_71 = arith.constant 9.99999974E-6 : f32
    %163 = vector.broadcast %cst_71 : f32 to vector<4x1xf32>
    %164 = arith.addf %160, %163 : vector<4x1xf32>
    %165 = math.rsqrt %164 : vector<4x1xf32>
    %166 = vector.broadcast %165 : vector<4x1xf32> to vector<4x32xf32>
    %167 = arith.mulf %162, %166 : vector<4x32xf32>
    %168 = vector.broadcast %146 : vector<1x32xf32> to vector<4x32xf32>
    %169 = arith.mulf %167, %168 : vector<4x32xf32>
    %170 = vector.broadcast %147 : vector<1x32xf32> to vector<4x32xf32>
    %171 = arith.addf %169, %170 : vector<4x32xf32>
    %c0_72 = arith.constant 0 : index
    %c0_73 = arith.constant 0 : index
    %c0_74 = arith.constant 0 : index
    %172 = vector.load %arg19[%c0_72, %c0_73, %c0_74] : memref<1x4x32xf32, #tpu.memory_space<vmem>>, vector<1x4x32xf32>
    %173 = vector.shape_cast %172 : vector<1x4x32xf32> to vector<4x32xf32>
    %174 = vector.shape_cast %171 : vector<4x32xf32> to vector<1x4x32xf32>
    tpu.vector_store %arg19[%c0_72, %c0_73, %c0_74], %174 {strides = array<i32>} : memref<1x4x32xf32, #tpu.memory_space<vmem>>, vector<1x4x32xf32>,
    %c0_75 = arith.constant 0 : index
    %c0_76 = arith.constant 0 : index
    %175 = vector.load %arg17[%c0_75, %c0_76] : memref<32x8xf32, #tpu.memory_space<vmem>>, vector<32x8xf32>
    %cst_77 = arith.constant dense<0.000000e+00> : vector<4x8xf32>
    %176 = tpu.matmul %171, %175, %cst_77 {dimension_numbers = #tpu.dot_dimension_numbers<[1], [0], [0], [1], [0, 0, 1, 1], [], []>} : vector<4x32xf32>, vector<32x8xf32>, vector<4x8xf32> -> vector<4x8xf32>
    %c0_78 = arith.constant 0 : index
    %c0_79 = arith.constant 0 : index
    %177 = vector.load %arg18[%c0_78, %c0_79] : memref<1x8xf32, #tpu.memory_space<vmem>>, vector<1x8xf32>
    %178 = vector.broadcast %177 : vector<1x8xf32> to vector<4x8xf32>
    %179 = arith.addf %176, %178 : vector<4x8xf32>
    %c0_80 = arith.constant 0 : index
    %c0_81 = arith.constant 0 : index
    %c0_82 = arith.constant 0 : index
    %180 = vector.load %arg20[%c0_80, %c0_81, %c0_82] : memref<1x4x8xf32, #tpu.memory_space<vmem>>, vector<1x4x8xf32>
    %181 = vector.shape_cast %180 : vector<1x4x8xf32> to vector<4x8xf32>
    %182 = vector.shape_cast %179 : vector<4x8xf32> to vector<1x4x8xf32>
    tpu.vector_store %arg20[%c0_80, %c0_81, %c0_82], %182 {strides = array<i32>} : memref<1x4x8xf32, #tpu.memory_space<vmem>>, vector<1x4x8xf32>,
    return
  }
  func.func @transform_0(%arg0: i32) -> (i32, i32, i32) {
    %c0_i32 = arith.constant 0 : i32
    %c0_i32_0 = arith.constant 0 : i32
    %c0_i32_1 = arith.constant 0 : i32
    return %arg0, %c0_i32, %c0_i32_0 : i32, i32, i32
  }
  func.func @transform_1(%arg0: i32) -> (i32, i32, i32) {
    %c0_i32 = arith.constant 0 : i32
    %c0_i32_0 = arith.constant 0 : i32
    %c0_i32_1 = arith.constant 0 : i32
    return %arg0, %c0_i32, %c0_i32_0 : i32, i32, i32
  }
  func.func @transform_2(%arg0: i32) -> (i32, i32) {
    %c0_i32 = arith.constant 0 : i32
    %c0_i32_0 = arith.constant 0 : i32
    %c0_i32_1 = arith.constant 0 : i32
    return %c0_i32, %c0_i32_0 : i32, i32
  }
  func.func @transform_3(%arg0: i32) -> (i32, i32) {
    %c0_i32 = arith.constant 0 : i32
    %c0_i32_0 = arith.constant 0 : i32
    %c0_i32_1 = arith.constant 0 : i32
    return %c0_i32, %c0_i32_0 : i32, i32
  }
  func.func @transform_4(%arg0: i32) -> (i32, i32) {
    %c0_i32 = arith.constant 0 : i32
    %c0_i32_0 = arith.constant 0 : i32
    %c0_i32_1 = arith.constant 0 : i32
    return %c0_i32, %c0_i32_0 : i32, i32
  }
  func.func @transform_5(%arg0: i32) -> (i32, i32) {
    %c0_i32 = arith.constant 0 : i32
    %c0_i32_0 = arith.constant 0 : i32
    %c0_i32_1 = arith.constant 0 : i32
    return %c0_i32, %c0_i32_0 : i32, i32
  }
  func.func @transform_6(%arg0: i32) -> (i32, i32) {
    %c0_i32 = arith.constant 0 : i32
    %c0_i32_0 = arith.constant 0 : i32
    %c0_i32_1 = arith.constant 0 : i32
    return %c0_i32, %c0_i32_0 : i32, i32
  }
  func.func @transform_7(%arg0: i32) -> (i32, i32) {
    %c0_i32 = arith.constant 0 : i32
    %c0_i32_0 = arith.constant 0 : i32
    %c0_i32_1 = arith.constant 0 : i32
    return %c0_i32, %c0_i32_0 : i32, i32
  }
  func.func @transform_8(%arg0: i32) -> (i32, i32) {
    %c0_i32 = arith.constant 0 : i32
    %c0_i32_0 = arith.constant 0 : i32
    %c0_i32_1 = arith.constant 0 : i32
    return %c0_i32, %c0_i32_0 : i32, i32
  }
  func.func @transform_9(%arg0: i32) -> (i32, i32) {
    %c0_i32 = arith.constant 0 : i32
    %c0_i32_0 = arith.constant 0 : i32
    %c0_i32_1 = arith.constant 0 : i32
    return %c0_i32, %c0_i32_0 : i32, i32
  }
  func.func @transform_10(%arg0: i32) -> (i32, i32) {
    %c0_i32 = arith.constant 0 : i32
    %c0_i32_0 = arith.constant 0 : i32
    %c0_i32_1 = arith.constant 0 : i32
    return %c0_i32, %c0_i32_0 : i32, i32
  }
  func.func @transform_11(%arg0: i32) -> (i32, i32) {
    %c0_i32 = arith.constant 0 : i32
    %c0_i32_0 = arith.constant 0 : i32
    %c0_i32_1 = arith.constant 0 : i32
    return %c0_i32, %c0_i32_0 : i32, i32
  }
  func.func @transform_12(%arg0: i32) -> (i32, i32) {
    %c0_i32 = arith.constant 0 : i32
    %c0_i32_0 = arith.constant 0 : i32
    %c0_i32_1 = arith.constant 0 : i32
    return %c0_i32, %c0_i32_0 : i32, i32
  }
  func.func @transform_13(%arg0: i32) -> (i32, i32) {
    %c0_i32 = arith.constant 0 : i32
    %c0_i32_0 = arith.constant 0 : i32
    %c0_i32_1 = arith.constant 0 : i32
    return %c0_i32, %c0_i32_0 : i32, i32
  }
  func.func @transform_14(%arg0: i32) -> (i32, i32) {
    %c0_i32 = arith.constant 0 : i32
    %c0_i32_0 = arith.constant 0 : i32
    %c0_i32_1 = arith.constant 0 : i32
    return %c0_i32, %c0_i32_0 : i32, i32
  }
  func.func @transform_15(%arg0: i32) -> (i32, i32) {
    %c0_i32 = arith.constant 0 : i32
    %c0_i32_0 = arith.constant 0 : i32
    %c0_i32_1 = arith.constant 0 : i32
    return %c0_i32, %c0_i32_0 : i32, i32
  }
  func.func @transform_16(%arg0: i32) -> (i32, i32) {
    %c0_i32 = arith.constant 0 : i32
    %c0_i32_0 = arith.constant 0 : i32
    %c0_i32_1 = arith.constant 0 : i32
    return %c0_i32, %c0_i32_0 : i32, i32
  }
  func.func @transform_17(%arg0: i32) -> (i32, i32) {
    %c0_i32 = arith.constant 0 : i32
    %c0_i32_0 = arith.constant 0 : i32
    %c0_i32_1 = arith.constant 0 : i32
    return %c0_i32, %c0_i32_0 : i32, i32
  }
  func.func @transform_18(%arg0: i32) -> (i32, i32, i32) {
    %c0_i32 = arith.constant 0 : i32
    %c0_i32_0 = arith.constant 0 : i32
    %c0_i32_1 = arith.constant 0 : i32
    return %arg0, %c0_i32, %c0_i32_0 : i32, i32, i32
  }
  func.func @transform_19(%arg0: i32) -> (i32, i32, i32) {
    %c0_i32 = arith.constant 0 : i32
    %c0_i32_0 = arith.constant 0 : i32
    %c0_i32_1 = arith.constant 0 : i32
    return %arg0, %c0_i32, %c0_i32_0 : i32, i32, i32
  }
}

module attributes {stable_mosaic.version = 11 : i64} {
  func.func @_gsh_tail_kernel(%arg0: i32, %arg1: memref<1x4x32xf32, #tpu.memory_space<vmem>>, %arg2: memref<1x4x32xf32, #tpu.memory_space<vmem>>, %arg3: memref<32x32xf32, #tpu.memory_space<vmem>>, %arg4: memref<1x32xf32, #tpu.memory_space<vmem>>, %arg5: memref<32x64xf32, #tpu.memory_space<vmem>>, %arg6: memref<1x64xf32, #tpu.memory_space<vmem>>, %arg7: memref<32x32xf32, #tpu.memory_space<vmem>>, %arg8: memref<1x32xf32, #tpu.memory_space<vmem>>, %arg9: memref<1x32xf32, #tpu.memory_space<vmem>>, %arg10: memref<1x32xf32, #tpu.memory_space<vmem>>, %arg11: memref<32x32xf32, #tpu.memory_space<vmem>>, %arg12: memref<1x32xf32, #tpu.memory_space<vmem>>, %arg13: memref<32x32xf32, #tpu.memory_space<vmem>>, %arg14: memref<1x32xf32, #tpu.memory_space<vmem>>, %arg15: memref<1x32xf32, #tpu.memory_space<vmem>>, %arg16: memref<1x32xf32, #tpu.memory_space<vmem>>, %arg17: memref<32x8xf32, #tpu.memory_space<vmem>>, %arg18: memref<1x8xf32, #tpu.memory_space<vmem>>, %arg19: memref<1x4x32xf32, #tpu.memory_space<vmem>>, %arg20: memref<1x4x8xf32, #tpu.memory_space<vmem>>) attributes {dimension_semantics = [#tpu.dimension_semantics<parallel>], iteration_bounds = array<i64: 6>, scalar_prefetch = 0 : i64, scratch_operands = 0 : i64, tpu.core_type = #tpu.core_type<tc>, window_params = [{transform_indices = @transform_0, window_bounds = array<i64: 1, 4, 32>}, {transform_indices = @transform_1, window_bounds = array<i64: 1, 4, 32>}, {pipeline_mode = #tpu.pipeline_mode<synchronous>, transform_indices = @transform_2, window_bounds = array<i64: 32, 32>}, {pipeline_mode = #tpu.pipeline_mode<synchronous>, transform_indices = @transform_3, window_bounds = array<i64: 1, 32>}, {pipeline_mode = #tpu.pipeline_mode<synchronous>, transform_indices = @transform_4, window_bounds = array<i64: 32, 64>}, {pipeline_mode = #tpu.pipeline_mode<synchronous>, transform_indices = @transform_5, window_bounds = array<i64: 1, 64>}, {pipeline_mode = #tpu.pipeline_mode<synchronous>, transform_indices = @transform_6, window_bounds = array<i64: 32, 32>}, {pipeline_mode = #tpu.pipeline_mode<synchronous>, transform_indices = @transform_7, window_bounds = array<i64: 1, 32>}, {pipeline_mode = #tpu.pipeline_mode<synchronous>, transform_indices = @transform_8, window_bounds = array<i64: 1, 32>}, {pipeline_mode = #tpu.pipeline_mode<synchronous>, transform_indices = @transform_9, window_bounds = array<i64: 1, 32>}, {pipeline_mode = #tpu.pipeline_mode<synchronous>, transform_indices = @transform_10, window_bounds = array<i64: 32, 32>}, {pipeline_mode = #tpu.pipeline_mode<synchronous>, transform_indices = @transform_11, window_bounds = array<i64: 1, 32>}, {pipeline_mode = #tpu.pipeline_mode<synchronous>, transform_indices = @transform_12, window_bounds = array<i64: 32, 32>}, {pipeline_mode = #tpu.pipeline_mode<synchronous>, transform_indices = @transform_13, window_bounds = array<i64: 1, 32>}, {pipeline_mode = #tpu.pipeline_mode<synchronous>, transform_indices = @transform_14, window_bounds = array<i64: 1, 32>}, {pipeline_mode = #tpu.pipeline_mode<synchronous>, transform_indices = @transform_15, window_bounds = array<i64: 1, 32>}, {pipeline_mode = #tpu.pipeline_mode<synchronous>, transform_indices = @transform_16, window_bounds = array<i64: 32, 8>}, {pipeline_mode = #tpu.pipeline_mode<synchronous>, transform_indices = @transform_17, window_bounds = array<i64: 1, 8>}, {transform_indices = @transform_18, window_bounds = array<i64: 1, 4, 32>}, {transform_indices = @transform_19, window_bounds = array<i64: 1, 4, 8>}]} {
    %c0 = arith.constant 0 : index
    %c0_0 = arith.constant 0 : index
    %c0_1 = arith.constant 0 : index
    %0 = vector.load %arg1[%c0, %c0_0, %c0_1] : memref<1x4x32xf32, #tpu.memory_space<vmem>>, vector<1x4x32xf32>
    %1 = vector.shape_cast %0 : vector<1x4x32xf32> to vector<4x32xf32>
    %c0_2 = arith.constant 0 : index
    %c0_3 = arith.constant 0 : index
    %c0_4 = arith.constant 0 : index
    %2 = vector.load %arg2[%c0_2, %c0_3, %c0_4] : memref<1x4x32xf32, #tpu.memory_space<vmem>>, vector<1x4x32xf32>
    %3 = vector.shape_cast %2 : vector<1x4x32xf32> to vector<4x32xf32>
    %c0_5 = arith.constant 0 : index
    %c0_6 = arith.constant 0 : index
    %4 = vector.load %arg3[%c0_5, %c0_6] : memref<32x32xf32, #tpu.memory_space<vmem>>, vector<32x32xf32>
    %c0_7 = arith.constant 0 : index
    %c0_8 = arith.constant 0 : index
    %5 = vector.load %arg4[%c0_7, %c0_8] : memref<1x32xf32, #tpu.memory_space<vmem>>, vector<1x32xf32>
    %c0_9 = arith.constant 0 : index
    %c0_10 = arith.constant 0 : index
    %6 = vector.load %arg5[%c0_9, %c0_10] : memref<32x64xf32, #tpu.memory_space<vmem>>, vector<32x64xf32>
    %c0_11 = arith.constant 0 : index
    %c0_12 = arith.constant 0 : index
    %7 = vector.load %arg6[%c0_11, %c0_12] : memref<1x64xf32, #tpu.memory_space<vmem>>, vector<1x64xf32>
    %c0_13 = arith.constant 0 : index
    %c0_14 = arith.constant 0 : index
    %8 = vector.load %arg7[%c0_13, %c0_14] : memref<32x32xf32, #tpu.memory_space<vmem>>, vector<32x32xf32>
    %c0_15 = arith.constant 0 : index
    %c0_16 = arith.constant 0 : index
    %9 = vector.load %arg8[%c0_15, %c0_16] : memref<1x32xf32, #tpu.memory_space<vmem>>, vector<1x32xf32>
    %cst = arith.constant dense<0.000000e+00> : vector<4x32xf32>
    %10 = tpu.matmul %1, %4, %cst {dimension_numbers = #tpu.dot_dimension_numbers<[1], [0], [0], [1], [0, 0, 1, 1], [], []>} : vector<4x32xf32>, vector<32x32xf32>, vector<4x32xf32> -> vector<4x32xf32>
    %11 = vector.broadcast %5 : vector<1x32xf32> to vector<4x32xf32>
    %12 = arith.addf %10, %11 : vector<4x32xf32>
    %cst_17 = arith.constant 0.353553385 : f32
    %13 = vector.broadcast %cst_17 : f32 to vector<4x32xf32>
    %14 = arith.mulf %12, %13 : vector<4x32xf32>
    %cst_18 = arith.constant dense<0.000000e+00> : vector<4x64xf32>
    %15 = tpu.matmul %3, %6, %cst_18 {dimension_numbers = #tpu.dot_dimension_numbers<[1], [0], [0], [1], [0, 0, 1, 1], [], []>} : vector<4x32xf32>, vector<32x64xf32>, vector<4x64xf32> -> vector<4x64xf32>
    %16 = vector.broadcast %7 : vector<1x64xf32> to vector<4x64xf32>
    %17 = arith.addf %15, %16 : vector<4x64xf32>
    %18 = vector.extract_strided_slice %17 {offsets = [0, 0], sizes = [4, 32], strides = [1, 1]} : vector<4x64xf32> to vector<4x32xf32>
    %19 = vector.extract_strided_slice %17 {offsets = [0, 32], sizes = [4, 32], strides = [1, 1]} : vector<4x64xf32> to vector<4x32xf32>
    %cst_19 = arith.constant 0.000000e+00 : f32
    %20 = vector.broadcast %cst_19 : f32 to vector<4x32xf32>
    %21 = vector.broadcast %9 : vector<1x32xf32> to vector<4x32xf32>
    %22 = arith.addf %20, %21 : vector<4x32xf32>
    %23 = vector.extract_strided_slice %14 {offsets = [0, 0], sizes = [4, 8], strides = [1, 1]} : vector<4x32xf32> to vector<4x8xf32>
    %24 = vector.extract_strided_slice %18 {offsets = [0, 0], sizes = [4, 8], strides = [1, 1]} : vector<4x32xf32> to vector<4x8xf32>
    %cst_20 = arith.constant dense<0.000000e+00> : vector<4x4xf32>
    %25 = tpu.matmul %23, %24, %cst_20 {dimension_numbers = #tpu.dot_dimension_numbers<[1], [1], [0], [0], [0, 0, 1, 0], [], []>} : vector<4x8xf32>, vector<4x8xf32>, vector<4x4xf32> -> vector<4x4xf32>
    %cst_21 = arith.constant dense<0xFF800000> : vector<4xf32>
    %26 = vector.multi_reduction <maximumf>, %25, %cst_21 [1] : vector<4x4xf32> to vector<4xf32>
    %27 = vector.shape_cast %26 : vector<4xf32> to vector<4x1xf32>
    %28 = vector.broadcast %27 : vector<4x1xf32> to vector<4x4xf32>
    %29 = arith.subf %25, %28 : vector<4x4xf32>
    %30 = math.exp %29 : vector<4x4xf32>
    %cst_22 = arith.constant dense<0.000000e+00> : vector<4xf32>
    %31 = vector.multi_reduction <add>, %30, %cst_22 [1] : vector<4x4xf32> to vector<4xf32>
    %32 = vector.shape_cast %31 : vector<4xf32> to vector<4x1xf32>
    %33 = tpu.reciprocal %32 {approx = true} : vector<4x1xf32> -> vector<4x1xf32>
    %34 = vector.extract_strided_slice %19 {offsets = [0, 0], sizes = [4, 8], strides = [1, 1]} : vector<4x32xf32> to vector<4x8xf32>
    %cst_23 = arith.constant dense<0.000000e+00> : vector<4x8xf32>
    %35 = tpu.matmul %30, %34, %cst_23 {dimension_numbers = #tpu.dot_dimension_numbers<[1], [0], [0], [1], [0, 0, 1, 1], [], []>} : vector<4x4xf32>, vector<4x8xf32>, vector<4x8xf32> -> vector<4x8xf32>
    %36 = vector.broadcast %33 : vector<4x1xf32> to vector<4x8xf32>
    %37 = arith.mulf %35, %36 : vector<4x8xf32>
    %38 = vector.extract_strided_slice %8 {offsets = [0, 0], sizes = [8, 32], strides = [1, 1]} : vector<32x32xf32> to vector<8x32xf32>
    %cst_24 = arith.constant dense<0.000000e+00> : vector<4x32xf32>
    %39 = tpu.matmul %37, %38, %cst_24 {dimension_numbers = #tpu.dot_dimension_numbers<[1], [0], [0], [1], [0, 0, 1, 1], [], []>} : vector<4x8xf32>, vector<8x32xf32>, vector<4x32xf32> -> vector<4x32xf32>
    %40 = arith.addf %22, %39 : vector<4x32xf32>
    %41 = vector.extract_strided_slice %14 {offsets = [0, 8], sizes = [4, 8], strides = [1, 1]} : vector<4x32xf32> to vector<4x8xf32>
    %42 = vector.extract_strided_slice %18 {offsets = [0, 8], sizes = [4, 8], strides = [1, 1]} : vector<4x32xf32> to vector<4x8xf32>
    %cst_25 = arith.constant dense<0.000000e+00> : vector<4x4xf32>
    %43 = tpu.matmul %41, %42, %cst_25 {dimension_numbers = #tpu.dot_dimension_numbers<[1], [1], [0], [0], [0, 0, 1, 0], [], []>} : vector<4x8xf32>, vector<4x8xf32>, vector<4x4xf32> -> vector<4x4xf32>
    %cst_26 = arith.constant dense<0xFF800000> : vector<4xf32>
    %44 = vector.multi_reduction <maximumf>, %43, %cst_26 [1] : vector<4x4xf32> to vector<4xf32>
    %45 = vector.shape_cast %44 : vector<4xf32> to vector<4x1xf32>
    %46 = vector.broadcast %45 : vector<4x1xf32> to vector<4x4xf32>
    %47 = arith.subf %43, %46 : vector<4x4xf32>
    %48 = math.exp %47 : vector<4x4xf32>
    %cst_27 = arith.constant dense<0.000000e+00> : vector<4xf32>
    %49 = vector.multi_reduction <add>, %48, %cst_27 [1] : vector<4x4xf32> to vector<4xf32>
    %50 = vector.shape_cast %49 : vector<4xf32> to vector<4x1xf32>
    %51 = tpu.reciprocal %50 {approx = true} : vector<4x1xf32> -> vector<4x1xf32>
    %52 = vector.extract_strided_slice %19 {offsets = [0, 8], sizes = [4, 8], strides = [1, 1]} : vector<4x32xf32> to vector<4x8xf32>
    %cst_28 = arith.constant dense<0.000000e+00> : vector<4x8xf32>
    %53 = tpu.matmul %48, %52, %cst_28 {dimension_numbers = #tpu.dot_dimension_numbers<[1], [0], [0], [1], [0, 0, 1, 1], [], []>} : vector<4x4xf32>, vector<4x8xf32>, vector<4x8xf32> -> vector<4x8xf32>
    %54 = vector.broadcast %51 : vector<4x1xf32> to vector<4x8xf32>
    %55 = arith.mulf %53, %54 : vector<4x8xf32>
    %56 = vector.extract_strided_slice %8 {offsets = [8, 0], sizes = [8, 32], strides = [1, 1]} : vector<32x32xf32> to vector<8x32xf32>
    %cst_29 = arith.constant dense<0.000000e+00> : vector<4x32xf32>
    %57 = tpu.matmul %55, %56, %cst_29 {dimension_numbers = #tpu.dot_dimension_numbers<[1], [0], [0], [1], [0, 0, 1, 1], [], []>} : vector<4x8xf32>, vector<8x32xf32>, vector<4x32xf32> -> vector<4x32xf32>
    %58 = arith.addf %40, %57 : vector<4x32xf32>
    %59 = vector.extract_strided_slice %14 {offsets = [0, 16], sizes = [4, 8], strides = [1, 1]} : vector<4x32xf32> to vector<4x8xf32>
    %60 = vector.extract_strided_slice %18 {offsets = [0, 16], sizes = [4, 8], strides = [1, 1]} : vector<4x32xf32> to vector<4x8xf32>
    %cst_30 = arith.constant dense<0.000000e+00> : vector<4x4xf32>
    %61 = tpu.matmul %59, %60, %cst_30 {dimension_numbers = #tpu.dot_dimension_numbers<[1], [1], [0], [0], [0, 0, 1, 0], [], []>} : vector<4x8xf32>, vector<4x8xf32>, vector<4x4xf32> -> vector<4x4xf32>
    %cst_31 = arith.constant dense<0xFF800000> : vector<4xf32>
    %62 = vector.multi_reduction <maximumf>, %61, %cst_31 [1] : vector<4x4xf32> to vector<4xf32>
    %63 = vector.shape_cast %62 : vector<4xf32> to vector<4x1xf32>
    %64 = vector.broadcast %63 : vector<4x1xf32> to vector<4x4xf32>
    %65 = arith.subf %61, %64 : vector<4x4xf32>
    %66 = math.exp %65 : vector<4x4xf32>
    %cst_32 = arith.constant dense<0.000000e+00> : vector<4xf32>
    %67 = vector.multi_reduction <add>, %66, %cst_32 [1] : vector<4x4xf32> to vector<4xf32>
    %68 = vector.shape_cast %67 : vector<4xf32> to vector<4x1xf32>
    %69 = tpu.reciprocal %68 {approx = true} : vector<4x1xf32> -> vector<4x1xf32>
    %70 = vector.extract_strided_slice %19 {offsets = [0, 16], sizes = [4, 8], strides = [1, 1]} : vector<4x32xf32> to vector<4x8xf32>
    %cst_33 = arith.constant dense<0.000000e+00> : vector<4x8xf32>
    %71 = tpu.matmul %66, %70, %cst_33 {dimension_numbers = #tpu.dot_dimension_numbers<[1], [0], [0], [1], [0, 0, 1, 1], [], []>} : vector<4x4xf32>, vector<4x8xf32>, vector<4x8xf32> -> vector<4x8xf32>
    %72 = vector.broadcast %69 : vector<4x1xf32> to vector<4x8xf32>
    %73 = arith.mulf %71, %72 : vector<4x8xf32>
    %74 = vector.extract_strided_slice %8 {offsets = [16, 0], sizes = [8, 32], strides = [1, 1]} : vector<32x32xf32> to vector<8x32xf32>
    %cst_34 = arith.constant dense<0.000000e+00> : vector<4x32xf32>
    %75 = tpu.matmul %73, %74, %cst_34 {dimension_numbers = #tpu.dot_dimension_numbers<[1], [0], [0], [1], [0, 0, 1, 1], [], []>} : vector<4x8xf32>, vector<8x32xf32>, vector<4x32xf32> -> vector<4x32xf32>
    %76 = arith.addf %58, %75 : vector<4x32xf32>
    %77 = vector.extract_strided_slice %14 {offsets = [0, 24], sizes = [4, 8], strides = [1, 1]} : vector<4x32xf32> to vector<4x8xf32>
    %78 = vector.extract_strided_slice %18 {offsets = [0, 24], sizes = [4, 8], strides = [1, 1]} : vector<4x32xf32> to vector<4x8xf32>
    %cst_35 = arith.constant dense<0.000000e+00> : vector<4x4xf32>
    %79 = tpu.matmul %77, %78, %cst_35 {dimension_numbers = #tpu.dot_dimension_numbers<[1], [1], [0], [0], [0, 0, 1, 0], [], []>} : vector<4x8xf32>, vector<4x8xf32>, vector<4x4xf32> -> vector<4x4xf32>
    %cst_36 = arith.constant dense<0xFF800000> : vector<4xf32>
    %80 = vector.multi_reduction <maximumf>, %79, %cst_36 [1] : vector<4x4xf32> to vector<4xf32>
    %81 = vector.shape_cast %80 : vector<4xf32> to vector<4x1xf32>
    %82 = vector.broadcast %81 : vector<4x1xf32> to vector<4x4xf32>
    %83 = arith.subf %79, %82 : vector<4x4xf32>
    %84 = math.exp %83 : vector<4x4xf32>
    %cst_37 = arith.constant dense<0.000000e+00> : vector<4xf32>
    %85 = vector.multi_reduction <add>, %84, %cst_37 [1] : vector<4x4xf32> to vector<4xf32>
    %86 = vector.shape_cast %85 : vector<4xf32> to vector<4x1xf32>
    %87 = tpu.reciprocal %86 {approx = true} : vector<4x1xf32> -> vector<4x1xf32>
    %88 = vector.extract_strided_slice %19 {offsets = [0, 24], sizes = [4, 8], strides = [1, 1]} : vector<4x32xf32> to vector<4x8xf32>
    %cst_38 = arith.constant dense<0.000000e+00> : vector<4x8xf32>
    %89 = tpu.matmul %84, %88, %cst_38 {dimension_numbers = #tpu.dot_dimension_numbers<[1], [0], [0], [1], [0, 0, 1, 1], [], []>} : vector<4x4xf32>, vector<4x8xf32>, vector<4x8xf32> -> vector<4x8xf32>
    %90 = vector.broadcast %87 : vector<4x1xf32> to vector<4x8xf32>
    %91 = arith.mulf %89, %90 : vector<4x8xf32>
    %92 = vector.extract_strided_slice %8 {offsets = [24, 0], sizes = [8, 32], strides = [1, 1]} : vector<32x32xf32> to vector<8x32xf32>
    %cst_39 = arith.constant dense<0.000000e+00> : vector<4x32xf32>
    %93 = tpu.matmul %91, %92, %cst_39 {dimension_numbers = #tpu.dot_dimension_numbers<[1], [0], [0], [1], [0, 0, 1, 1], [], []>} : vector<4x8xf32>, vector<8x32xf32>, vector<4x32xf32> -> vector<4x32xf32>
    %94 = arith.addf %76, %93 : vector<4x32xf32>
    %95 = arith.addf %1, %94 : vector<4x32xf32>
    %c0_40 = arith.constant 0 : index
    %c0_41 = arith.constant 0 : index
    %96 = vector.load %arg9[%c0_40, %c0_41] : memref<1x32xf32, #tpu.memory_space<vmem>>, vector<1x32xf32>
    %c0_42 = arith.constant 0 : index
    %c0_43 = arith.constant 0 : index
    %97 = vector.load %arg10[%c0_42, %c0_43] : memref<1x32xf32, #tpu.memory_space<vmem>>, vector<1x32xf32>
    %cst_44 = arith.constant dense<0.000000e+00> : vector<4xf32>
    %98 = vector.multi_reduction <add>, %95, %cst_44 [1] : vector<4x32xf32> to vector<4xf32>
    %99 = vector.shape_cast %98 : vector<4xf32> to vector<4x1xf32>
    %cst_45 = arith.constant 3.200000e+01 : f32
    %100 = vector.broadcast %cst_45 : f32 to vector<4x1xf32>
    %101 = arith.divf %99, %100 : vector<4x1xf32>
    %102 = vector.broadcast %101 : vector<4x1xf32> to vector<4x32xf32>
    %103 = arith.subf %95, %102 : vector<4x32xf32>
    %104 = vector.broadcast %101 : vector<4x1xf32> to vector<4x32xf32>
    %105 = arith.subf %95, %104 : vector<4x32xf32>
    %106 = arith.mulf %103, %105 : vector<4x32xf32>
    %cst_46 = arith.constant dense<0.000000e+00> : vector<4xf32>
    %107 = vector.multi_reduction <add>, %106, %cst_46 [1] : vector<4x32xf32> to vector<4xf32>
    %108 = vector.shape_cast %107 : vector<4xf32> to vector<4x1xf32>
    %cst_47 = arith.constant 3.200000e+01 : f32
    %109 = vector.broadcast %cst_47 : f32 to vector<4x1xf32>
    %110 = arith.divf %108, %109 : vector<4x1xf32>
    %111 = vector.broadcast %101 : vector<4x1xf32> to vector<4x32xf32>
    %112 = arith.subf %95, %111 : vector<4x32xf32>
    %cst_48 = arith.constant 9.99999974E-6 : f32
    %113 = vector.broadcast %cst_48 : f32 to vector<4x1xf32>
    %114 = arith.addf %110, %113 : vector<4x1xf32>
    %115 = math.rsqrt %114 : vector<4x1xf32>
    %116 = vector.broadcast %115 : vector<4x1xf32> to vector<4x32xf32>
    %117 = arith.mulf %112, %116 : vector<4x32xf32>
    %118 = vector.broadcast %96 : vector<1x32xf32> to vector<4x32xf32>
    %119 = arith.mulf %117, %118 : vector<4x32xf32>
    %120 = vector.broadcast %97 : vector<1x32xf32> to vector<4x32xf32>
    %121 = arith.addf %119, %120 : vector<4x32xf32>
    %c0_49 = arith.constant 0 : index
    %c0_50 = arith.constant 0 : index
    %122 = vector.load %arg11[%c0_49, %c0_50] : memref<32x32xf32, #tpu.memory_space<vmem>>, vector<32x32xf32>
    %c0_51 = arith.constant 0 : index
    %c0_52 = arith.constant 0 : index
    %123 = vector.load %arg12[%c0_51, %c0_52] : memref<1x32xf32, #tpu.memory_space<vmem>>, vector<1x32xf32>
    %c0_53 = arith.constant 0 : index
    %c0_54 = arith.constant 0 : index
    %124 = vector.load %arg13[%c0_53, %c0_54] : memref<32x32xf32, #tpu.memory_space<vmem>>, vector<32x32xf32>
    %c0_55 = arith.constant 0 : index
    %c0_56 = arith.constant 0 : index
    %125 = vector.load %arg14[%c0_55, %c0_56] : memref<1x32xf32, #tpu.memory_space<vmem>>, vector<1x32xf32>
    %cst_57 = arith.constant dense<0.000000e+00> : vector<4x32xf32>
    %126 = tpu.matmul %121, %122, %cst_57 {dimension_numbers = #tpu.dot_dimension_numbers<[1], [0], [0], [1], [0, 0, 1, 1], [], []>} : vector<4x32xf32>, vector<32x32xf32>, vector<4x32xf32> -> vector<4x32xf32>
    %127 = vector.broadcast %123 : vector<1x32xf32> to vector<4x32xf32>
    %128 = arith.addf %126, %127 : vector<4x32xf32>
    %cst_58 = arith.constant 5.000000e-01 : f32
    %129 = vector.broadcast %cst_58 : f32 to vector<4x32xf32>
    %130 = arith.mulf %129, %128 : vector<4x32xf32>
    %cst_59 = arith.constant 4.471500e-02 : f32
    %131 = vector.broadcast %cst_59 : f32 to vector<4x32xf32>
    %132 = arith.mulf %131, %128 : vector<4x32xf32>
    %133 = arith.mulf %132, %128 : vector<4x32xf32>
    %134 = arith.mulf %133, %128 : vector<4x32xf32>
    %135 = arith.addf %128, %134 : vector<4x32xf32>
    %cst_60 = arith.constant 0.797884583 : f32
    %136 = vector.broadcast %cst_60 : f32 to vector<4x32xf32>
    %137 = arith.mulf %136, %135 : vector<4x32xf32>
    %138 = math.tanh %137 : vector<4x32xf32>
    %cst_61 = arith.constant 1.000000e+00 : f32
    %139 = vector.broadcast %cst_61 : f32 to vector<4x32xf32>
    %140 = arith.addf %139, %138 : vector<4x32xf32>
    %141 = arith.mulf %130, %140 : vector<4x32xf32>
    %cst_62 = arith.constant dense<0.000000e+00> : vector<4x32xf32>
    %142 = tpu.matmul %141, %124, %cst_62 {dimension_numbers = #tpu.dot_dimension_numbers<[1], [0], [0], [1], [0, 0, 1, 1], [], []>} : vector<4x32xf32>, vector<32x32xf32>, vector<4x32xf32> -> vector<4x32xf32>
    %143 = vector.broadcast %125 : vector<1x32xf32> to vector<4x32xf32>
    %144 = arith.addf %142, %143 : vector<4x32xf32>
    %145 = arith.addf %121, %144 : vector<4x32xf32>
    %c0_63 = arith.constant 0 : index
    %c0_64 = arith.constant 0 : index
    %146 = vector.load %arg15[%c0_63, %c0_64] : memref<1x32xf32, #tpu.memory_space<vmem>>, vector<1x32xf32>
    %c0_65 = arith.constant 0 : index
    %c0_66 = arith.constant 0 : index
    %147 = vector.load %arg16[%c0_65, %c0_66] : memref<1x32xf32, #tpu.memory_space<vmem>>, vector<1x32xf32>
    %cst_67 = arith.constant dense<0.000000e+00> : vector<4xf32>
    %148 = vector.multi_reduction <add>, %145, %cst_67 [1] : vector<4x32xf32> to vector<4xf32>
    %149 = vector.shape_cast %148 : vector<4xf32> to vector<4x1xf32>
    %cst_68 = arith.constant 3.200000e+01 : f32
    %150 = vector.broadcast %cst_68 : f32 to vector<4x1xf32>
    %151 = arith.divf %149, %150 : vector<4x1xf32>
    %152 = vector.broadcast %151 : vector<4x1xf32> to vector<4x32xf32>
    %153 = arith.subf %145, %152 : vector<4x32xf32>
    %154 = vector.broadcast %151 : vector<4x1xf32> to vector<4x32xf32>
    %155 = arith.subf %145, %154 : vector<4x32xf32>
    %156 = arith.mulf %153, %155 : vector<4x32xf32>
    %cst_69 = arith.constant dense<0.000000e+00> : vector<4xf32>
    %157 = vector.multi_reduction <add>, %156, %cst_69 [1] : vector<4x32xf32> to vector<4xf32>
    %158 = vector.shape_cast %157 : vector<4xf32> to vector<4x1xf32>
    %cst_70 = arith.constant 3.200000e+01 : f32
    %159 = vector.broadcast %cst_70 : f32 to vector<4x1xf32>
    %160 = arith.divf %158, %159 : vector<4x1xf32>
    %161 = vector.broadcast %151 : vector<4x1xf32> to vector<4x32xf32>
    %162 = arith.subf %145, %161 : vector<4x32xf32>
    %cst_71 = arith.constant 9.99999974E-6 : f32
    %163 = vector.broadcast %cst_71 : f32 to vector<4x1xf32>
    %164 = arith.addf %160, %163 : vector<4x1xf32>
    %165 = math.rsqrt %164 : vector<4x1xf32>
    %166 = vector.broadcast %165 : vector<4x1xf32> to vector<4x32xf32>
    %167 = arith.mulf %162, %166 : vector<4x32xf32>
    %168 = vector.broadcast %146 : vector<1x32xf32> to vector<4x32xf32>
    %169 = arith.mulf %167, %168 : vector<4x32xf32>
    %170 = vector.broadcast %147 : vector<1x32xf32> to vector<4x32xf32>
    %171 = arith.addf %169, %170 : vector<4x32xf32>
    %c0_72 = arith.constant 0 : index
    %c0_73 = arith.constant 0 : index
    %c0_74 = arith.constant 0 : index
    %172 = vector.load %arg19[%c0_72, %c0_73, %c0_74] : memref<1x4x32xf32, #tpu.memory_space<vmem>>, vector<1x4x32xf32>
    %173 = vector.shape_cast %172 : vector<1x4x32xf32> to vector<4x32xf32>
    %174 = vector.shape_cast %171 : vector<4x32xf32> to vector<1x4x32xf32>
    tpu.vector_store %arg19[%c0_72, %c0_73, %c0_74], %174 {strides = array<i32>} : memref<1x4x32xf32, #tpu.memory_space<vmem>>, vector<1x4x32xf32>,
    %c0_75 = arith.constant 0 : index
    %c0_76 = arith.constant 0 : index
    %175 = vector.load %arg17[%c0_75, %c0_76] : memref<32x8xf32, #tpu.memory_space<vmem>>, vector<32x8xf32>
    %cst_77 = arith.constant dense<0.000000e+00> : vector<4x8xf32>
    %176 = tpu.matmul %171, %175, %cst_77 {dimension_numbers = #tpu.dot_dimension_numbers<[1], [0], [0], [1], [0, 0, 1, 1], [], []>} : vector<4x32xf32>, vector<32x8xf32>, vector<4x8xf32> -> vector<4x8xf32>
    %c0_78 = arith.constant 0 : index
    %c0_79 = arith.constant 0 : index
    %177 = vector.load %arg18[%c0_78, %c0_79] : memref<1x8xf32, #tpu.memory_space<vmem>>, vector<1x8xf32>
    %178 = vector.broadcast %177 : vector<1x8xf32> to vector<4x8xf32>
    %179 = arith.addf %176, %178 : vector<4x8xf32>
    %c0_80 = arith.constant 0 : index
    %c0_81 = arith.constant 0 : index
    %c0_82 = arith.constant 0 : index
    %180 = vector.load %arg20[%c0_80, %c0_81, %c0_82] : memref<1x4x8xf32, #tpu.memory_space<vmem>>, vector<1x4x8xf32>
    %181 = vector.shape_cast %180 : vector<1x4x8xf32> to vector<4x8xf32>
    %182 = vector.shape_cast %179 : vector<4x8xf32> to vector<1x4x8xf32>
    tpu.vector_store %arg20[%c0_80, %c0_81, %c0_82], %182 {strides = array<i32>} : memref<1x4x8xf32, #tpu.memory_space<vmem>>, vector<1x4x8xf32>,
    return
  }
  func.func @transform_0(%arg0: i32) -> (i32, i32, i32) {
    %c0_i32 = arith.constant 0 : i32
    %c0_i32_0 = arith.constant 0 : i32
    %c0_i32_1 = arith.constant 0 : i32
    return %arg0, %c0_i32, %c0_i32_0 : i32, i32, i32
  }
  func.func @transform_1(%arg0: i32) -> (i32, i32, i32) {
    %c0_i32 = arith.constant 0 : i32
    %c0_i32_0 = arith.constant 0 : i32
    %c0_i32_1 = arith.constant 0 : i32
    return %arg0, %c0_i32, %c0_i32_0 : i32, i32, i32
  }
  func.func @transform_2(%arg0: i32) -> (i32, i32) {
    %c0_i32 = arith.constant 0 : i32
    %c0_i32_0 = arith.constant 0 : i32
    %c0_i32_1 = arith.constant 0 : i32
    return %c0_i32, %c0_i32_0 : i32, i32
  }
  func.func @transform_3(%arg0: i32) -> (i32, i32) {
    %c0_i32 = arith.constant 0 : i32
    %c0_i32_0 = arith.constant 0 : i32
    %c0_i32_1 = arith.constant 0 : i32
    return %c0_i32, %c0_i32_0 : i32, i32
  }
  func.func @transform_4(%arg0: i32) -> (i32, i32) {
    %c0_i32 = arith.constant 0 : i32
    %c0_i32_0 = arith.constant 0 : i32
    %c0_i32_1 = arith.constant 0 : i32
    return %c0_i32, %c0_i32_0 : i32, i32
  }
  func.func @transform_5(%arg0: i32) -> (i32, i32) {
    %c0_i32 = arith.constant 0 : i32
    %c0_i32_0 = arith.constant 0 : i32
    %c0_i32_1 = arith.constant 0 : i32
    return %c0_i32, %c0_i32_0 : i32, i32
  }
  func.func @transform_6(%arg0: i32) -> (i32, i32) {
    %c0_i32 = arith.constant 0 : i32
    %c0_i32_0 = arith.constant 0 : i32
    %c0_i32_1 = arith.constant 0 : i32
    return %c0_i32, %c0_i32_0 : i32, i32
  }
  func.func @transform_7(%arg0: i32) -> (i32, i32) {
    %c0_i32 = arith.constant 0 : i32
    %c0_i32_0 = arith.constant 0 : i32
    %c0_i32_1 = arith.constant 0 : i32
    return %c0_i32, %c0_i32_0 : i32, i32
  }
  func.func @transform_8(%arg0: i32) -> (i32, i32) {
    %c0_i32 = arith.constant 0 : i32
    %c0_i32_0 = arith.constant 0 : i32
    %c0_i32_1 = arith.constant 0 : i32
    return %c0_i32, %c0_i32_0 : i32, i32
  }
  func.func @transform_9(%arg0: i32) -> (i32, i32) {
    %c0_i32 = arith.constant 0 : i32
    %c0_i32_0 = arith.constant 0 : i32
    %c0_i32_1 = arith.constant 0 : i32
    return %c0_i32, %c0_i32_0 : i32, i32
  }
  func.func @transform_10(%arg0: i32) -> (i32, i32) {
    %c0_i32 = arith.constant 0 : i32
    %c0_i32_0 = arith.constant 0 : i32
    %c0_i32_1 = arith.constant 0 : i32
    return %c0_i32, %c0_i32_0 : i32, i32
  }
  func.func @transform_11(%arg0: i32) -> (i32, i32) {
    %c0_i32 = arith.constant 0 : i32
    %c0_i32_0 = arith.constant 0 : i32
    %c0_i32_1 = arith.constant 0 : i32
    return %c0_i32, %c0_i32_0 : i32, i32
  }
  func.func @transform_12(%arg0: i32) -> (i32, i32) {
    %c0_i32 = arith.constant 0 : i32
    %c0_i32_0 = arith.constant 0 : i32
    %c0_i32_1 = arith.constant 0 : i32
    return %c0_i32, %c0_i32_0 : i32, i32
  }
  func.func @transform_13(%arg0: i32) -> (i32, i32) {
    %c0_i32 = arith.constant 0 : i32
    %c0_i32_0 = arith.constant 0 : i32
    %c0_i32_1 = arith.constant 0 : i32
    return %c0_i32, %c0_i32_0 : i32, i32
  }
  func.func @transform_14(%arg0: i32) -> (i32, i32) {
    %c0_i32 = arith.constant 0 : i32
    %c0_i32_0 = arith.constant 0 : i32
    %c0_i32_1 = arith.constant 0 : i32
    return %c0_i32, %c0_i32_0 : i32, i32
  }
  func.func @transform_15(%arg0: i32) -> (i32, i32) {
    %c0_i32 = arith.constant 0 : i32
    %c0_i32_0 = arith.constant 0 : i32
    %c0_i32_1 = arith.constant 0 : i32
    return %c0_i32, %c0_i32_0 : i32, i32
  }
  func.func @transform_16(%arg0: i32) -> (i32, i32) {
    %c0_i32 = arith.constant 0 : i32
    %c0_i32_0 = arith.constant 0 : i32
    %c0_i32_1 = arith.constant 0 : i32
    return %c0_i32, %c0_i32_0 : i32, i32
  }
  func.func @transform_17(%arg0: i32) -> (i32, i32) {
    %c0_i32 = arith.constant 0 : i32
    %c0_i32_0 = arith.constant 0 : i32
    %c0_i32_1 = arith.constant 0 : i32
    return %c0_i32, %c0_i32_0 : i32, i32
  }
  func.func @transform_18(%arg0: i32) -> (i32, i32, i32) {
    %c0_i32 = arith.constant 0 : i32
    %c0_i32_0 = arith.constant 0 : i32
    %c0_i32_1 = arith.constant 0 : i32
    return %arg0, %c0_i32, %c0_i32_0 : i32, i32, i32
  }
  func.func @transform_19(%arg0: i32) -> (i32, i32, i32) {
    %c0_i32 = arith.constant 0 : i32
    %c0_i32_0 = arith.constant 0 : i32
    %c0_i32_1 = arith.constant 0 : i32
    return %arg0, %c0_i32, %c0_i32_0 : i32, i32, i32
  }
}

</mosaic_0001>

<bundles_post_ra>
// kernel: decoder_forward.6
= control target key start
LH: loop header
LB: loop body
LE: loop exit
PB: predicated region body
PF: predicated region fallthrough
CT: control target
= control target key end

     0   :  { %s2300_s18 = smov 0   ;;  %s2530_s0 = inlined_call_operand.vmem [shape: f32[6,4,32], index: 0, kind: input, shape index: {}]   ;;  %s2531_s1 = inlined_call_operand.vmem [shape: f32[32,32], index: 1, kind: input, shape index: {}]   ;;  %s2532_s2 = inlined_call_operand.vmem [shape: f32[1,32], index: 2, kind: input, shape index: {}]   ;;  %s2533_s3 = inlined_call_operand.vmem [shape: f32[32,64], index: 3, kind: input, shape index: {}]   ;;  %s2534_s4 = inlined_call_operand.vmem [shape: f32[1,64], index: 4, kind: input, shape index: {}]   ;;  %s2535_s5 = inlined_call_operand.vmem [shape: f32[32,32], index: 5, kind: input, shape index: {}]   ;;  %s2536_s6 = inlined_call_operand.vmem [shape: f32[1,32], index: 6, kind: input, shape index: {}]   ;;  %s2537_s7 = inlined_call_operand.vmem [shape: f32[1,32], index: 7, kind: input, shape index: {}]   ;;  %s2538_s8 = inlined_call_operand.vmem [shape: f32[1,32], index: 8, kind: input, shape index: {}]   ;;  %s2539_s9 = inlined_call_operand.vmem [shape: f32[32,64], index: 9, kind: input, shape index: {}]   ;;  %s2540_s10 = inlined_call_operand.vmem [shape: f32[1,64], index: 10, kind: input, shape index: {}]   ;;  %s2541_s11 = inlined_call_operand.vmem [shape: f32[64,32], index: 11, kind: input, shape index: {}]   ;;  %s2542_s12 = inlined_call_operand.vmem [shape: f32[1,32], index: 12, kind: input, shape index: {}]   ;;  %s2543_s13 = inlined_call_operand.vmem [shape: f32[1,32], index: 13, kind: input, shape index: {}]   ;;  %s2544_s14 = inlined_call_operand.vmem [shape: f32[1,32], index: 14, kind: input, shape index: {}]   ;;  %s2545_s15 = inlined_call_operand.vmem [shape: f32[6,4,32], index: 15, kind: output, shape index: {}]  }
   0x1 LB: > { %s1930_s19 = sadd.s32 4294967295, %s2208_s18   ;;  %p1934_p0 = scmp.ge.s32.totalorder %s2208_s18, 1  ;;  %s2208_s18 = sphi %s2300_s18, %s25_s18  }
   0x2   : > { %p436_p1 = scmp.lt.s32.totalorder %s2208_s18, 7 }
   0x4   : > { %p437_p2 = pnand %p1934_p0, %p436_p1 }
   0x5   : > { %v491_v0 = vld [vmem:[%s2531_s1] sm:$0xff] (!%p437_p2)  ;;  %v492_v1 = vld [vmem:[%s2531_s1 + $0x8] sm:$0xff] (!%p437_p2)  ;;  %v2210_v3 = vmov (!%p437_p2), 0.0|0.0   ;;  %v493_v6 = vld [vmem:[%s2531_s1 + $0x10] sm:$0xff] (!%p437_p2)  ;;  %p482_p3 = scmp.lt.s32.totalorder (!%p437_p2), %s1930_s19, 5  ;;  %vm2211_vm0 = vmmov (!%p437_p2), 0  }
   0x6   : > { %440 = sbr.rel (%p437_p2) target bundleno = 3085 (0xc0d), region = 80  ;;  %v496_v2 = vld [vmem:[%s2533_s3] sm:$0xff] (!%p437_p2)  ;;  %2132 = vmatprep.subr.bf16.mxu0 (!%p437_p2), %v2210_v3  ;;  %2138 = vmatprep.subr.bf16.mxu1 (!%p437_p2), %v2210_v3  ;;  %v2133_v4 = vpack.c.bf16 (!%p437_p2), %v492_v1, %v491_v0  ;;  %v497_v5 = vld [vmem:[%s2533_s3 + $0x8] sm:$0xff] (!%p437_p2)  ;;  %v494_v7 = vld [vmem:[%s2531_s1 + $0x18] sm:$0xff] (!%p437_p2)  ;;  %v2212_v11 = vmov (!%p437_p2), 0.0   ;;  %vm512_vm1 = vcmask (!%p437_p2), 261120  }
   0x7   : > { %v2139_v8 = vpack.c.bf16 (!%p437_p2), %v497_v5, %v496_v2  ;;  %v498_v9 = vld [vmem:[%s2533_s3 + $0x10] sm:$0xff] (!%p437_p2)  ;;  %v499_v10 = vld [vmem:[%s2533_s3 + $0x18] sm:$0xff] (!%p437_p2)  ;;  %2028 = vmatprep.mubr.msk.f32.mxu0 (!%p437_p2), %vm2211_vm0, %v2212_v11  ;;  %2039 = vmatprep.mubr.msk.f32.mxu1 (!%p437_p2), %vm2211_vm0, %v2212_v11  ;;  %v2136_v12 = vpack.c.bf16 (!%p437_p2), %v494_v7, %v493_v6  ;;  %v1937_v15 = vld [vmem:[%s2532_s2] ss:$0 sm:$0xff] (!%p437_p2)  ;;  %vm670_vm2 = vcmask (!%p437_p2), 64512   ;;  %s2213_s16 = smov (!%p437_p2), 120  }
   0x8   : > { %2134 = vmatpush3.bf16.msra.mxu0 (!%p437_p2), %v2133_v4  ;;  %v2142_v13 = vpack.c.bf16 (!%p437_p2), %v499_v10, %v498_v9  ;;  %v1939_v16 = vld [vmem:[%s2534_s4] ss:$0 sm:$0xff] (!%p437_p2)  ;;  %vm747_vm3 = vcmask (!%p437_p2), 27648   ;;  %s2214_s17 = smov (!%p437_p2), 96   ;;  %s2215_s20 = smov (!%p437_p2), 112   ;;  %vm764_vm4 = vcmask (!%p437_p2), 1043456  }
   0x9   : > { %2140 = vmatpush3.bf16.msra.mxu1 (!%p437_p2), %v2139_v8  ;;  %2135 = vmatprep.subr.bf16.mxu0 (!%p437_p2), %v2210_v3  ;;  %vm760_vm5 = vcmask (!%p437_p2), 31744   ;;  %s2216_s21 = smov (!%p437_p2), 88   ;;  %v501_v38 = vld [vmem:[%s2535_s5] sm:$0xff] (!%p437_p2)  ;;  %s2217_s25 = smov (!%p437_p2), 80   ;;  %v502_v52 = vld [vmem:[%s2535_s5 + $0x8] sm:$0xff] (!%p437_p2)  ;;  %vm1635_vm6 = vcmask (!%p437_p2), 257024  }
   0xa   : > { %2141 = vmatprep.subr.bf16.mxu1 (!%p437_p2), %v2210_v3  ;;  %s2219_s29 = smov (!%p437_p2), 72   ;;  %v1941_v8 = vld [vmem:[%s2536_s6] ss:$0 sm:$0xff] (!%p437_p2)  ;;  %vm1772_vm7 = vcmask (!%p437_p2), 523264  }
   0xc   : > { %2137 = vmatpush3.bf16.msra.mxu0 (!%p437_p2), %v2136_v12 }
   0xd   : > { %s2547_s19 = smov (!%p482_p3, %s1930_s19), 5  ;;  %2143 = vmatpush3.bf16.msra.mxu1 %v2142_v13  ;;  %2042 = vmatprep.subr.mxu0 %v2212_v11 }
   0xe   : > { %s1935_s23 = sshll.u32 %s2547_s19, 2  ;;  %2057 = vmatprep.subr.mxu1 %v2212_v11 }
   0xf   : > { %s485_s26 = scalar_lea.vmem %s2530_s0, %s1935_s23 }
  0x10   : > { %v2348_v14 = vld [vmem:[%s485_s26] sm:$0xf]  ;;  %s2218_s26 = smov 104  }
  0x11   : > { %2029 = vmatmul.mubr.msk.f32.vlgmr.msra.gmra.mrb[0].mxu0 %vm512_vm1, %v2348_v14  ;;  %2040 = vmatmul.mubr.msk.f32.vlgmr.msra.gmra.mrb[0].mxu1 %vm512_vm1, %v2348_v14 }
  0x12   : > { %2044 = vmatprep.mubr.msk.f32.mxu0 %vm2211_vm0, %v2212_v11  ;;  %2059 = vmatprep.mubr.msk.f32.mxu1 %vm2211_vm0, %v2212_v11 }
  0xe4   : > { %v582_v17 = vpop.f32.mrb[0].mxu0  ;;  %v659_v19 = vpop.f32.mrb[0].mxu1 }
  0xe5   : > { %v583_v18 = vadd.f32 %v1937_v15, %v582_v17  ;;  %v2030_v20 = vpop.f32.mrb[1].mxu0  ;;  %v2366_v21 = vadd.f32 %v1939_v16, %v659_v19  ;;  %v2041_v22 = vpop.f32.mrb[1].mxu1  ;;  %v503_v15 = vld [vmem:[%s2535_s5 + $0x10] sm:$0xff] }
  0xe7   : > { %v586_v23 = vmul.f32 0.35355338, %v583_v18  ;;  %914 = vrot.lane.b32.xlu0 %v2366_v21, %s2213_s16  ;;  %2043 = vmatpush3.xpose.msk.msra.mxu0 %vm670_vm2, %v2366_v21 }
  0xe8   : > { %2047 = vmatprep.subr.mxu0 %v2212_v11 }
  0xea   : > { %2045 = vmatmul.mubr.msk.f32.vlgmr.msra.gmra.mrb[2].mxu0 %vm670_vm2, %v586_v23 }
  0xeb   : > { %912 = vrot.lane.b32.xlu0 %v586_v23, %s2213_s16  ;;  %2049 = vmatprep.mubr.msk.f32.mxu0 %vm2211_vm0, %v2212_v11 }
 0x159   : > { %v915_v24 = vpop.permute.xlu0 %914 }
 0x15a   : > { %2058 = vmatpush3.xpose.msk.msra.mxu1 %vm670_vm2, %v915_v24 }
 0x15b   : > { %2067 = vmatprep.subr.mxu1 %v2212_v11 }
 0x15d   : > { %v913_v25 = vpop.permute.xlu0 %912 }
 0x15e   : > { %2060 = vmatmul.mubr.msk.f32.vlgmr.msra.gmra.mrb[2].mxu1 %vm670_vm2, %v913_v25 }
 0x15f   : > { %2069 = vmatprep.mubr.msk.f32.mxu1 %vm2211_vm0, %v2212_v11  ;;  %2068 = vmatpush3.msra.mxu1 %v502_v52 }
 0x160   : > { %2077 = vmatprep.subr.mxu1 %v2212_v11 }
 0x1bd   : > { %v743_v26 = vpop.f32.mrb[2].mxu0 }
 0x1be   : > { %v2046_v27 = vpop.f32.mrb[3].mxu0  ;;  %v748_v28 = vsel %vm747_vm3, %v743_v26, -inf }
 0x1bf   : > { %749 = vmax.xlane.f32.xlu1 %v748_v28 }
 0x1d0   : > { %758 = vrot.lane.b32.xlu1 %v2366_v21, %s2214_s17 }
 0x231   : > { %v986_v29 = vpop.f32.mrb[2].mxu1 }
 0x232   : > { %v2061_v30 = vpop.f32.mrb[3].mxu1  ;;  %v990_v31 = vsel %vm747_vm3, %v986_v29, -inf }
 0x233   : > { %991 = vmax.xlane.f32.xlu1 %v990_v31 }
 0x244   : > { %1154 = vrot.lane.b32.xlu1 %v2366_v21, %s2215_s20 }
 0x24c   : > { %v750_v32 = vpop.xlane.xlu1 %749 }
 0x24d   : > { %v751_v33 = vsub.f32 %v743_v26, %v750_v32 }
 0x24f   : > { %v752_v34 = vmul.f32 1.442695, %v751_v33  ;;  %v504_v33 = vld [vmem:[%s2535_s5 + $0x18] sm:$0xff] }
 0x250   : > { %v759_v35 = vpop.permute.xlu1 %758 }
 0x251   : > { %2180 = vpow2.f32 %v752_v34  ;;  %2048 = vmatpush3.msk.msra.mxu0 %vm764_vm4, %v759_v35 }
 0x252   : > { %2052 = vmatprep.subr.mxu0 %v2212_v11 }
 0x25b   : > { %v2181_v36 = vpop.eup %2180 }
 0x25c   : > { %2050 = vmatmul.mubr.msk.f32.vlgmr.msra.gmra.mrb[4].mxu0 %vm760_vm5, %v2181_v36  ;;  %v754_v37 = vsel %vm747_vm3, %v2181_v36, 0.0 }
 0x25d   : > { %755 = vadd.xlane.f32.xlu0 %v754_v37  ;;  %2054 = vmatprep.mubr.msk.f32.mxu0 %vm2211_vm0, %v2212_v11 }
 0x25e   : > { %2053 = vmatpush3.msra.mxu0 %v501_v38 }
 0x25f   : > { %2062 = vmatprep.subr.mxu0 %v2212_v11 }
 0x273   : > { %1000 = vrot.lane.b32.xlu0 %v2366_v21, %s2216_s21 }
 0x277   : > { %1152 = vrot.lane.b32.xlu0 %v586_v23, %s2215_s20 }
 0x2c0   : > { %v992_v39 = vpop.xlane.xlu1 %991 }
 0x2c1   : > { %v993_v40 = vsub.f32 %v986_v29, %v992_v39 }
 0x2c3   : > { %v994_v41 = vmul.f32 1.442695, %v993_v40 }
 0x2c4   : > { %v1155_v50 = vpop.permute.xlu1 %1154 }
 0x2c5   : > { %2182 = vpow2.f32 %v994_v41 }
 0x2cf   : > { %v2183_v42 = vpop.eup %2182 }
 0x2d0   : > { %v996_v43 = vsel %vm747_vm3, %v2183_v42, 0.0 }
 0x2d1   : > { %997 = vadd.xlane.f32.xlu0 %v996_v43 }
 0x2e7   : > { %1240 = vrot.lane.b32.xlu0 %v2366_v21, %s2217_s25 }
 0x2ea   : > { %v756_v44 = vpop.xlane.xlu0 %755 }
 0x2eb   : > { %1392 = vrot.lane.b32.xlu0 %v586_v23, %s2218_s26  ;;  %2184 = vrcp.f32 %v756_v44 }
 0x2ee   : > { %v1001_v49 = vpop.permute.xlu0 %1000 }
 0x2f2   : > { %v1153_v51 = vpop.permute.xlu0 %1152 }
 0x2f5   : > { %v2185_v45 = vpop.eup %2184 }
 0x32f   : > { %v833_v46 = vpop.f32.mrb[4].mxu0 }
 0x330   : > { %v837_v47 = vmul.f32 %v2185_v45, %v833_v46  ;;  %v2051_v48 = vpop.f32.mrb[5].mxu0 }
 0x332   : > { %2055 = vmatmul.mubr.msk.f32.vlgmr.msra.gmra.mrb[6].mxu0 %vm670_vm2, %v837_v47 }
 0x333   : > { %2063 = vmatpush3.msk.msra.mxu0 %vm764_vm4, %v1001_v49  ;;  %2064 = vmatprep.mubr.msk.f32.mxu0 %vm2211_vm0, %v2212_v11  ;;  %v1665_v49 = vld [vmem:[%s2539_s9 + $0x8] sm:$0xff] }
 0x334   : > { %2072 = vmatprep.subr.mxu0 %v2212_v11 }
 0x336   : > { %2065 = vmatmul.mubr.msk.f32.vlgmr.msra.gmra.mrb[8].mxu0 %vm760_vm5, %v2183_v42 }
 0x337   : > { %2074 = vmatprep.mubr.msk.f32.mxu0 %vm2211_vm0, %v2212_v11 }
 0x33a   : > { %2073 = vmatpush3.xpose.msk.msra.mxu0 %vm670_vm2, %v1155_v50 }
 0x33b   : > { %2082 = vmatprep.subr.mxu0 %v2212_v11 }
 0x33d   : > { %2075 = vmatmul.mubr.msk.f32.vlgmr.msra.gmra.mrb[10].mxu0 %vm670_vm2, %v1153_v51  ;;  %v1667_v51 = vld [vmem:[%s2539_s9 + $0x18] sm:$0xff] }
 0x33e   : > { %2084 = vmatprep.mubr.msk.f32.mxu0 %vm2211_vm0, %v2212_v11  ;;  %2083 = vmatpush3.msra.mxu0 %v503_v15 }
 0x33f   : > { %2092 = vmatprep.subr.mxu0 %v2212_v11 }
 0x35e   : > { %v998_v53 = vpop.xlane.xlu0 %997 }
 0x35f   : > { %2186 = vrcp.f32 %v998_v53 }
 0x362   : > { %v1241_v60 = vpop.permute.xlu0 %1240 }
 0x366   : > { %v1393_v7 = vpop.permute.xlu0 %1392 }
 0x369   : > { %v2187_v56 = vpop.eup %2186 }
 0x405   : > { %v907_v54 = vpop.f32.mrb[6].mxu0 }
 0x406   : > { %v2056_v55 = vpop.f32.mrb[7].mxu0  ;;  %v911_v9 = vadd.f32 %v1941_v8, %v907_v54  ;;  %v1675_v8 = vld [vmem:[%s2541_s11 + $0x30] sm:$0xff] }
 0x409   : > { %v1073_v57 = vpop.f32.mrb[8].mxu0 }
 0x40a   : > { %v1077_v58 = vmul.f32 %v2187_v56, %v1073_v57  ;;  %v2066_v59 = vpop.f32.mrb[9].mxu0  ;;  %v1962_v57 = vld [vmem:[%s2537_s7] ss:$0 sm:$0xff] }
 0x40b   : > { %v1963_v59 = vld [vmem:[%s2538_s8] ss:$0 sm:$0xff] }
 0x40c   : > { %2070 = vmatmul.mubr.msk.f32.vlgmr.msra.gmra.mrb[4].mxu1 %vm670_vm2, %v1077_v58 }
 0x40d   : > { %2078 = vmatpush3.msk.msra.mxu1 %vm764_vm4, %v1241_v60  ;;  %2079 = vmatprep.mubr.msk.f32.mxu1 %vm2211_vm0, %v2212_v11 }
 0x40e   : > { %2087 = vmatprep.subr.mxu1 %v2212_v11 }
 0x410   : > { %v1226_v61 = vpop.f32.mrb[10].mxu0 }
 0x411   : > { %v2076_v62 = vpop.f32.mrb[11].mxu0  ;;  %v1230_v63 = vsel %vm747_vm3, %v1226_v61, -inf }
 0x412   : > { %1231 = vmax.xlane.f32.xlu1 %v1230_v63  ;;  %v1669_v62 = vld [vmem:[%s2541_s11] sm:$0xff]  ;;  %v1670_v63 = vld [vmem:[%s2541_s11 + $0x8] sm:$0xff] }
 0x423   : > { %1394 = vrot.lane.b32.xlu1 %v2366_v21, %s2218_s26  ;;  %s489_s26 = scalar_lea.vmem %s2545_s15, %s1935_s23 }
 0x49f   : > { %v1232_v0 = vpop.xlane.xlu1 %1231 }
 0x4a0   : > { %v1233_v1 = vsub.f32 %v1226_v61, %v1232_v0  ;;  %v2151_v0 = vpack.c.bf16 %v1670_v63, %v1669_v62 }
 0x4a2   : > { %v1234_v2 = vmul.f32 1.442695, %v1233_v1  ;;  %v1671_v1 = vld [vmem:[%s2541_s11 + $0x10] sm:$0xff] }
 0x4a3   : > { %v1395_v5 = vpop.permute.xlu1 %1394 }
 0x4a4   : > { %2188 = vpow2.f32 %v1234_v2  ;;  %v1672_v2 = vld [vmem:[%s2541_s11 + $0x18] sm:$0xff] }
 0x4ae   : > { %v2189_v4 = vpop.eup %2188 }
 0x4af   : > { %2080 = vmatmul.mubr.msk.f32.vlgmr.msra.gmra.mrb[6].mxu1 %vm760_vm5, %v2189_v4  ;;  %v1236_v6 = vsel %vm747_vm3, %v2189_v4, 0.0  ;;  %v2154_v4 = vpack.c.bf16 %v1672_v2, %v1671_v1 }
 0x4b0   : > { %2088 = vmatpush3.xpose.msk.msra.mxu1 %vm670_vm2, %v1395_v5  ;;  %1237 = vadd.xlane.f32.xlu0 %v1236_v6  ;;  %v1673_v5 = vld [vmem:[%s2541_s11 + $0x20] sm:$0xff]  ;;  %v1674_v6 = vld [vmem:[%s2541_s11 + $0x28] sm:$0xff] }
 0x4b1   : > { %2089 = vmatprep.mubr.msk.f32.mxu1 %vm2211_vm0, %v2212_v11  ;;  %2097 = vmatprep.subr.mxu1 %v2212_v11 }
 0x4b3   : > { %2090 = vmatmul.mubr.msk.f32.vlgmr.msra.gmra.mrb[8].mxu1 %vm670_vm2, %v1393_v7  ;;  %v2157_v7 = vpack.c.bf16 %v1674_v6, %v1673_v5 }
 0x4b4   : > { %2099 = vmatprep.mubr.msk.f32.mxu1 %vm2211_vm0, %v2212_v11  ;;  %2098 = vmatpush3.msra.mxu1 %v504_v33 }
 0x4b5   : > { %2150 = vmatprep.subr.bf16.mxu1 %v2210_v3 }
 0x4c6   : > { %1480 = vrot.lane.b32.xlu0 %v2366_v21, %s2219_s29 }
 0x4df   : > { %v1147_v10 = vpop.f32.mrb[4].mxu1 }
 0x4e0   : > { %v1151_v12 = vadd.f32 %v1147_v10, %v911_v9  ;;  %v2071_v13 = vpop.f32.mrb[5].mxu1  ;;  %v1676_v9 = vld [vmem:[%s2541_s11 + $0x38] sm:$0xff] }
 0x4e1   : > { %v2160_v10 = vpack.c.bf16 %v1676_v9, %v1675_v8 }
 0x53d   : > { %v1238_v16 = vpop.xlane.xlu0 %1237 }
 0x53e   : > { %2190 = vrcp.f32 %v1238_v16 }
 0x541   : > { %v1481_v21 = vpop.permute.xlu0 %1480 }
 0x548   : > { %v2191_v17 = vpop.eup %2190 }
 0x582   : > { %v1313_v18 = vpop.f32.mrb[6].mxu1 }
 0x583   : > { %v1317_v19 = vmul.f32 %v2191_v17, %v1313_v18  ;;  %v2081_v20 = vpop.f32.mrb[7].mxu1 }
 0x585   : > { %2085 = vmatmul.mubr.msk.f32.vlgmr.msra.gmra.mrb[12].mxu0 %vm670_vm2, %v1317_v19 }
 0x586   : > { %2093 = vmatpush3.msk.msra.mxu0 %vm764_vm4, %v1481_v21  ;;  %v1466_v22 = vpop.f32.mrb[8].mxu1  ;;  %2094 = vmatprep.mubr.msk.f32.mxu0 %vm2211_vm0, %v2212_v11 }
 0x587   : > { %v2091_v23 = vpop.f32.mrb[9].mxu1  ;;  %v1470_v24 = vsel %vm747_vm3, %v1466_v22, -inf  ;;  %2144 = vmatprep.subr.bf16.mxu0 %v2210_v3 }
 0x588   : > { %1471 = vmax.xlane.f32.xlu1 %v1470_v24 }
 0x615   : > { %v1472_v25 = vpop.xlane.xlu1 %1471 }
 0x616   : > { %v1473_v26 = vsub.f32 %v1466_v22, %v1472_v25 }
 0x618   : > { %v1474_v27 = vmul.f32 1.442695, %v1473_v26 }
 0x61a   : > { %2192 = vpow2.f32 %v1474_v27 }
 0x624   : > { %v2193_v28 = vpop.eup %2192 }
 0x625   : > { %2095 = vmatmul.mubr.msk.f32.vlgmr.msra.gmra.mrb[14].mxu0 %vm760_vm5, %v2193_v28  ;;  %v1476_v29 = vsel %vm747_vm3, %v2193_v28, 0.0 }
 0x626   : > { %1477 = vadd.xlane.f32.xlu1 %v1476_v29  ;;  %2110 = vmatprep.mubr.msk.f32.mxu0 %vm2211_vm0, %v2212_v11 }
 0x658   : > { %v1387_v30 = vpop.f32.mrb[12].mxu0 }
 0x659   : > { %v1391_v31 = vadd.f32 %v1387_v30, %v1151_v12  ;;  %v2086_v32 = vpop.f32.mrb[13].mxu0  ;;  %v1964_v12 = vld [vmem:[%s2540_s10] ss:$0 sm:$0xff] }
 0x6b3   : > { %v1478_v34 = vpop.xlane.xlu1 %1477 }
 0x6b4   : > { %2194 = vrcp.f32 %v1478_v34 }
 0x6be   : > { %v2195_v35 = vpop.eup %2194 }
 0x6f8   : > { %v1553_v36 = vpop.f32.mrb[14].mxu0 }
 0x6f9   : > { %v1557_v37 = vmul.f32 %v2195_v35, %v1553_v36  ;;  %v2096_v38 = vpop.f32.mrb[15].mxu0 }
 0x6fb   : > { %2100 = vmatmul.mubr.msk.f32.vlgmr.msra.gmra.mrb[10].mxu1 %vm670_vm2, %v1557_v37 }
 0x6fc   : > { %2129 = vmatprep.mubr.msk.f32.mxu1 %vm2211_vm0, %v2212_v11  ;;  %v1664_v11 = vld [vmem:[%s2539_s9] sm:$0xff]  ;;  %2152 = vmatpush3.bf16.msra.mxu1 %v2151_v0 }
 0x6fd   : > { %v2145_v50 = vpack.c.bf16 %v1665_v49, %v1664_v11  ;;  %2153 = vmatprep.subr.bf16.mxu1 %v2210_v3 }
 0x6ff   : > { %2146 = vmatpush3.bf16.msra.mxu0 %v2145_v50 }
 0x700   : > { %2147 = vmatprep.subr.bf16.mxu0 %v2210_v3  ;;  %2155 = vmatpush3.bf16.msra.mxu1 %v2154_v4 }
 0x701   : > { %2156 = vmatprep.subr.bf16.mxu1 %v2210_v3 }
 0x704   : > { %2158 = vmatpush3.bf16.msra.mxu1 %v2157_v7 }
 0x705   : > { %2159 = vmatprep.subr.bf16.mxu1 %v2210_v3  ;;  %v1966_v3 = vld [vmem:[%s2542_s12] ss:$0 sm:$0xff] }
 0x708   : > { %2161 = vmatpush3.bf16.msra.mxu1 %v2160_v10 }
 0x7ce   : > { %v1627_v39 = vpop.f32.mrb[10].mxu1 }
 0x7cf   : > { %v1631_v40 = vadd.f32 %v1627_v39, %v1391_v31  ;;  %v2101_v41 = vpop.f32.mrb[11].mxu1 }
 0x7d1   : > { %v1632_v42 = vadd.f32 %v1631_v40, %v2348_v14  ;;  %v1666_v14 = vld [vmem:[%s2539_s9 + $0x10] sm:$0xff]  ;;  %v1968_v40 = vld [vmem:[%s2543_s13] ss:$0 sm:$0xff] }
 0x7d2   : > { %v2148_v52 = vpack.c.bf16 %v1667_v51, %v1666_v14 }
 0x7d3   : > { %v1636_v43 = vsel %vm1635_vm6, %v1632_v42, 0.0 }
 0x7d4   : > { %1637 = vadd.xlane.f32.xlu1 %v1636_v43  ;;  %2149 = vmatpush3.bf16.msra.mxu0 %v2148_v52 }
 0x861   : > { %v1638_v44 = vpop.xlane.xlu1 %1637 }
 0x862   : > { %v1640_v45 = vmul.f32 0.03125, %v1638_v44 }
 0x864   : > { %v1641_v46 = vsub.f32 %v1632_v42, %v1640_v45  ;;  %v1969_v42 = vld [vmem:[%s2544_s14] ss:$0 sm:$0xff] }
 0x866   : > { %v1642_v47 = vmul.f32 %v1641_v46, %v1641_v46 }
 0x868   : > { %v1643_v48 = vsel %vm1635_vm6, %v1642_v47, 0.0 }
 0x869   : > { %1644 = vadd.xlane.f32.xlu1 %v1643_v48 }
 0x8f6   : > { %v1645_v53 = vpop.xlane.xlu1 %1644 }
 0x8f7   : > { %v1646_v54 = vmul.f32 0.03125, %v1645_v53 }
 0x8f9   : > { %v1647_v55 = vadd.f32 1e-05, %v1646_v54 }
 0x8fb   : > { %2196 = vrsqrt.f32 %v1647_v55 }
 0x905   : > { %v2197_v56 = vpop.eup %2196 }
 0x906   : > { %v1649_v58 = vmul.f32 %v2197_v56, %v1641_v46 }
 0x908   : > { %v1656_v60 = vmul.f32 %v1962_v57, %v1649_v58 }
 0x90a   : > { %v1663_v61 = vadd.f32 %v1963_v59, %v1656_v60 }
 0x90c   : > { %2111 = vmatmul.mubr.msk.f32.vlgmr.msra.gmra.mrb[16].mxu0 %vm512_vm1, %v1663_v61 }
 0x9df   : > { %v1753_v13 = vpop.f32.mrb[16].mxu0 }
 0x9e0   : > { %v1754_v15 = vadd.f32 %v1964_v12, %v1753_v13  ;;  %v2112_v16 = vpop.f32.mrb[17].mxu0 }
 0x9e2   : > { %v1758_v17 = vmul.f32 0.044715, %v1754_v15  ;;  %v1757_v23 = vmul.f32 0.5, %v1754_v15 }
 0x9e4   : > { %v1759_v18 = vmul.f32 %v1758_v17, %v1754_v15 }
 0x9e6   : > { %v1760_v19 = vmul.f32 %v1759_v18, %v1754_v15 }
 0x9e8   : > { %v1761_v20 = vadd.f32 %v1760_v19, %v1754_v15 }
 0x9ea   : > { %v1762_v21 = vmul.f32 0.7978846, %v1761_v20 }
 0x9ec   : > { %2198 = vtanh.f32 %v1762_v21 }
 0x9f6   : > { %v2199_v22 = vpop.eup %2198 }
 0x9f7   : > { %v1764_v24 = vadd.f32 1.0, %v2199_v22 }
 0x9f9   : > { %v1765_v25 = vmul.f32 %v1764_v24, %v1757_v23 }
 0x9fb   : > { %2130 = vmatmul.mubr.msk.f32.vlgmr.msra.gmra.mrb[12].mxu1 %vm1772_vm7, %v1765_v25 }
 0xace   : > { %v1842_v26 = vpop.f32.mrb[12].mxu1 }
 0xacf   : > { %v1843_v27 = vadd.f32 %v1966_v3, %v1842_v26  ;;  %v2131_v28 = vpop.f32.mrb[13].mxu1 }
 0xad1   : > { %v1846_v29 = vadd.f32 %v1843_v27, %v1663_v61 }
 0xad3   : > { %v1849_v30 = vsel %vm1635_vm6, %v1846_v29, 0.0 }
 0xad4   : > { %1850 = vadd.xlane.f32.xlu0 %v1849_v30 }
 0xb61   : > { %v1851_v31 = vpop.xlane.xlu0 %1850 }
 0xb62   : > { %v1852_v32 = vmul.f32 0.03125, %v1851_v31 }
 0xb64   : > { %v1853_v33 = vsub.f32 %v1846_v29, %v1852_v32 }
 0xb66   : > { %v1854_v34 = vmul.f32 %v1853_v33, %v1853_v33 }
 0xb68   : > { %v1855_v35 = vsel %vm1635_vm6, %v1854_v34, 0.0 }
 0xb69   : > { %1856 = vadd.xlane.f32.xlu1 %v1855_v35 }
 0xbf6   : > { %v1857_v36 = vpop.xlane.xlu1 %1856 }
 0xbf7   : > { %v1858_v37 = vmul.f32 0.03125, %v1857_v36 }
 0xbf9   : > { %v1859_v38 = vadd.f32 1e-05, %v1858_v37 }
 0xbfb   : > { %2200 = vrsqrt.f32 %v1859_v38 }
 0xc05   : > { %v2201_v39 = vpop.eup %2200 }
 0xc06   : > { %v1861_v41 = vmul.f32 %v2201_v39, %v1853_v33 }
 0xc08   : > { %v1868_v43 = vmul.f32 %v1968_v40, %v1861_v41 }
 0xc0a   : > { %v1875_v44 = vadd.f32 %v1969_v42, %v1868_v43 }
 0xc0c   : > { %1876 = vst.msk [vmem:[%s489_s26] sm:$0xf] %vm1635_vm6, %v1875_v44 }
 0xc0d PF: > { %s25_s18 = sadd.s32 1, %s2208_s18  }
 0xc0e   : > { %p22_p4 = scmp.ge.s32.totalorder %s25_s18, 8  }
 0xc10   :  { %24 = sbr.rel (!%p22_p4) target bundleno = 1 (0x1), region = 110 }

// kernel: decoder_forward.7
= control target key start
LH: loop header
LB: loop body
LE: loop exit
PB: predicated region body
PF: predicated region fallthrough
CT: control target
= control target key end

     0   :  { %s4359_s0 = inlined_call_operand.vmem [shape: f32[8,3,32], index: 0, kind: input, shape index: {}]   ;;  %s4360_s1 = inlined_call_operand.vmem [shape: f32[4,2,32], index: 1, kind: input, shape index: {}]   ;;  %s4361_s2 = inlined_call_operand.vmem [shape: f32[32,32], index: 2, kind: input, shape index: {}]   ;;  %s4362_s3 = inlined_call_operand.vmem [shape: f32[1,32], index: 3, kind: input, shape index: {}]   ;;  %s4363_s4 = inlined_call_operand.vmem [shape: f32[32,64], index: 4, kind: input, shape index: {}]   ;;  %s4364_s5 = inlined_call_operand.vmem [shape: f32[1,64], index: 5, kind: input, shape index: {}]   ;;  %s4365_s6 = inlined_call_operand.vmem [shape: f32[32,32], index: 6, kind: input, shape index: {}]   ;;  %s4366_s7 = inlined_call_operand.vmem [shape: f32[1,32], index: 7, kind: input, shape index: {}]   ;;  %s4367_s8 = inlined_call_operand.vmem [shape: f32[32,32], index: 8, kind: input, shape index: {}]   ;;  %s4368_s9 = inlined_call_operand.vmem [shape: f32[1,32], index: 9, kind: input, shape index: {}]   ;;  %s4369_s10 = inlined_call_operand.vmem [shape: f32[32,64], index: 10, kind: input, shape index: {}]   ;;  %s4370_s11 = inlined_call_operand.vmem [shape: f32[1,64], index: 11, kind: input, shape index: {}]   ;;  %s4371_s12 = inlined_call_operand.vmem [shape: f32[32,32], index: 12, kind: input, shape index: {}]   ;;  %s4372_s13 = inlined_call_operand.vmem [shape: f32[1,32], index: 13, kind: input, shape index: {}]   ;;  %s4373_s14 = inlined_call_operand.vmem [shape: f32[1,32], index: 14, kind: input, shape index: {}]   ;;  %s4374_s15 = inlined_call_operand.vmem [shape: f32[1,32], index: 15, kind: input, shape index: {}]   ;;  %s4375_s16 = inlined_call_operand.vmem [shape: f32[32,64], index: 16, kind: input, shape index: {}]   ;;  %s4376_s17 = inlined_call_operand.vmem [shape: f32[1,64], index: 17, kind: input, shape index: {}]   ;;  %s4377_s18 = inlined_call_operand.vmem [shape: f32[64,32], index: 18, kind: input, shape index: {}]   ;;  %s4378_s19 = inlined_call_operand.vmem [shape: f32[1,32], index: 19, kind: input, shape index: {}]   ;;  %s4379_s20 = inlined_call_operand.vmem [shape: f32[1,32], index: 20, kind: input, shape index: {}]   ;;  %s4380_s21 = inlined_call_operand.vmem [shape: f32[1,32], index: 21, kind: input, shape index: {}]   ;;  %s4381_s22 = inlined_call_operand.vmem [shape: f32[8,3,32], index: 22, kind: output, shape index: {}]  }
   0x1   :  { %4393 = sst [smem:[#allocation2_spill]] %s4359_s0 }
   0x2   :  { %4394 = sst [smem:[#allocation3_spill]] %s4360_s1 }
   0x3   :  { %4395 = sst [smem:[#allocation4_spill]] %s4361_s2 }
   0x4   :  { %4396 = sst [smem:[#allocation5_spill]] %s4362_s3  ;;  %s3966_s3 = smov 0  }
   0x5   :  { %4397 = sst [smem:[#allocation6_spill]] %s4363_s4 }
   0x6   :  { %4398 = sst [smem:[#allocation7_spill]] %s4364_s5 }
   0x7   :  { %4399 = sst [smem:[#allocation8_spill]] %s4365_s6 }
   0x8 LB: > { %s3972_s28 = sadd.s32 4294967295, %s3839_s3   ;;  %p3385_p0 = scmp.ge.s32.totalorder %s3839_s3, 1  ;;  %s3839_s3 = sphi %s3966_s3, %s32_s3  }
   0x9   : > { %p668_p1 = scmp.lt.s32.totalorder %s3839_s3, 9 }
   0xb   : > { %p669_p2 = pnand %p3385_p0, %p668_p1 }
   0xc   : > { %s4400_s4 = sld [smem:[#allocation6_spill]] (!%p669_p2)  ;;  %s4401_s24 = sld [smem:[#allocation4_spill]] (!%p669_p2)  ;;  %v3841_v3 = vmov (!%p669_p2), 0.0|0.0   ;;  %vm3842_vm0 = vmmov (!%p669_p2), 0   ;;  %v3843_v9 = vmov (!%p669_p2), 0.0   ;;  %vm803_vm1 = vcmask (!%p669_p2), 261120  }
   0xd   : > { %672 = sbr.rel (%p669_p2) target bundleno = 4759 (0x1297), region = 108  ;;  %3734 = vmatprep.subr.bf16.mxu1 (!%p669_p2), %v3841_v3  ;;  %3728 = vmatprep.subr.bf16.mxu0 (!%p669_p2), %v3841_v3  ;;  %p744_p3 = scmp.lt.s32.totalorder (!%p669_p2), %s3972_s28, 7  ;;  %vm964_vm2 = vcmask (!%p669_p2), 64512   ;;  %vm1058_vm3 = vcmask (!%p669_p2), 1042432   ;;  %vm1041_vm4 = vcmask (!%p669_p2), 17408   ;;  %vm1054_vm5 = vcmask (!%p669_p2), 23552  }
   0xe   : > { %3553 = vmatprep.mubr.msk.f32.mxu1 (!%p669_p2), %vm3842_vm0, %v3843_v9  ;;  %3542 = vmatprep.mubr.msk.f32.mxu0 (!%p669_p2), %vm3842_vm0, %v3843_v9  ;;  %s749_s5 = ssub.s32 (!%p669_p2), 0, %s3972_s28  ;;  %p748_p4 = scmp.lt.s32.totalorder (!%p669_p2), %s3972_s28, 0  ;;  %vm2197_vm6 = vcmask (!%p669_p2), 1041408   ;;  %vm2180_vm7 = vcmask (!%p669_p2), 10240   ;;  %vm2193_vm8 = vcmask (!%p669_p2), 15360   ;;  %vm3068_vm9 = vcmask (!%p669_p2), 256000  }
   0xf   : > { %s3387_s25 = smin.u32 (!%p669_p2), %s3972_s28, %s749_s5  ;;  %s4402_s30 = sld [smem:[#allocation2_spill]] (!%p669_p2)  ;;  %vm3205_vm10 = vcmask (!%p669_p2), 523264  }
  0x10   : > { %s751_s2 = sand.u32 (!%p669_p2), 3, %s3387_s25   ;;  %s4403_s27 = sld [smem:[#allocation3_spill]] (!%p669_p2) }
  0x11   : > { %s752_s23 = ssub.s32 (!%p669_p2), 0, %s751_s2  ;;  %s4405_s25 = sld [smem:[#allocation5_spill]] (!%p669_p2) }
  0x12   : > { %v787_v0 = vld [vmem:[%s4400_s4] sm:$0xff] (!%p669_p2)  ;;  %v788_v1 = vld [vmem:[%s4400_s4 + $0x8] sm:$0xff] (!%p669_p2)  ;;  %v789_v6 = vld [vmem:[%s4400_s4 + $0x10] sm:$0xff] (!%p669_p2)  ;;  %s4387_s29 = smov (!%p669_p2), 104   ;;  %s4406_s5 = sld [smem:[#allocation8_spill]] (!%p669_p2) }
  0x13   : > { %v782_v2 = vld [vmem:[%s4401_s24] sm:$0xff] (!%p669_p2)  ;;  %v3735_v4 = vpack.c.bf16 (!%p669_p2), %v788_v1, %v787_v0  ;;  %v783_v5 = vld [vmem:[%s4401_s24 + $0x8] sm:$0xff] (!%p669_p2)  ;;  %v790_v7 = vld [vmem:[%s4400_s4 + $0x18] sm:$0xff] (!%p669_p2) }
  0x14   : > { %v3729_v8 = vpack.c.bf16 %v783_v5, %v782_v2  ;;  %v784_v10 = vld [vmem:[%s4401_s24 + $0x10] sm:$0xff]  ;;  %v785_v11 = vld [vmem:[%s4401_s24 + $0x18] sm:$0xff]  ;;  %v3738_v12 = vpack.c.bf16 %v790_v7, %v789_v6  ;;  %s4009_s6 = scalar_select %p744_p3, %s3972_s28, 7 }
  0x15   : > { %3736 = vmatpush3.bf16.msra.mxu1 %v3735_v4  ;;  %v3732_v13 = vpack.c.bf16 %v785_v11, %v784_v10  ;;  %s4414_s23 = smov (!%p748_p4, %s752_s23), %s751_s2 }
  0x16   : > { %3730 = vmatpush3.bf16.msra.mxu0 %v3729_v8  ;;  %3737 = vmatprep.subr.bf16.mxu1 %v3841_v3  ;;  %s4385_s26 = sshll.u32 %s4009_s6, 2  ;;  %p3389_p5 = scmp.lt.s32.totalorder %s4414_s23, 0 }
  0x17   : > { %3731 = vmatprep.subr.bf16.mxu0 %v3841_v3  ;;  %s747_s0 = scalar_lea.vmem %s4402_s30, %s4385_s26  ;;  %s758_s28 = sadd.s32 4, %s4414_s23  ;;  %v3392_v20 = vld [vmem:[%s4405_s25] ss:$0 sm:$0xff] }
  0x18   : > { %v4021_v14 = vld [vmem:[%s747_s0] sm:$0x7]  ;;  %s4416_s28 = smov (!%p3389_p5, %s758_s28), %s4414_s23  ;;  %s4404_s0 = sld [smem:[#allocation7_spill]]  ;;  %v793_v0 = vld [vmem:[%s4406_s5 + $0x8] sm:$0xff] }
  0x19   : > { %3739 = vmatpush3.bf16.msra.mxu1 %v3738_v12  ;;  %p760_p6 = scmp.lt.s32.totalorder %s4416_s28, 3  ;;  %s4390_s23 = smov 112   ;;  %v792_v45 = vld [vmem:[%s4406_s5] sm:$0xff] }
  0x1a   : > { %3733 = vmatpush3.bf16.msra.mxu0 %v3732_v13  ;;  %3571 = vmatprep.subr.mxu1 %v3843_v9  ;;  %s4392_s30 = smov 88   ;;  %s4409_s26 = smov 80  }
  0x1b   : > { %3556 = vmatprep.subr.mxu0 %v3843_v9  ;;  %s4418_s28 = smov (!%p760_p6, %s4416_s28), 3 }
  0x1c   : > { %3554 = vmatmul.mubr.msk.f32.vlgmr.msra.gmra.mrb[0].mxu1 %vm803_vm1, %v4021_v14  ;;  %s3390_s1 = sshll.u32 %s4418_s28, 1  ;;  %s3845_s28 = smov 120  }
  0x1d   : > { %3573 = vmatprep.mubr.msk.f32.mxu1 %vm3842_vm0, %v3843_v9  ;;  %s763_s2 = scalar_lea.vmem %s4403_s27, %s3390_s1  ;;  %s3846_s27 = smov 96  }
  0x1e   : > { %v781_v15 = vld [vmem:[%s763_s2] sm:$0x3]  ;;  %s4389_s2 = smov 80   ;;  %s4386_s1 = smov 72  }
  0x1f   : > { %3543 = vmatmul.mubr.msk.f32.vlgmr.msra.gmra.mrb[0].mxu0 %vm803_vm1, %v781_v15  ;;  %v3394_v16 = vld [vmem:[%s4404_s0] ss:$0 sm:$0xff]  ;;  %v794_v15 = vld [vmem:[%s4406_s5 + $0x10] sm:$0xff] }
  0x20   : > { %3558 = vmatprep.mubr.msk.f32.mxu0 %vm3842_vm0, %v3843_v9 }
  0xef   : > { %v953_v17 = vpop.f32.mrb[0].mxu1 }
  0xf0   : > { %v4038_v18 = vadd.f32 %v3394_v16, %v953_v17  ;;  %v3555_v19 = vpop.f32.mrb[1].mxu1 }
  0xf2   : > { %1448 = vrot.lane.b32.xlu1 %v4038_v18, %s4390_s23  ;;  %1208 = vrot.lane.b32.xlu0 %v4038_v18, %s3845_s28  ;;  %v873_v21 = vpop.f32.mrb[0].mxu0 }
  0xf3   : > { %3557 = vmatpush3.xpose.msk.msra.mxu0 %vm964_vm2, %v4038_v18  ;;  %v874_v22 = vadd.f32 %v3392_v20, %v873_v21  ;;  %v3544_v23 = vpop.f32.mrb[1].mxu0 }
  0xf4   : > { %3561 = vmatprep.subr.mxu0 %v3843_v9 }
  0xf5   : > { %v877_v24 = vmul.f32 0.35355338, %v874_v22 }
  0xf7   : > { %1446 = vrot.lane.b32.xlu1 %v877_v24, %s4390_s23  ;;  %1206 = vrot.lane.b32.xlu0 %v877_v24, %s3845_s28  ;;  %s4410_s23 = smov 104  }
  0xf8   : > { %3559 = vmatmul.mubr.msk.f32.vlgmr.msra.gmra.mrb[2].mxu0 %vm964_vm2, %v877_v24 }
  0xf9   : > { %3563 = vmatprep.mubr.msk.f32.mxu0 %vm3842_vm0, %v3843_v9 }
  0xfb   : > { %1052 = vrot.lane.b32.xlu1 %v4038_v18, %s3846_s27 }
 0x164   : > { %v1209_v25 = vpop.permute.xlu0 %1208  ;;  %v1449_v26 = vpop.permute.xlu1 %1448 }
 0x165   : > { %3572 = vmatpush3.xpose.msk.msra.mxu1 %vm964_vm2, %v1209_v25  ;;  %v1926_v25 = vld [vmem:[%s4367_s8] sm:$0xff] }
 0x166   : > { %3586 = vmatprep.subr.mxu1 %v3843_v9 }
 0x169   : > { %v1447_v27 = vpop.permute.xlu1 %1446  ;;  %v1207_v28 = vpop.permute.xlu0 %1206 }
 0x16a   : > { %3574 = vmatmul.mubr.msk.f32.vlgmr.msra.gmra.mrb[2].mxu1 %vm964_vm2, %v1207_v28 }
 0x16b   : > { %3587 = vmatpush3.xpose.msk.msra.mxu1 %vm964_vm2, %v1449_v26  ;;  %3588 = vmatprep.mubr.msk.f32.mxu1 %vm3842_vm0, %v3843_v9  ;;  %v1927_v26 = vld [vmem:[%s4367_s8 + $0x8] sm:$0xff] }
 0x16c   : > { %3591 = vmatprep.subr.mxu1 %v3843_v9 }
 0x16d   : > { %v1053_v29 = vpop.permute.xlu1 %1052 }
 0x16e   : > { %3562 = vmatpush3.msk.msra.mxu0 %vm1058_vm3, %v1053_v29  ;;  %3589 = vmatmul.mubr.msk.f32.vlgmr.msra.gmra.mrb[4].mxu1 %vm964_vm2, %v1447_v27  ;;  %v3741_v27 = vpack.c.bf16 %v1927_v26, %v1926_v25  ;;  %v1931_v29 = vld [vmem:[%s4369_s10] sm:$0xff] }
 0x16f   : > { %3593 = vmatprep.mubr.msk.f32.mxu1 %vm3842_vm0, %v3843_v9  ;;  %3566 = vmatprep.subr.mxu0 %v3843_v9 }
 0x1cb   : > { %v1037_v30 = vpop.f32.mrb[2].mxu0 }
 0x1cc   : > { %v3560_v31 = vpop.f32.mrb[3].mxu0  ;;  %v1042_v32 = vsel %vm1041_vm4, %v1037_v30, -inf }
 0x1cd   : > { %1043 = vmax.xlane.f32.xlu0 %v1042_v32 }
 0x1e3   : > { %1534 = vrot.lane.b32.xlu0 %v4038_v18, %s4389_s2 }
 0x1e7   : > { %1686 = vrot.lane.b32.xlu0 %v877_v24, %s4387_s29  ;;  %v795_v24 = vld [vmem:[%s4406_s5 + $0x18] sm:$0xff] }
 0x23d   : > { %v1280_v33 = vpop.f32.mrb[2].mxu1 }
 0x23e   : > { %v3575_v34 = vpop.f32.mrb[3].mxu1  ;;  %v1284_v44 = vsel %vm1041_vm4, %v1280_v33, -inf }
 0x241   : > { %v1520_v35 = vpop.f32.mrb[4].mxu1 }
 0x242   : > { %v3590_v36 = vpop.f32.mrb[5].mxu1  ;;  %v1524_v37 = vsel %vm1041_vm4, %v1520_v35, -inf }
 0x243   : > { %1525 = vmax.xlane.f32.xlu1 %v1524_v37  ;;  %v1933_v36 = vld [vmem:[%s4369_s10 + $0x10] sm:$0xff]  ;;  %v1934_v37 = vld [vmem:[%s4369_s10 + $0x18] sm:$0xff] }
 0x254   : > { %1688 = vrot.lane.b32.xlu1 %v4038_v18, %s4387_s29 }
 0x25a   : > { %v1044_v38 = vpop.xlane.xlu0 %1043 }
 0x25b   : > { %v1045_v39 = vsub.f32 %v1037_v30, %v1044_v38  ;;  %v1932_v30 = vld [vmem:[%s4369_s10 + $0x8] sm:$0xff]  ;;  %v1928_v38 = vld [vmem:[%s4367_s8 + $0x10] sm:$0xff] }
 0x25d   : > { %v1046_v40 = vmul.f32 1.442695, %v1045_v39  ;;  %v3750_v39 = vpack.c.bf16 %v1934_v37, %v1933_v36 }
 0x25e   : > { %v1535_v41 = vpop.permute.xlu0 %1534 }
 0x25f   : > { %3795 = vpow2.f32 %v1046_v40  ;;  %3592 = vmatpush3.msk.msra.mxu1 %vm1058_vm3, %v1535_v41  ;;  %v1929_v40 = vld [vmem:[%s4367_s8 + $0x18] sm:$0xff] }
 0x260   : > { %3601 = vmatprep.subr.mxu1 %v3843_v9  ;;  %v3744_v41 = vpack.c.bf16 %v1929_v40, %v1928_v38 }
 0x262   : > { %v1687_v51 = vpop.permute.xlu0 %1686 }
 0x269   : > { %v3796_v42 = vpop.eup %3795 }
 0x26a   : > { %3564 = vmatmul.mubr.msk.f32.vlgmr.msra.gmra.mrb[4].mxu0 %vm1054_vm5, %v3796_v42  ;;  %v1048_v43 = vsel %vm1041_vm4, %v3796_v42, 0.0  ;;  %v3396_v42 = vld [vmem:[%s4366_s7] ss:$0 sm:$0xff] }
 0x26b   : > { %1049 = vadd.xlane.f32.xlu0 %v1048_v43  ;;  %3568 = vmatprep.mubr.msk.f32.mxu0 %vm3842_vm0, %v3843_v9 }
 0x26c   : > { %3567 = vmatpush3.msra.mxu0 %v792_v45 }
 0x26d   : > { %3576 = vmatprep.subr.mxu0 %v3843_v9 }
 0x278   : > { %1285 = vmax.xlane.f32.xlu1 %v1284_v44 }
 0x281   : > { %1294 = vrot.lane.b32.xlu0 %v4038_v18, %s4392_s30  ;;  %s4411_s30 = smov 72  }
 0x2d0   : > { %v1526_v46 = vpop.xlane.xlu1 %1525 }
 0x2d1   : > { %v1527_v47 = vsub.f32 %v1520_v35, %v1526_v46 }
 0x2d3   : > { %v1528_v48 = vmul.f32 1.442695, %v1527_v47 }
 0x2d4   : > { %v1689_v50 = vpop.permute.xlu1 %1688 }
 0x2d5   : > { %3797 = vpow2.f32 %v1528_v48  ;;  %v3417_v48 = vld [vmem:[%s4368_s9] ss:$0 sm:$0xff] }
 0x2df   : > { %v3798_v49 = vpop.eup %3797 }
 0x2e0   : > { %3594 = vmatmul.mubr.msk.f32.vlgmr.msra.gmra.mrb[6].mxu1 %vm1054_vm5, %v3798_v49  ;;  %v1530_v57 = vsel %vm1041_vm4, %v3798_v49, 0.0  ;;  %v3419_v49 = vld [vmem:[%s4370_s11] ss:$0 sm:$0xff] }
 0x2e1   : > { %3602 = vmatpush3.xpose.msk.msra.mxu1 %vm964_vm2, %v1689_v50  ;;  %3603 = vmatprep.mubr.msk.f32.mxu1 %vm3842_vm0, %v3843_v9 }
 0x2e2   : > { %3740 = vmatprep.subr.bf16.mxu1 %v3841_v3 }
 0x2e4   : > { %3604 = vmatmul.mubr.msk.f32.vlgmr.msra.gmra.mrb[8].mxu1 %vm964_vm2, %v1687_v51 }
 0x2e5   : > { %3624 = vmatprep.mubr.msk.f32.mxu1 %vm3842_vm0, %v3843_v9  ;;  %3742 = vmatpush3.bf16.msra.mxu1 %v3741_v27 }
 0x2e6   : > { %3743 = vmatprep.subr.bf16.mxu1 %v3841_v3 }
 0x2e9   : > { %3745 = vmatpush3.bf16.msra.mxu1 %v3744_v41  ;;  %v3421_v41 = vld [vmem:[%s4372_s13] ss:$0 sm:$0xff] }
 0x2ea   : > { %3638 = vmatprep.subr.mxu1 %v3843_v9 }
 0x2ec   : > { %3625 = vmatmul.mubr.msk.f32.vlgmr.msra.gmra.mrb[10].mxu1 %vm803_vm1, %v4021_v14 }
 0x2ed   : > { %3640 = vmatprep.mubr.msk.f32.mxu1 %vm3842_vm0, %v3843_v9 }
 0x2f8   : > { %v1050_v58 = vpop.xlane.xlu0 %1049 }
 0x2fc   : > { %v1295_v63 = vpop.permute.xlu0 %1294 }
 0x305   : > { %v1286_v52 = vpop.xlane.xlu1 %1285 }
 0x306   : > { %v1287_v53 = vsub.f32 %v1280_v33, %v1286_v52  ;;  %v3747_v33 = vpack.c.bf16 %v1932_v30, %v1931_v29 }
 0x308   : > { %v1288_v54 = vmul.f32 1.442695, %v1287_v53 }
 0x30a   : > { %3799 = vpow2.f32 %v1288_v54 }
 0x30b   : > { %3801 = vrcp.f32 %v1050_v58 }
 0x314   : > { %v3800_v55 = vpop.eup %3799 }
 0x315   : > { %v1290_v56 = vsel %vm1041_vm4, %v3800_v55, 0.0  ;;  %v3802_v59 = vpop.eup %3801 }
 0x316   : > { %1291 = vadd.xlane.f32.xlu1 %v1290_v56 }
 0x31a   : > { %1531 = vadd.xlane.f32.xlu1 %v1530_v57 }
 0x33d   : > { %v1127_v60 = vpop.f32.mrb[4].mxu0 }
 0x33e   : > { %v1131_v61 = vmul.f32 %v3802_v59, %v1127_v60  ;;  %v3565_v62 = vpop.f32.mrb[5].mxu0 }
 0x340   : > { %3569 = vmatmul.mubr.msk.f32.vlgmr.msra.gmra.mrb[6].mxu0 %vm964_vm2, %v1131_v61 }
 0x341   : > { %3577 = vmatpush3.msk.msra.mxu0 %vm1058_vm3, %v1295_v63  ;;  %3578 = vmatprep.mubr.msk.f32.mxu0 %vm3842_vm0, %v3843_v9 }
 0x342   : > { %3581 = vmatprep.subr.mxu0 %v3843_v9 }
 0x344   : > { %3579 = vmatmul.mubr.msk.f32.vlgmr.msra.gmra.mrb[8].mxu0 %vm1054_vm5, %v3800_v55 }
 0x345   : > { %3583 = vmatprep.mubr.msk.f32.mxu0 %vm3842_vm0, %v3843_v9  ;;  %3582 = vmatpush3.msra.mxu0 %v793_v0 }
 0x346   : > { %3596 = vmatprep.subr.mxu0 %v3843_v9 }
 0x3a3   : > { %v1292_v7 = vpop.xlane.xlu1 %1291 }
 0x3a4   : > { %3803 = vrcp.f32 %v1292_v7 }
 0x3a7   : > { %v1532_v8 = vpop.xlane.xlu1 %1531 }
 0x3a8   : > { %3805 = vrcp.f32 %v1532_v8 }
 0x3ae   : > { %v3804_v10 = vpop.eup %3803 }
 0x3b2   : > { %v3806_v16 = vpop.eup %3805 }
 0x3b3   : > { %v1607_v1 = vpop.f32.mrb[6].mxu1 }
 0x3b4   : > { %v3595_v2 = vpop.f32.mrb[7].mxu1  ;;  %v1611_v17 = vmul.f32 %v3806_v16, %v1607_v1 }
 0x3b5   : > { %v1936_v2 = vld [vmem:[%s4371_s12] sm:$0xff] }
 0x3b7   : > { %v1760_v4 = vpop.f32.mrb[8].mxu1 }
 0x3b8   : > { %v3605_v5 = vpop.f32.mrb[9].mxu1  ;;  %v1764_v6 = vsel %vm1041_vm4, %v1760_v4, -inf }
 0x3b9   : > { %1765 = vmax.xlane.f32.xlu1 %v1764_v6 }
 0x3bf   : > { %v2013_v46 = vpop.f32.mrb[10].mxu1 }
 0x3c0   : > { %v3626_v47 = vpop.f32.mrb[11].mxu1  ;;  %v2014_v50 = vadd.f32 %v3417_v48, %v2013_v46  ;;  %v1938_v46 = vld [vmem:[%s4371_s12 + $0x10] sm:$0xff] }
 0x3c2   : > { %v4183_v54 = vmul.f32 0.35355338, %v2014_v50 }
 0x3ca   : > { %1774 = vrot.lane.b32.xlu1 %v4038_v18, %s4386_s1 }
 0x417   : > { %v1367_v11 = vpop.f32.mrb[8].mxu0 }
 0x418   : > { %v1371_v12 = vmul.f32 %v3804_v10, %v1367_v11  ;;  %v3580_v13 = vpop.f32.mrb[9].mxu0 }
 0x41a   : > { %3584 = vmatmul.mubr.msk.f32.vlgmr.msra.gmra.mrb[6].mxu0 %vm964_vm2, %v1371_v12 }
 0x41b   : > { %3597 = vmatpush3.msra.mxu0 %v794_v15  ;;  %3598 = vmatprep.mubr.msk.f32.mxu0 %vm3842_vm0, %v3843_v9 }
 0x41c   : > { %3606 = vmatprep.subr.mxu0 %v3843_v9 }
 0x422   : > { %3599 = vmatmul.mubr.msk.f32.vlgmr.msra.gmra.mrb[6].mxu0 %vm964_vm2, %v1611_v17 }
 0x423   : > { %3608 = vmatprep.mubr.msk.f32.mxu0 %vm3842_vm0, %v3843_v9 }
 0x446   : > { %v1766_v18 = vpop.xlane.xlu1 %1765 }
 0x447   : > { %v1767_v19 = vsub.f32 %v1760_v4, %v1766_v18 }
 0x449   : > { %v1768_v20 = vmul.f32 1.442695, %v1767_v19 }
 0x44a   : > { %v1775_v21 = vpop.permute.xlu1 %1774 }
 0x44b   : > { %3807 = vpow2.f32 %v1768_v20  ;;  %3607 = vmatpush3.msk.msra.mxu0 %vm1058_vm3, %v1775_v21 }
 0x44c   : > { %3611 = vmatprep.subr.mxu0 %v3843_v9 }
 0x455   : > { %v3808_v22 = vpop.eup %3807 }
 0x456   : > { %3609 = vmatmul.mubr.msk.f32.vlgmr.msra.gmra.mrb[10].mxu0 %vm1054_vm5, %v3808_v22  ;;  %v1770_v23 = vsel %vm1041_vm4, %v3808_v22, 0.0 }
 0x457   : > { %1771 = vadd.xlane.f32.xlu0 %v1770_v23  ;;  %3613 = vmatprep.mubr.msk.f32.mxu0 %vm3842_vm0, %v3843_v9 }
 0x458   : > { %3612 = vmatpush3.msra.mxu0 %v795_v24  ;;  %v1937_v24 = vld [vmem:[%s4371_s12 + $0x8] sm:$0xff] }
 0x459   : > { %3746 = vmatprep.subr.bf16.mxu0 %v3841_v3 }
 0x4e4   : > { %v1772_v28 = vpop.xlane.xlu0 %1771 }
 0x4e5   : > { %3809 = vrcp.f32 %v1772_v28 }
 0x4ef   : > { %v3810_v31 = vpop.eup %3809 }
 0x529   : > { %v1847_v32 = vpop.f32.mrb[10].mxu0 }
 0x52a   : > { %v1851_v34 = vmul.f32 %v3810_v31, %v1847_v32  ;;  %v3610_v35 = vpop.f32.mrb[11].mxu0 }
 0x52c   : > { %3614 = vmatmul.mubr.msk.f32.vlgmr.msra.gmra.mrb[6].mxu0 %vm964_vm2, %v1851_v34 }
 0x52d   : > { %3748 = vmatpush3.bf16.msra.mxu0 %v3747_v33  ;;  %3635 = vmatprep.mubr.msk.f32.mxu0 %vm3842_vm0, %v3843_v9 }
 0x52e   : > { %3749 = vmatprep.subr.bf16.mxu0 %v3841_v3 }
 0x531   : > { %3751 = vmatpush3.bf16.msra.mxu0 %v3750_v39 }
 0x532   : > { %3648 = vmatprep.subr.mxu0 %v3843_v9 }
 0x5ff   : > { %v1921_v43 = vpop.f32.mrb[6].mxu0 }
 0x600   : > { %v3770_v44 = vadd.f32 %v3396_v42, %v1921_v43  ;;  %v3615_v45 = vpop.f32.mrb[7].mxu0 }
 0x602   : > { %3636 = vmatmul.mubr.msk.f32.vlgmr.msra.gmra.mrb[12].mxu0 %vm803_vm1, %v3770_v44 }
 0x603   : > { %3650 = vmatprep.mubr.msk.f32.mxu0 %vm3842_vm0, %v3843_v9  ;;  %3649 = vmatpush3.msra.mxu0 %v1936_v2 }
 0x604   : > { %3658 = vmatprep.subr.mxu0 %v3843_v9 }
 0x6d5   : > { %v2093_v51 = vpop.f32.mrb[12].mxu0 }
 0x6d6   : > { %v4181_v52 = vadd.f32 %v3419_v49, %v2093_v51  ;;  %v3637_v53 = vpop.f32.mrb[13].mxu0 }
 0x6d8   : > { %2191 = vrot.lane.b32.xlu0 %v4181_v52, %s3846_s27  ;;  %3639 = vmatpush3.xpose.msk.msra.mxu1 %vm964_vm2, %v4181_v52  ;;  %s4408_s27 = smov 112  }
 0x6d9   : > { %3643 = vmatprep.subr.mxu1 %v3843_v9 }
 0x6db   : > { %3641 = vmatmul.mubr.msk.f32.vlgmr.msra.gmra.mrb[12].mxu1 %vm964_vm2, %v4183_v54 }
 0x6dc   : > { %2345 = vrot.lane.b32.xlu0 %v4183_v54, %s3845_s28  ;;  %3645 = vmatprep.mubr.msk.f32.mxu1 %vm3842_vm0, %v3843_v9 }
 0x74a   : > { %v2192_v55 = vpop.permute.xlu0 %2191 }
 0x74b   : > { %3644 = vmatpush3.msk.msra.mxu1 %vm2197_vm6, %v2192_v55 }
 0x74c   : > { %3653 = vmatprep.subr.mxu1 %v3843_v9 }
 0x74e   : > { %v2346_v1 = vpop.permute.xlu0 %2345 }
 0x7ae   : > { %v2176_v56 = vpop.f32.mrb[12].mxu1 }
 0x7af   : > { %v3642_v57 = vpop.f32.mrb[13].mxu1  ;;  %v2181_v58 = vsel %vm2180_vm7, %v2176_v56, -inf }
 0x7b0   : > { %2182 = vmax.xlane.f32.xlu1 %v2181_v58 }
 0x7c1   : > { %2347 = vrot.lane.b32.xlu1 %v4181_v52, %s3845_s28  ;;  %s4407_s28 = smov 88  }
 0x83d   : > { %v2183_v59 = vpop.xlane.xlu1 %2182 }
 0x83e   : > { %v2184_v60 = vsub.f32 %v2176_v56, %v2183_v59 }
 0x840   : > { %v2185_v61 = vmul.f32 1.442695, %v2184_v60 }
 0x841   : > { %v2348_v63 = vpop.permute.xlu1 %2347 }
 0x842   : > { %3811 = vpow2.f32 %v2185_v61 }
 0x84c   : > { %v3812_v62 = vpop.eup %3811 }
 0x84d   : > { %3646 = vmatmul.mubr.msk.f32.vlgmr.msra.gmra.mrb[14].mxu1 %vm2193_vm8, %v3812_v62  ;;  %v2187_v0 = vsel %vm2180_vm7, %v3812_v62, 0.0 }
 0x84e   : > { %3654 = vmatpush3.xpose.msk.msra.mxu1 %vm964_vm2, %v2348_v63  ;;  %2188 = vadd.xlane.f32.xlu0 %v2187_v0  ;;  %v1939_v0 = vld [vmem:[%s4371_s12 + $0x18] sm:$0xff] }
 0x84f   : > { %3655 = vmatprep.mubr.msk.f32.mxu1 %vm3842_vm0, %v3843_v9  ;;  %3663 = vmatprep.subr.mxu1 %v3843_v9 }
 0x851   : > { %3656 = vmatmul.mubr.msk.f32.vlgmr.msra.gmra.mrb[16].mxu1 %vm964_vm2, %v2346_v1 }
 0x852   : > { %3665 = vmatprep.mubr.msk.f32.mxu1 %vm3842_vm0, %v3843_v9  ;;  %3664 = vmatpush3.msra.mxu1 %v1937_v24 }
 0x853   : > { %3673 = vmatprep.subr.mxu1 %v3843_v9 }
 0x864   : > { %2433 = vrot.lane.b32.xlu0 %v4181_v52, %s4407_s28 }
 0x868   : > { %2585 = vrot.lane.b32.xlu0 %v4183_v54, %s4408_s27 }
 0x8db   : > { %v2189_v4 = vpop.xlane.xlu0 %2188 }
 0x8dc   : > { %3813 = vrcp.f32 %v2189_v4 }
 0x8df   : > { %v2434_v10 = vpop.permute.xlu0 %2433 }
 0x8e3   : > { %v2586_v21 = vpop.permute.xlu0 %2585 }
 0x8e6   : > { %v3814_v5 = vpop.eup %3813 }
 0x920   : > { %v2266_v6 = vpop.f32.mrb[14].mxu1 }
 0x921   : > { %v2270_v7 = vmul.f32 %v3814_v5, %v2266_v6  ;;  %v3647_v8 = vpop.f32.mrb[15].mxu1 }
 0x923   : > { %3651 = vmatmul.mubr.msk.f32.vlgmr.msra.gmra.mrb[14].mxu0 %vm964_vm2, %v2270_v7 }
 0x924   : > { %3659 = vmatpush3.msk.msra.mxu0 %vm2197_vm6, %v2434_v10  ;;  %v2419_v11 = vpop.f32.mrb[16].mxu1  ;;  %3660 = vmatprep.mubr.msk.f32.mxu0 %vm3842_vm0, %v3843_v9 }
 0x925   : > { %v3657_v12 = vpop.f32.mrb[17].mxu1  ;;  %v2423_v13 = vsel %vm2180_vm7, %v2419_v11, -inf  ;;  %3668 = vmatprep.subr.mxu0 %v3843_v9 }
 0x926   : > { %2424 = vmax.xlane.f32.xlu1 %v2423_v13 }
 0x937   : > { %2587 = vrot.lane.b32.xlu1 %v4181_v52, %s4408_s27  ;;  %s4412_s27 = sshll.u32 %s4009_s6, 2 }
 0x9b3   : > { %v2425_v15 = vpop.xlane.xlu1 %2424 }
 0x9b4   : > { %v2426_v16 = vsub.f32 %v2419_v11, %v2425_v15 }
 0x9b6   : > { %v2427_v17 = vmul.f32 1.442695, %v2426_v16 }
 0x9b7   : > { %v2588_v19 = vpop.permute.xlu1 %2587 }
 0x9b8   : > { %3815 = vpow2.f32 %v2427_v17 }
 0x9c2   : > { %v3816_v18 = vpop.eup %3815 }
 0x9c3   : > { %3661 = vmatmul.mubr.msk.f32.vlgmr.msra.gmra.mrb[16].mxu0 %vm2193_vm8, %v3816_v18  ;;  %v2429_v20 = vsel %vm2180_vm7, %v3816_v18, 0.0 }
 0x9c4   : > { %3669 = vmatpush3.xpose.msk.msra.mxu0 %vm964_vm2, %v2588_v19  ;;  %2430 = vadd.xlane.f32.xlu0 %v2429_v20  ;;  %v3098_v19 = vld [vmem:[%s4375_s16 + $0x8] sm:$0xff] }
 0x9c5   : > { %3670 = vmatprep.mubr.msk.f32.mxu0 %vm3842_vm0, %v3843_v9  ;;  %3678 = vmatprep.subr.mxu0 %v3843_v9 }
 0x9c7   : > { %3671 = vmatmul.mubr.msk.f32.vlgmr.msra.gmra.mrb[18].mxu0 %vm964_vm2, %v2586_v21  ;;  %v3100_v21 = vld [vmem:[%s4375_s16 + $0x18] sm:$0xff] }
 0x9c8   : > { %3680 = vmatprep.mubr.msk.f32.mxu0 %vm3842_vm0, %v3843_v9  ;;  %3679 = vmatpush3.msra.mxu0 %v1938_v46 }
 0x9c9   : > { %3688 = vmatprep.subr.mxu0 %v3843_v9 }
 0x9da   : > { %2673 = vrot.lane.b32.xlu0 %v4181_v52, %s4409_s26  ;;  %s779_s26 = scalar_lea.vmem %s4381_s22, %s4412_s27 }
 0x9de   : > { %2825 = vrot.lane.b32.xlu0 %v4183_v54, %s4410_s23 }
 0x9f6   : > { %v2340_v22 = vpop.f32.mrb[14].mxu0 }
 0x9f7   : > { %v3652_v23 = vpop.f32.mrb[15].mxu0  ;;  %v2344_v42 = vadd.f32 %v3421_v41, %v2340_v22  ;;  %v3108_v41 = vld [vmem:[%s4377_s18 + $0x30] sm:$0xff] }
 0xa51   : > { %v2431_v25 = vpop.xlane.xlu0 %2430 }
 0xa52   : > { %3817 = vrcp.f32 %v2431_v25 }
 0xa55   : > { %v2674_v30 = vpop.permute.xlu0 %2673 }
 0xa59   : > { %v2826_v40 = vpop.permute.xlu0 %2825 }
 0xa5c   : > { %v3818_v26 = vpop.eup %3817 }
 0xa96   : > { %v2506_v27 = vpop.f32.mrb[16].mxu0 }
 0xa97   : > { %v2510_v28 = vmul.f32 %v3818_v26, %v2506_v27  ;;  %v3662_v29 = vpop.f32.mrb[17].mxu0  ;;  %v3442_v27 = vld [vmem:[%s4373_s14] ss:$0 sm:$0xff] }
 0xa98   : > { %v3443_v29 = vld [vmem:[%s4374_s15] ss:$0 sm:$0xff] }
 0xa99   : > { %3666 = vmatmul.mubr.msk.f32.vlgmr.msra.gmra.mrb[18].mxu1 %vm964_vm2, %v2510_v28 }
 0xa9a   : > { %3674 = vmatpush3.msk.msra.mxu1 %vm2197_vm6, %v2674_v30  ;;  %v2659_v31 = vpop.f32.mrb[18].mxu0  ;;  %3675 = vmatprep.mubr.msk.f32.mxu1 %vm3842_vm0, %v3843_v9 }
 0xa9b   : > { %v3672_v32 = vpop.f32.mrb[19].mxu0  ;;  %v2663_v33 = vsel %vm2180_vm7, %v2659_v31, -inf  ;;  %3683 = vmatprep.subr.mxu1 %v3843_v9 }
 0xa9c   : > { %2664 = vmax.xlane.f32.xlu1 %v2663_v33  ;;  %v3102_v32 = vld [vmem:[%s4377_s18] sm:$0xff]  ;;  %v3103_v33 = vld [vmem:[%s4377_s18 + $0x8] sm:$0xff] }
 0xaad   : > { %2827 = vrot.lane.b32.xlu1 %v4181_v52, %s4410_s23 }
 0xb29   : > { %v2665_v34 = vpop.xlane.xlu1 %2664 }
 0xb2a   : > { %v2666_v35 = vsub.f32 %v2659_v31, %v2665_v34  ;;  %v3759_v34 = vpack.c.bf16 %v3103_v33, %v3102_v32 }
 0xb2c   : > { %v2667_v36 = vmul.f32 1.442695, %v2666_v35  ;;  %v3104_v35 = vld [vmem:[%s4377_s18 + $0x10] sm:$0xff] }
 0xb2d   : > { %v2828_v38 = vpop.permute.xlu1 %2827 }
 0xb2e   : > { %3819 = vpow2.f32 %v2667_v36  ;;  %v3105_v36 = vld [vmem:[%s4377_s18 + $0x18] sm:$0xff] }
 0xb38   : > { %v3820_v37 = vpop.eup %3819 }
 0xb39   : > { %3676 = vmatmul.mubr.msk.f32.vlgmr.msra.gmra.mrb[20].mxu1 %vm2193_vm8, %v3820_v37  ;;  %v2669_v39 = vsel %vm2180_vm7, %v3820_v37, 0.0  ;;  %v3762_v37 = vpack.c.bf16 %v3105_v36, %v3104_v35 }
 0xb3a   : > { %3684 = vmatpush3.xpose.msk.msra.mxu1 %vm964_vm2, %v2828_v38  ;;  %2670 = vadd.xlane.f32.xlu0 %v2669_v39  ;;  %v3106_v38 = vld [vmem:[%s4377_s18 + $0x20] sm:$0xff]  ;;  %v3107_v39 = vld [vmem:[%s4377_s18 + $0x28] sm:$0xff] }
 0xb3b   : > { %3685 = vmatprep.mubr.msk.f32.mxu1 %vm3842_vm0, %v3843_v9  ;;  %3693 = vmatprep.subr.mxu1 %v3843_v9 }
 0xb3d   : > { %3686 = vmatmul.mubr.msk.f32.vlgmr.msra.gmra.mrb[22].mxu1 %vm964_vm2, %v2826_v40  ;;  %v3765_v40 = vpack.c.bf16 %v3107_v39, %v3106_v38 }
 0xb3e   : > { %3695 = vmatprep.mubr.msk.f32.mxu1 %vm3842_vm0, %v3843_v9  ;;  %3694 = vmatpush3.msra.mxu1 %v1939_v0 }
 0xb3f   : > { %3758 = vmatprep.subr.bf16.mxu1 %v3841_v3 }
 0xb50   : > { %2913 = vrot.lane.b32.xlu0 %v4181_v52, %s4411_s30 }
 0xb6c   : > { %v2580_v43 = vpop.f32.mrb[18].mxu1 }
 0xb6d   : > { %v2584_v44 = vadd.f32 %v2580_v43, %v2344_v42  ;;  %v3667_v45 = vpop.f32.mrb[19].mxu1  ;;  %v3109_v42 = vld [vmem:[%s4377_s18 + $0x38] sm:$0xff] }
 0xb6e   : > { %v3768_v43 = vpack.c.bf16 %v3109_v42, %v3108_v41 }
 0xbc7   : > { %v2671_v47 = vpop.xlane.xlu0 %2670 }
 0xbc8   : > { %3821 = vrcp.f32 %v2671_v47 }
 0xbcb   : > { %v2914_v52 = vpop.permute.xlu0 %2913 }
 0xbd2   : > { %v3822_v48 = vpop.eup %3821 }
 0xc0c   : > { %v2746_v49 = vpop.f32.mrb[20].mxu1 }
 0xc0d   : > { %v2750_v50 = vmul.f32 %v3822_v48, %v2746_v49  ;;  %v3677_v51 = vpop.f32.mrb[21].mxu1 }
 0xc0f   : > { %3681 = vmatmul.mubr.msk.f32.vlgmr.msra.gmra.mrb[20].mxu0 %vm964_vm2, %v2750_v50 }
 0xc10   : > { %3689 = vmatpush3.msk.msra.mxu0 %vm2197_vm6, %v2914_v52  ;;  %v2899_v53 = vpop.f32.mrb[22].mxu1  ;;  %3690 = vmatprep.mubr.msk.f32.mxu0 %vm3842_vm0, %v3843_v9 }
 0xc11   : > { %v3687_v54 = vpop.f32.mrb[23].mxu1  ;;  %v2903_v55 = vsel %vm2180_vm7, %v2899_v53, -inf  ;;  %3752 = vmatprep.subr.bf16.mxu0 %v3841_v3 }
 0xc12   : > { %2904 = vmax.xlane.f32.xlu1 %v2903_v55 }
 0xc9f   : > { %v2905_v56 = vpop.xlane.xlu1 %2904 }
 0xca0   : > { %v2906_v57 = vsub.f32 %v2899_v53, %v2905_v56 }
 0xca2   : > { %v2907_v58 = vmul.f32 1.442695, %v2906_v57 }
 0xca4   : > { %3823 = vpow2.f32 %v2907_v58 }
 0xcae   : > { %v3824_v59 = vpop.eup %3823 }
 0xcaf   : > { %3691 = vmatmul.mubr.msk.f32.vlgmr.msra.gmra.mrb[22].mxu0 %vm2193_vm8, %v3824_v59  ;;  %v2909_v60 = vsel %vm2180_vm7, %v3824_v59, 0.0 }
 0xcb0   : > { %2910 = vadd.xlane.f32.xlu1 %v2909_v60  ;;  %3706 = vmatprep.mubr.msk.f32.mxu0 %vm3842_vm0, %v3843_v9 }
 0xce2   : > { %v2820_v61 = vpop.f32.mrb[20].mxu0 }
 0xce3   : > { %v2824_v62 = vadd.f32 %v2820_v61, %v2584_v44  ;;  %v3682_v63 = vpop.f32.mrb[21].mxu0  ;;  %v3444_v44 = vld [vmem:[%s4376_s17] ss:$0 sm:$0xff] }
 0xd3d   : > { %v2911_v1 = vpop.xlane.xlu1 %2910 }
 0xd3e   : > { %3825 = vrcp.f32 %v2911_v1 }
 0xd48   : > { %v3826_v2 = vpop.eup %3825 }
 0xd82   : > { %v2986_v4 = vpop.f32.mrb[22].mxu0 }
 0xd83   : > { %v2990_v5 = vmul.f32 %v3826_v2, %v2986_v4  ;;  %v3692_v6 = vpop.f32.mrb[23].mxu0 }
 0xd85   : > { %3696 = vmatmul.mubr.msk.f32.vlgmr.msra.gmra.mrb[24].mxu1 %vm964_vm2, %v2990_v5 }
 0xd86   : > { %3725 = vmatprep.mubr.msk.f32.mxu1 %vm3842_vm0, %v3843_v9  ;;  %v3097_v9 = vld [vmem:[%s4375_s16] sm:$0xff]  ;;  %3760 = vmatpush3.bf16.msra.mxu1 %v3759_v34 }
 0xd87   : > { %v3753_v20 = vpack.c.bf16 %v3098_v19, %v3097_v9  ;;  %3761 = vmatprep.subr.bf16.mxu1 %v3841_v3 }
 0xd89   : > { %3754 = vmatpush3.bf16.msra.mxu0 %v3753_v20 }
 0xd8a   : > { %3755 = vmatprep.subr.bf16.mxu0 %v3841_v3  ;;  %3763 = vmatpush3.bf16.msra.mxu1 %v3762_v37 }
 0xd8b   : > { %3764 = vmatprep.subr.bf16.mxu1 %v3841_v3 }
 0xd8e   : > { %3766 = vmatpush3.bf16.msra.mxu1 %v3765_v40 }
 0xd8f   : > { %3767 = vmatprep.subr.bf16.mxu1 %v3841_v3  ;;  %v3446_v3 = vld [vmem:[%s4378_s19] ss:$0 sm:$0xff] }
 0xd92   : > { %3769 = vmatpush3.bf16.msra.mxu1 %v3768_v43 }
 0xe58   : > { %v3060_v7 = vpop.f32.mrb[24].mxu1 }
 0xe59   : > { %v3064_v8 = vadd.f32 %v3060_v7, %v2824_v62  ;;  %v3697_v10 = vpop.f32.mrb[25].mxu1 }
 0xe5b   : > { %v3065_v11 = vadd.f32 %v3064_v8, %v4021_v14  ;;  %v3099_v14 = vld [vmem:[%s4375_s16 + $0x10] sm:$0xff]  ;;  %v3448_v8 = vld [vmem:[%s4379_s20] ss:$0 sm:$0xff] }
 0xe5c   : > { %v3756_v22 = vpack.c.bf16 %v3100_v21, %v3099_v14 }
 0xe5d   : > { %v3069_v12 = vsel %vm3068_vm9, %v3065_v11, 0.0 }
 0xe5e   : > { %3070 = vadd.xlane.f32.xlu1 %v3069_v12  ;;  %3757 = vmatpush3.bf16.msra.mxu0 %v3756_v22 }
 0xeeb   : > { %v3071_v13 = vpop.xlane.xlu1 %3070 }
 0xeec   : > { %v3073_v15 = vmul.f32 0.03125, %v3071_v13 }
 0xeee   : > { %v3074_v16 = vsub.f32 %v3065_v11, %v3073_v15  ;;  %v3449_v11 = vld [vmem:[%s4380_s21] ss:$0 sm:$0xff] }
 0xef0   : > { %v3075_v17 = vmul.f32 %v3074_v16, %v3074_v16 }
 0xef2   : > { %v3076_v18 = vsel %vm3068_vm9, %v3075_v17, 0.0 }
 0xef3   : > { %3077 = vadd.xlane.f32.xlu1 %v3076_v18 }
 0xf80   : > { %v3078_v23 = vpop.xlane.xlu1 %3077 }
 0xf81   : > { %v3079_v24 = vmul.f32 0.03125, %v3078_v23 }
 0xf83   : > { %v3080_v25 = vadd.f32 1e-05, %v3079_v24 }
 0xf85   : > { %3827 = vrsqrt.f32 %v3080_v25 }
 0xf8f   : > { %v3828_v26 = vpop.eup %3827 }
 0xf90   : > { %v3082_v28 = vmul.f32 %v3828_v26, %v3074_v16 }
 0xf92   : > { %v3089_v30 = vmul.f32 %v3442_v27, %v3082_v28 }
 0xf94   : > { %v3096_v31 = vadd.f32 %v3443_v29, %v3089_v30 }
 0xf96   : > { %3707 = vmatmul.mubr.msk.f32.vlgmr.msra.gmra.mrb[24].mxu0 %vm803_vm1, %v3096_v31 }
0x1069   : > { %v3186_v45 = vpop.f32.mrb[24].mxu0 }
0x106a   : > { %v3187_v46 = vadd.f32 %v3444_v44, %v3186_v45  ;;  %v3708_v47 = vpop.f32.mrb[25].mxu0 }
0x106c   : > { %v3191_v48 = vmul.f32 0.044715, %v3187_v46  ;;  %v3190_v54 = vmul.f32 0.5, %v3187_v46 }
0x106e   : > { %v3192_v49 = vmul.f32 %v3191_v48, %v3187_v46 }
0x1070   : > { %v3193_v50 = vmul.f32 %v3192_v49, %v3187_v46 }
0x1072   : > { %v3194_v51 = vadd.f32 %v3193_v50, %v3187_v46 }
0x1074   : > { %v3195_v52 = vmul.f32 0.7978846, %v3194_v51 }
0x1076   : > { %3829 = vtanh.f32 %v3195_v52 }
0x1080   : > { %v3830_v53 = vpop.eup %3829 }
0x1081   : > { %v3197_v55 = vadd.f32 1.0, %v3830_v53 }
0x1083   : > { %v3198_v56 = vmul.f32 %v3197_v55, %v3190_v54 }
0x1085   : > { %3726 = vmatmul.mubr.msk.f32.vlgmr.msra.gmra.mrb[26].mxu1 %vm3205_vm10, %v3198_v56 }
0x1158   : > { %v3275_v57 = vpop.f32.mrb[26].mxu1 }
0x1159   : > { %v3276_v58 = vadd.f32 %v3446_v3, %v3275_v57  ;;  %v3727_v59 = vpop.f32.mrb[27].mxu1 }
0x115b   : > { %v3279_v60 = vadd.f32 %v3276_v58, %v3096_v31 }
0x115d   : > { %v3282_v61 = vsel %vm3068_vm9, %v3279_v60, 0.0 }
0x115e   : > { %3283 = vadd.xlane.f32.xlu1 %v3282_v61 }
0x11eb   : > { %v3284_v62 = vpop.xlane.xlu1 %3283 }
0x11ec   : > { %v3285_v63 = vmul.f32 0.03125, %v3284_v62 }
0x11ee   : > { %v3286_v0 = vsub.f32 %v3279_v60, %v3285_v63 }
0x11f0   : > { %v3287_v1 = vmul.f32 %v3286_v0, %v3286_v0 }
0x11f2   : > { %v3288_v2 = vsel %vm3068_vm9, %v3287_v1, 0.0 }
0x11f3   : > { %3289 = vadd.xlane.f32.xlu1 %v3288_v2 }
0x1280   : > { %v3290_v4 = vpop.xlane.xlu1 %3289 }
0x1281   : > { %v3291_v5 = vmul.f32 0.03125, %v3290_v4 }
0x1283   : > { %v3292_v6 = vadd.f32 1e-05, %v3291_v5 }
0x1285   : > { %3831 = vrsqrt.f32 %v3292_v6 }
0x128f   : > { %v3832_v7 = vpop.eup %3831 }
0x1290   : > { %v3294_v10 = vmul.f32 %v3832_v7, %v3286_v0 }
0x1292   : > { %v3301_v12 = vmul.f32 %v3448_v8, %v3294_v10 }
0x1294   : > { %v3308_v13 = vadd.f32 %v3449_v11, %v3301_v12 }
0x1296   : > { %3309 = vst.msk [vmem:[%s779_s26] sm:$0x7] %vm3068_vm9, %v3308_v13 }
0x1297 PF: > { %s32_s3 = sadd.s32 1, %s3839_s3  }
0x1298   : > { %p29_p7 = scmp.ge.s32.totalorder %s32_s3, 10  }
0x129a   :  { %31 = sbr.rel (!%p29_p7) target bundleno = 8 (0x8), region = 141 }

// kernel: decoder_forward.8
= control target key start
LH: loop header
LB: loop body
LE: loop exit
PB: predicated region body
PF: predicated region fallthrough
CT: control target
= control target key end

     0   :  { %s2837_s0 = inlined_call_operand.vmem [shape: f32[6,4,32], index: 0, kind: input, shape index: {}]   ;;  %s2838_s1 = inlined_call_operand.vmem [shape: f32[6,4,32], index: 1, kind: input, shape index: {}]   ;;  %s2839_s2 = inlined_call_operand.vmem [shape: f32[32,32], index: 2, kind: input, shape index: {}]   ;;  %s2840_s3 = inlined_call_operand.vmem [shape: f32[1,32], index: 3, kind: input, shape index: {}]   ;;  %s2841_s4 = inlined_call_operand.vmem [shape: f32[32,64], index: 4, kind: input, shape index: {}]   ;;  %s2842_s5 = inlined_call_operand.vmem [shape: f32[1,64], index: 5, kind: input, shape index: {}]   ;;  %s2843_s6 = inlined_call_operand.vmem [shape: f32[32,32], index: 6, kind: input, shape index: {}]   ;;  %s2844_s7 = inlined_call_operand.vmem [shape: f32[1,32], index: 7, kind: input, shape index: {}]   ;;  %s2845_s8 = inlined_call_operand.vmem [shape: f32[1,32], index: 8, kind: input, shape index: {}]   ;;  %s2846_s9 = inlined_call_operand.vmem [shape: f32[1,32], index: 9, kind: input, shape index: {}]   ;;  %s2847_s10 = inlined_call_operand.vmem [shape: f32[32,32], index: 10, kind: input, shape index: {}]   ;;  %s2848_s11 = inlined_call_operand.vmem [shape: f32[1,32], index: 11, kind: input, shape index: {}]   ;;  %s2849_s12 = inlined_call_operand.vmem [shape: f32[32,32], index: 12, kind: input, shape index: {}]   ;;  %s2850_s13 = inlined_call_operand.vmem [shape: f32[1,32], index: 13, kind: input, shape index: {}]   ;;  %s2851_s14 = inlined_call_operand.vmem [shape: f32[1,32], index: 14, kind: input, shape index: {}]   ;;  %s2852_s15 = inlined_call_operand.vmem [shape: f32[1,32], index: 15, kind: input, shape index: {}]   ;;  %s2853_s16 = inlined_call_operand.vmem [shape: f32[32,8], index: 16, kind: input, shape index: {}]   ;;  %s2854_s17 = inlined_call_operand.vmem [shape: f32[1,8], index: 17, kind: input, shape index: {}]   ;;  %s2855_s18 = inlined_call_operand.vmem [shape: f32[6,4,32], index: 18, kind: output, shape index: {0}]   ;;  %s2856_s19 = inlined_call_operand.vmem [shape: f32[6,4,8], index: 19, kind: output, shape index: {1}]  }
   0x1   :  { %2858 = sst [smem:[#allocation2_spill]] %s2837_s0  ;;  %s2592_s0 = smov 0  }
   0x2   :  { %2859 = sst [smem:[#allocation3_spill]] %s2838_s1 }
   0x3   :  { %2860 = sst [smem:[#allocation4_spill]] %s2839_s2 }
   0x4   :  { %2861 = sst [smem:[#allocation5_spill]] %s2840_s3 }
   0x5 LB: > { %s2194_s30 = sadd.s32 4294967295, %s2480_s0   ;;  %p2198_p0 = scmp.ge.s32.totalorder %s2480_s0, 1  ;;  %s2480_s0 = sphi %s2592_s0, %s30_s0  }
   0x6   : > { %p548_p1 = scmp.lt.s32.totalorder %s2480_s0, 7 }
   0x8   : > { %p549_p2 = pnand %p2198_p0, %p548_p1 }
   0x9   : > { %v633_v0 = vld [vmem:[%s2841_s4] sm:$0xff] (!%p549_p2)  ;;  %v634_v1 = vld [vmem:[%s2841_s4 + $0x8] sm:$0xff] (!%p549_p2)  ;;  %s2862_s24 = sld [smem:[#allocation4_spill]] (!%p549_p2)  ;;  %v2482_v3 = vmov (!%p549_p2), 0.0|0.0   ;;  %v635_v6 = vld [vmem:[%s2841_s4 + $0x10] sm:$0xff] (!%p549_p2)  ;;  %p610_p3 = scmp.lt.s32.totalorder (!%p549_p2), %s2194_s30, 5 }
   0xa   : > { %552 = sbr.rel (%p549_p2) target bundleno = 3459 (0xd83), region = 92  ;;  %2410 = vmatprep.subr.bf16.mxu1 (!%p549_p2), %v2482_v3  ;;  %2404 = vmatprep.subr.bf16.mxu0 (!%p549_p2), %v2482_v3  ;;  %v2411_v4 = vpack.c.bf16 (!%p549_p2), %v634_v1, %v633_v0  ;;  %v636_v7 = vld [vmem:[%s2841_s4 + $0x18] sm:$0xff] (!%p549_p2)  ;;  %vm2483_vm0 = vmmov (!%p549_p2), 0   ;;  %v2484_v11 = vmov (!%p549_p2), 0.0   ;;  %s2863_s3 = sld [smem:[#allocation3_spill]] (!%p549_p2)  ;;  %vm649_vm1 = vcmask (!%p549_p2), 261120  }
   0xb   : > { %2308 = vmatprep.mubr.msk.f32.mxu1 (!%p549_p2), %vm2483_vm0, %v2484_v11  ;;  %2297 = vmatprep.mubr.msk.f32.mxu0 (!%p549_p2), %vm2483_vm0, %v2484_v11  ;;  %v2414_v12 = vpack.c.bf16 (!%p549_p2), %v636_v7, %v635_v6  ;;  %s2864_s29 = sld [smem:[#allocation2_spill]] (!%p549_p2)  ;;  %v2205_v16 = vld [vmem:[%s2842_s5] ss:$0 sm:$0xff] (!%p549_p2)  ;;  %s2865_s23 = sld [smem:[#allocation5_spill]] (!%p549_p2)  ;;  %vm810_vm2 = vcmask (!%p549_p2), 64512   ;;  %vm887_vm3 = vcmask (!%p549_p2), 27648  }
   0xc   : > { %2412 = vmatpush3.bf16.msra.mxu1 (!%p549_p2), %v2411_v4  ;;  %s2485_s25 = smov (!%p549_p2), 120   ;;  %vm904_vm4 = vcmask (!%p549_p2), 1043456   ;;  %vm900_vm5 = vcmask (!%p549_p2), 31744   ;;  %s2488_s27 = smov (!%p549_p2), 112   ;;  %v638_v36 = vld [vmem:[%s2843_s6] sm:$0xff] (!%p549_p2)  ;;  %v639_v55 = vld [vmem:[%s2843_s6 + $0x8] sm:$0xff] (!%p549_p2) }
   0xd   : > { %2413 = vmatprep.subr.bf16.mxu1 (!%p549_p2), %v2482_v3  ;;  %s2491_s22 = smov (!%p549_p2), 72   ;;  %vm1775_vm6 = vcmask (!%p549_p2), 257024   ;;  %vm2096_vm7 = vcmask (!%p549_p2), 60416  }
   0xf   : > { %v628_v2 = vld [vmem:[%s2862_s24] sm:$0xff] (!%p549_p2)  ;;  %v629_v5 = vld [vmem:[%s2862_s24 + $0x8] sm:$0xff] (!%p549_p2)  ;;  %v630_v9 = vld [vmem:[%s2862_s24 + $0x10] sm:$0xff] (!%p549_p2) }
  0x10   : > { %v2405_v8 = vpack.c.bf16 (!%p549_p2), %v629_v5, %v628_v2  ;;  %v631_v10 = vld [vmem:[%s2862_s24 + $0x18] sm:$0xff] (!%p549_p2)  ;;  %2415 = vmatpush3.bf16.msra.mxu1 (!%p549_p2), %v2414_v12 }
  0x11   : > { %s2867_s30 = smov (!%p610_p3, %s2194_s30), 5  ;;  %v2408_v13 = vpack.c.bf16 %v631_v10, %v630_v9  ;;  %2311 = vmatprep.subr.mxu1 %v2484_v11  ;;  %v2203_v17 = vld [vmem:[%s2865_s23] ss:$0 sm:$0xff] }
  0x12   : > { %2406 = vmatpush3.bf16.msra.mxu0 %v2405_v8  ;;  %s2632_s2 = sshll.u32 %s2867_s30, 2  ;;  %s2490_s30 = smov 104   ;;  %v2207_v9 = vld [vmem:[%s2844_s7] ss:$0 sm:$0xff] }
  0x13   : > { %2407 = vmatprep.subr.bf16.mxu0 %v2482_v3  ;;  %s617_s26 = scalar_lea.vmem %s2863_s3, %s2632_s2  ;;  %s613_s20 = scalar_lea.vmem %s2864_s29, %s2632_s2 }
  0x14   : > { %v627_v14 = vld [vmem:[%s617_s26] sm:$0xf]  ;;  %s2486_s3 = smov 96   ;;  %s2487_s26 = smov 88  }
  0x15   : > { %v2642_v15 = vld [vmem:[%s613_s20] sm:$0xf]  ;;  %2309 = vmatmul.mubr.msk.f32.vlgmr.msra.gmra.mrb[0].mxu1 %vm649_vm1, %v627_v14  ;;  %s2489_s20 = smov 80  }
  0x16   : > { %2409 = vmatpush3.bf16.msra.mxu0 %v2408_v13  ;;  %2313 = vmatprep.mubr.msk.f32.mxu1 %vm2483_vm0, %v2484_v11 }
  0x17   : > { %2321 = vmatprep.subr.mxu0 %v2484_v11 }
  0x19   : > { %2298 = vmatmul.mubr.msk.f32.vlgmr.msra.gmra.mrb[0].mxu0 %vm649_vm1, %v2642_v15 }
  0x1a   : > { %2323 = vmatprep.mubr.msk.f32.mxu0 %vm2483_vm0, %v2484_v11  ;;  %2322 = vmatpush3.msra.mxu0 %v638_v36 }
  0x1b   : > { %2331 = vmatprep.subr.mxu0 %v2484_v11 }
  0xe8   : > { %v799_v18 = vpop.f32.mrb[0].mxu1 }
  0xe9   : > { %v2659_v19 = vadd.f32 %v2205_v16, %v799_v18  ;;  %v2310_v21 = vpop.f32.mrb[1].mxu1  ;;  %v640_v16 = vld [vmem:[%s2843_s6 + $0x10] sm:$0xff] }
  0xeb   : > { %1054 = vrot.lane.b32.xlu1 %v2659_v19, %s2485_s25  ;;  %2312 = vmatpush3.xpose.msk.msra.mxu1 %vm810_vm2, %v2659_v19 }
  0xec   : > { %v719_v20 = vpop.f32.mrb[0].mxu0  ;;  %2316 = vmatprep.subr.mxu1 %v2484_v11 }
  0xed   : > { %v720_v22 = vadd.f32 %v2203_v17, %v719_v20  ;;  %v2299_v23 = vpop.f32.mrb[1].mxu0 }
  0xef   : > { %v2664_v24 = vmul.f32 0.35355338, %v720_v22 }
  0xf1   : > { %2314 = vmatmul.mubr.msk.f32.vlgmr.msra.gmra.mrb[2].mxu1 %vm810_vm2, %v2664_v24  ;;  %1052 = vrot.lane.b32.xlu1 %v2664_v24, %s2485_s25  ;;  %s625_s25 = scalar_lea.vmem %s2856_s19, %s2632_s2 }
  0xf2   : > { %2318 = vmatprep.mubr.msk.f32.mxu1 %vm2483_vm0, %v2484_v11 }
 0x15d   : > { %v1055_v32 = vpop.permute.xlu1 %1054 }
 0x163   : > { %v1053_v35 = vpop.permute.xlu1 %1052 }
 0x1c4   : > { %v883_v25 = vpop.f32.mrb[2].mxu1 }
 0x1c5   : > { %v2315_v26 = vpop.f32.mrb[3].mxu1  ;;  %v888_v27 = vsel %vm887_vm3, %v883_v25, -inf }
 0x1c6   : > { %889 = vmax.xlane.f32.xlu0 %v888_v27 }
 0x1dc   : > { %898 = vrot.lane.b32.xlu0 %v2659_v19, %s2486_s3 }
 0x253   : > { %v890_v28 = vpop.xlane.xlu0 %889 }
 0x254   : > { %v891_v29 = vsub.f32 %v883_v25, %v890_v28 }
 0x256   : > { %v892_v30 = vmul.f32 1.442695, %v891_v29 }
 0x257   : > { %v899_v31 = vpop.permute.xlu0 %898 }
 0x258   : > { %2452 = vpow2.f32 %v892_v30  ;;  %2317 = vmatpush3.msk.msra.mxu1 %vm904_vm4, %v899_v31 }
 0x259   : > { %2326 = vmatprep.subr.mxu1 %v2484_v11 }
 0x262   : > { %v2453_v33 = vpop.eup %2452 }
 0x263   : > { %2319 = vmatmul.mubr.msk.f32.vlgmr.msra.gmra.mrb[4].mxu1 %vm900_vm5, %v2453_v33  ;;  %v894_v34 = vsel %vm887_vm3, %v2453_v33, 0.0 }
 0x264   : > { %2327 = vmatpush3.xpose.msk.msra.mxu1 %vm810_vm2, %v1055_v32  ;;  %895 = vadd.xlane.f32.xlu1 %v894_v34  ;;  %v641_v34 = vld [vmem:[%s2843_s6 + $0x18] sm:$0xff] }
 0x265   : > { %2328 = vmatprep.mubr.msk.f32.mxu1 %vm2483_vm0, %v2484_v11  ;;  %2336 = vmatprep.subr.mxu1 %v2484_v11 }
 0x267   : > { %2329 = vmatmul.mubr.msk.f32.vlgmr.msra.gmra.mrb[6].mxu1 %vm810_vm2, %v1053_v35 }
 0x268   : > { %2338 = vmatprep.mubr.msk.f32.mxu1 %vm2483_vm0, %v2484_v11  ;;  %2337 = vmatpush3.msra.mxu1 %v639_v55 }
 0x269   : > { %2346 = vmatprep.subr.mxu1 %v2484_v11 }
 0x275   : > { %1140 = vrot.lane.b32.xlu1 %v2659_v19, %s2487_s26 }
 0x279   : > { %1292 = vrot.lane.b32.xlu1 %v2664_v24, %s2488_s27 }
 0x2f1   : > { %v896_v37 = vpop.xlane.xlu1 %895 }
 0x2f2   : > { %2454 = vrcp.f32 %v896_v37 }
 0x2f5   : > { %v1141_v42 = vpop.permute.xlu1 %1140 }
 0x2f9   : > { %v1293_v52 = vpop.permute.xlu1 %1292 }
 0x2fc   : > { %v2455_v38 = vpop.eup %2454 }
 0x336   : > { %v973_v39 = vpop.f32.mrb[4].mxu1 }
 0x337   : > { %v977_v40 = vmul.f32 %v2455_v38, %v973_v39  ;;  %v2320_v41 = vpop.f32.mrb[5].mxu1 }
 0x339   : > { %2324 = vmatmul.mubr.msk.f32.vlgmr.msra.gmra.mrb[2].mxu0 %vm810_vm2, %v977_v40 }
 0x33a   : > { %2332 = vmatpush3.msk.msra.mxu0 %vm904_vm4, %v1141_v42  ;;  %v1126_v43 = vpop.f32.mrb[6].mxu1  ;;  %2333 = vmatprep.mubr.msk.f32.mxu0 %vm2483_vm0, %v2484_v11 }
 0x33b   : > { %v2330_v44 = vpop.f32.mrb[7].mxu1  ;;  %v1130_v45 = vsel %vm887_vm3, %v1126_v43, -inf  ;;  %2341 = vmatprep.subr.mxu0 %v2484_v11 }
 0x33c   : > { %1131 = vmax.xlane.f32.xlu0 %v1130_v45 }
 0x352   : > { %1294 = vrot.lane.b32.xlu0 %v2659_v19, %s2488_s27 }
 0x3c9   : > { %v1132_v46 = vpop.xlane.xlu0 %1131 }
 0x3ca   : > { %v1133_v47 = vsub.f32 %v1126_v43, %v1132_v46 }
 0x3cc   : > { %v1134_v48 = vmul.f32 1.442695, %v1133_v47 }
 0x3cd   : > { %v1295_v50 = vpop.permute.xlu0 %1294 }
 0x3ce   : > { %2456 = vpow2.f32 %v1134_v48 }
 0x3d8   : > { %v2457_v49 = vpop.eup %2456 }
 0x3d9   : > { %2334 = vmatmul.mubr.msk.f32.vlgmr.msra.gmra.mrb[4].mxu0 %vm900_vm5, %v2457_v49  ;;  %v1136_v51 = vsel %vm887_vm3, %v2457_v49, 0.0 }
 0x3da   : > { %2342 = vmatpush3.xpose.msk.msra.mxu0 %vm810_vm2, %v1295_v50  ;;  %1137 = vadd.xlane.f32.xlu1 %v1136_v51  ;;  %v1804_v50 = vld [vmem:[%s2847_s10] sm:$0xff]  ;;  %v1805_v51 = vld [vmem:[%s2847_s10 + $0x8] sm:$0xff] }
 0x3db   : > { %2343 = vmatprep.mubr.msk.f32.mxu0 %vm2483_vm0, %v2484_v11  ;;  %2351 = vmatprep.subr.mxu0 %v2484_v11 }
 0x3dd   : > { %2344 = vmatmul.mubr.msk.f32.vlgmr.msra.gmra.mrb[6].mxu0 %vm810_vm2, %v1293_v52  ;;  %v2417_v52 = vpack.c.bf16 %v1805_v51, %v1804_v50 }
 0x3de   : > { %2353 = vmatprep.mubr.msk.f32.mxu0 %vm2483_vm0, %v2484_v11  ;;  %2352 = vmatpush3.msra.mxu0 %v640_v16 }
 0x3df   : > { %2361 = vmatprep.subr.mxu0 %v2484_v11 }
 0x3eb   : > { %1380 = vrot.lane.b32.xlu1 %v2659_v19, %s2489_s20 }
 0x3ef   : > { %1532 = vrot.lane.b32.xlu1 %v2664_v24, %s2490_s30 }
 0x40c   : > { %v1047_v53 = vpop.f32.mrb[2].mxu0 }
 0x40d   : > { %v2325_v54 = vpop.f32.mrb[3].mxu0  ;;  %v1051_v10 = vadd.f32 %v2207_v9, %v1047_v53  ;;  %v1807_v53 = vld [vmem:[%s2847_s10 + $0x18] sm:$0xff] }
 0x467   : > { %v1138_v56 = vpop.xlane.xlu1 %1137 }
 0x468   : > { %2458 = vrcp.f32 %v1138_v56 }
 0x46b   : > { %v1381_v61 = vpop.permute.xlu1 %1380 }
 0x46f   : > { %v1533_v8 = vpop.permute.xlu1 %1532 }
 0x472   : > { %v2459_v57 = vpop.eup %2458 }
 0x4ac   : > { %v1213_v58 = vpop.f32.mrb[4].mxu0 }
 0x4ad   : > { %v1217_v59 = vmul.f32 %v2459_v57, %v1213_v58  ;;  %v2335_v60 = vpop.f32.mrb[5].mxu0 }
 0x4af   : > { %2339 = vmatmul.mubr.msk.f32.vlgmr.msra.gmra.mrb[8].mxu1 %vm810_vm2, %v1217_v59  ;;  %v2228_v59 = vld [vmem:[%s2845_s8] ss:$0 sm:$0xff] }
 0x4b0   : > { %2347 = vmatpush3.msk.msra.mxu1 %vm904_vm4, %v1381_v61  ;;  %v1366_v62 = vpop.f32.mrb[6].mxu0  ;;  %2348 = vmatprep.mubr.msk.f32.mxu1 %vm2483_vm0, %v2484_v11  ;;  %v2229_v61 = vld [vmem:[%s2846_s9] ss:$0 sm:$0xff] }
 0x4b1   : > { %v2345_v63 = vpop.f32.mrb[7].mxu0  ;;  %v1370_v0 = vsel %vm887_vm3, %v1366_v62, -inf  ;;  %2356 = vmatprep.subr.mxu1 %v2484_v11 }
 0x4b2   : > { %1371 = vmax.xlane.f32.xlu0 %v1370_v0  ;;  %v1809_v0 = vld [vmem:[%s2849_s12] sm:$0xff] }
 0x4c8   : > { %1534 = vrot.lane.b32.xlu0 %v2659_v19, %s2490_s30  ;;  %s621_s30 = scalar_lea.vmem %s2855_s18, %s2632_s2 }
 0x53f   : > { %v1372_v1 = vpop.xlane.xlu0 %1371 }
 0x540   : > { %v1373_v2 = vsub.f32 %v1366_v62, %v1372_v1  ;;  %v1810_v1 = vld [vmem:[%s2849_s12 + $0x8] sm:$0xff] }
 0x542   : > { %v1374_v4 = vmul.f32 1.442695, %v1373_v2  ;;  %v1811_v2 = vld [vmem:[%s2849_s12 + $0x10] sm:$0xff] }
 0x543   : > { %v1535_v6 = vpop.permute.xlu0 %1534 }
 0x544   : > { %2460 = vpow2.f32 %v1374_v4  ;;  %v2423_v4 = vpack.c.bf16 %v1810_v1, %v1809_v0 }
 0x54e   : > { %v2461_v5 = vpop.eup %2460 }
 0x54f   : > { %2349 = vmatmul.mubr.msk.f32.vlgmr.msra.gmra.mrb[10].mxu1 %vm900_vm5, %v2461_v5  ;;  %v1376_v7 = vsel %vm887_vm3, %v2461_v5, 0.0  ;;  %v1812_v5 = vld [vmem:[%s2849_s12 + $0x18] sm:$0xff] }
 0x550   : > { %2357 = vmatpush3.xpose.msk.msra.mxu1 %vm810_vm2, %v1535_v6  ;;  %1377 = vadd.xlane.f32.xlu1 %v1376_v7  ;;  %v2426_v6 = vpack.c.bf16 %v1812_v5, %v1811_v2 }
 0x551   : > { %2358 = vmatprep.mubr.msk.f32.mxu1 %vm2483_vm0, %v2484_v11  ;;  %2366 = vmatprep.subr.mxu1 %v2484_v11 }
 0x553   : > { %2359 = vmatmul.mubr.msk.f32.vlgmr.msra.gmra.mrb[12].mxu1 %vm810_vm2, %v1533_v8 }
 0x554   : > { %2368 = vmatprep.mubr.msk.f32.mxu1 %vm2483_vm0, %v2484_v11  ;;  %2367 = vmatpush3.msra.mxu1 %v641_v34 }
 0x555   : > { %2422 = vmatprep.subr.bf16.mxu1 %v2482_v3 }
 0x561   : > { %1620 = vrot.lane.b32.xlu1 %v2659_v19, %s2491_s22 }
 0x582   : > { %v1287_v12 = vpop.f32.mrb[8].mxu1 }
 0x583   : > { %v1291_v13 = vadd.f32 %v1287_v12, %v1051_v10  ;;  %v2340_v14 = vpop.f32.mrb[9].mxu1 }
 0x5dd   : > { %v1378_v17 = vpop.xlane.xlu1 %1377 }
 0x5de   : > { %2462 = vrcp.f32 %v1378_v17 }
 0x5e1   : > { %v1621_v22 = vpop.permute.xlu1 %1620 }
 0x5e8   : > { %v2463_v18 = vpop.eup %2462 }
 0x622   : > { %v1453_v20 = vpop.f32.mrb[10].mxu1 }
 0x623   : > { %v1457_v19 = vmul.f32 %v2463_v18, %v1453_v20  ;;  %v2350_v21 = vpop.f32.mrb[11].mxu1 }
 0x624   : > { %v2232_v21 = vld [vmem:[%s2850_s13] ss:$0 sm:$0xff] }
 0x625   : > { %2354 = vmatmul.mubr.msk.f32.vlgmr.msra.gmra.mrb[8].mxu0 %vm810_vm2, %v1457_v19 }
 0x626   : > { %2362 = vmatpush3.msk.msra.mxu0 %vm904_vm4, %v1621_v22  ;;  %v1606_v23 = vpop.f32.mrb[12].mxu1  ;;  %2363 = vmatprep.mubr.msk.f32.mxu0 %vm2483_vm0, %v2484_v11 }
 0x627   : > { %v2360_v24 = vpop.f32.mrb[13].mxu1  ;;  %v1610_v25 = vsel %vm887_vm3, %v1606_v23, -inf  ;;  %2416 = vmatprep.subr.bf16.mxu0 %v2482_v3 }
 0x628   : > { %1611 = vmax.xlane.f32.xlu0 %v1610_v25 }
 0x6b5   : > { %v1612_v26 = vpop.xlane.xlu0 %1611 }
 0x6b6   : > { %v1613_v27 = vsub.f32 %v1606_v23, %v1612_v26 }
 0x6b8   : > { %v1614_v28 = vmul.f32 1.442695, %v1613_v27 }
 0x6ba   : > { %2464 = vpow2.f32 %v1614_v28 }
 0x6c4   : > { %v2465_v29 = vpop.eup %2464 }
 0x6c5   : > { %2364 = vmatmul.mubr.msk.f32.vlgmr.msra.gmra.mrb[10].mxu0 %vm900_vm5, %v2465_v29  ;;  %v1616_v30 = vsel %vm887_vm3, %v2465_v29, 0.0 }
 0x6c6   : > { %1617 = vadd.xlane.f32.xlu0 %v1616_v30  ;;  %2379 = vmatprep.mubr.msk.f32.mxu0 %vm2483_vm0, %v2484_v11 }
 0x6c7   : > { %2418 = vmatpush3.bf16.msra.mxu0 %v2417_v52 }
 0x6c8   : > { %2419 = vmatprep.subr.bf16.mxu0 %v2482_v3 }
 0x6f8   : > { %v1527_v31 = vpop.f32.mrb[8].mxu0 }
 0x6f9   : > { %v1531_v32 = vadd.f32 %v1527_v31, %v1291_v13  ;;  %v2355_v33 = vpop.f32.mrb[9].mxu0 }
 0x6fa   : > { %v2013_v33 = vld [vmem:[%s2853_s16 + $0x8] sm:$0xff] }
 0x753   : > { %v1618_v35 = vpop.xlane.xlu0 %1617 }
 0x754   : > { %2466 = vrcp.f32 %v1618_v35  ;;  %v2014_v35 = vld [vmem:[%s2853_s16 + $0x10] sm:$0xff] }
 0x75e   : > { %v2467_v36 = vpop.eup %2466 }
 0x798   : > { %v1693_v37 = vpop.f32.mrb[10].mxu0 }
 0x799   : > { %v1697_v38 = vmul.f32 %v2467_v36, %v1693_v37  ;;  %v2365_v39 = vpop.f32.mrb[11].mxu0  ;;  %v2015_v36 = vld [vmem:[%s2853_s16 + $0x18] sm:$0xff] }
 0x79a   : > { %v2432_v37 = vpack.c.bf16 %v2015_v36, %v2014_v35 }
 0x79b   : > { %2369 = vmatmul.mubr.msk.f32.vlgmr.msra.gmra.mrb[14].mxu1 %vm810_vm2, %v1697_v38 }
 0x79c   : > { %2390 = vmatprep.mubr.msk.f32.mxu1 %vm2483_vm0, %v2484_v11  ;;  %2424 = vmatpush3.bf16.msra.mxu1 %v2423_v4 }
 0x79d   : > { %2425 = vmatprep.subr.bf16.mxu1 %v2482_v3 }
 0x7a0   : > { %2427 = vmatpush3.bf16.msra.mxu1 %v2426_v6 }
 0x86e   : > { %v1767_v40 = vpop.f32.mrb[14].mxu1 }
 0x86f   : > { %v1771_v41 = vadd.f32 %v1767_v40, %v1531_v32  ;;  %v2370_v42 = vpop.f32.mrb[15].mxu1  ;;  %v2012_v32 = vld [vmem:[%s2853_s16] sm:$0xff] }
 0x870   : > { %v2429_v34 = vpack.c.bf16 %v2013_v33, %v2012_v32 }
 0x871   : > { %v1772_v43 = vadd.f32 %v1771_v41, %v2642_v15  ;;  %v1806_v15 = vld [vmem:[%s2847_s10 + $0x10] sm:$0xff] }
 0x872   : > { %v2420_v54 = vpack.c.bf16 %v1807_v53, %v1806_v15 }
 0x873   : > { %v1776_v44 = vsel %vm1775_vm6, %v1772_v43, 0.0 }
 0x874   : > { %1777 = vadd.xlane.f32.xlu0 %v1776_v44  ;;  %2421 = vmatpush3.bf16.msra.mxu0 %v2420_v54 }
 0x875   : > { %2428 = vmatprep.subr.bf16.mxu0 %v2482_v3 }
 0x901   : > { %v1778_v45 = vpop.xlane.xlu0 %1777 }
 0x902   : > { %v1780_v46 = vmul.f32 0.03125, %v1778_v45 }
 0x904   : > { %v1781_v47 = vsub.f32 %v1772_v43, %v1780_v46  ;;  %v2235_v43 = vld [vmem:[%s2852_s15] ss:$0 sm:$0xff] }
 0x905   : > { %v2236_v46 = vld [vmem:[%s2854_s17] ss:$0 sm:$0xff] }
 0x906   : > { %v1782_v48 = vmul.f32 %v1781_v47, %v1781_v47 }
 0x908   : > { %v1783_v49 = vsel %vm1775_vm6, %v1782_v48, 0.0 }
 0x909   : > { %1784 = vadd.xlane.f32.xlu0 %v1783_v49 }
 0x996   : > { %v1785_v55 = vpop.xlane.xlu0 %1784 }
 0x997   : > { %v1786_v56 = vmul.f32 0.03125, %v1785_v55 }
 0x999   : > { %v1787_v57 = vadd.f32 1e-05, %v1786_v56 }
 0x99b   : > { %2468 = vrsqrt.f32 %v1787_v57 }
 0x9a5   : > { %v2469_v58 = vpop.eup %2468 }
 0x9a6   : > { %v1789_v60 = vmul.f32 %v2469_v58, %v1781_v47 }
 0x9a8   : > { %v1796_v62 = vmul.f32 %v2228_v59, %v1789_v60 }
 0x9aa   : > { %v1803_v63 = vadd.f32 %v2229_v61, %v1796_v62 }
 0x9ac   : > { %2380 = vmatmul.mubr.msk.f32.vlgmr.msra.gmra.mrb[12].mxu0 %vm649_vm1, %v1803_v63 }
 0x9ad   : > { %2401 = vmatprep.mubr.msk.f32.mxu0 %vm2483_vm0, %v2484_v11  ;;  %v2230_v11 = vld [vmem:[%s2848_s11] ss:$0 sm:$0xff]  ;;  %2430 = vmatpush3.bf16.msra.mxu0 %v2429_v34 }
 0x9ae   : > { %2431 = vmatprep.subr.bf16.mxu0 %v2482_v3  ;;  %v2234_v3 = vld [vmem:[%s2851_s14] ss:$0 sm:$0xff] }
 0x9b1   : > { %2433 = vmatpush3.bf16.msra.mxu0 %v2432_v37 }
 0xa7f   : > { %v1889_v7 = vpop.f32.mrb[12].mxu0 }
 0xa80   : > { %v1890_v8 = vadd.f32 %v2230_v11, %v1889_v7  ;;  %v2381_v9 = vpop.f32.mrb[13].mxu0 }
 0xa82   : > { %v1894_v10 = vmul.f32 0.044715, %v1890_v8  ;;  %v1893_v18 = vmul.f32 0.5, %v1890_v8 }
 0xa84   : > { %v1895_v12 = vmul.f32 %v1894_v10, %v1890_v8 }
 0xa86   : > { %v1896_v13 = vmul.f32 %v1895_v12, %v1890_v8 }
 0xa88   : > { %v1897_v14 = vadd.f32 %v1896_v13, %v1890_v8 }
 0xa8a   : > { %v1898_v16 = vmul.f32 0.7978846, %v1897_v14 }
 0xa8c   : > { %2470 = vtanh.f32 %v1898_v16 }
 0xa96   : > { %v2471_v17 = vpop.eup %2470 }
 0xa97   : > { %v1900_v20 = vadd.f32 1.0, %v2471_v17 }
 0xa99   : > { %v1901_v19 = vmul.f32 %v1900_v20, %v1893_v18 }
 0xa9b   : > { %2391 = vmatmul.mubr.msk.f32.vlgmr.msra.gmra.mrb[16].mxu1 %vm649_vm1, %v1901_v19 }
 0xb6e   : > { %v1977_v22 = vpop.f32.mrb[16].mxu1 }
 0xb6f   : > { %v1978_v23 = vadd.f32 %v2232_v21, %v1977_v22  ;;  %v2392_v24 = vpop.f32.mrb[17].mxu1 }
 0xb71   : > { %v1981_v25 = vadd.f32 %v1978_v23, %v1803_v63 }
 0xb73   : > { %v1984_v26 = vsel %vm1775_vm6, %v1981_v25, 0.0 }
 0xb74   : > { %1985 = vadd.xlane.f32.xlu0 %v1984_v26 }
 0xc01   : > { %v1986_v27 = vpop.xlane.xlu0 %1985 }
 0xc02   : > { %v1987_v28 = vmul.f32 0.03125, %v1986_v27 }
 0xc04   : > { %v1988_v29 = vsub.f32 %v1981_v25, %v1987_v28 }
 0xc06   : > { %v1989_v30 = vmul.f32 %v1988_v29, %v1988_v29 }
 0xc08   : > { %v1990_v31 = vsel %vm1775_vm6, %v1989_v30, 0.0 }
 0xc09   : > { %1991 = vadd.xlane.f32.xlu1 %v1990_v31 }
 0xc96   : > { %v1992_v38 = vpop.xlane.xlu1 %1991 }
 0xc97   : > { %v1993_v39 = vmul.f32 0.03125, %v1992_v38 }
 0xc99   : > { %v1994_v40 = vadd.f32 1e-05, %v1993_v39 }
 0xc9b   : > { %2472 = vrsqrt.f32 %v1994_v40 }
 0xca5   : > { %v2473_v41 = vpop.eup %2472 }
 0xca6   : > { %v1996_v42 = vmul.f32 %v2473_v41, %v1988_v29 }
 0xca8   : > { %v2003_v44 = vmul.f32 %v2234_v3, %v1996_v42 }
 0xcaa   : > { %v2010_v45 = vadd.f32 %v2235_v43, %v2003_v44 }
 0xcac   : > { %2011 = vst.msk [vmem:[%s621_s30] sm:$0xf] %vm1775_vm6, %v2010_v45  ;;  %2402 = vmatmul.mubr.msk.f32.vlgmr.msra.gmra.mrb[14].mxu0 %vm649_vm1, %v2010_v45 }
 0xd7f   : > { %v2092_v47 = vpop.f32.mrb[14].mxu0 }
 0xd80   : > { %v2093_v48 = vadd.f32 %v2236_v46, %v2092_v47  ;;  %v2403_v49 = vpop.f32.mrb[15].mxu0 }
 0xd82   : > { %2097 = vst.msk [vmem:[%s625_s25] sm:$0xf] %vm2096_vm7, %v2093_v48 }
 0xd83 PF: > { %s30_s0 = sadd.s32 1, %s2480_s0  }
 0xd84   : > { %p27_p4 = scmp.ge.s32.totalorder %s30_s0, 8  }
 0xd86   :  { %29 = sbr.rel (!%p27_p4) target bundleno = 5 (0x5), region = 137 }

// kernel: decoder_forward.11
= control target key start
LH: loop header
LB: loop body
LE: loop exit
PB: predicated region body
PF: predicated region fallthrough
CT: control target
= control target key end

     0   :  { %s3022_s0 = inlined_call_operand.vmem [shape: f32[6,4,32], index: 0, kind: input, shape index: {}]   ;;  %s3023_s1 = inlined_call_operand.vmem [shape: f32[6,4,32], index: 1, kind: input, shape index: {}]   ;;  %s3024_s2 = inlined_call_operand.vmem [shape: f32[32,32], index: 2, kind: input, shape index: {}]   ;;  %s3025_s3 = inlined_call_operand.vmem [shape: f32[1,32], index: 3, kind: input, shape index: {}]   ;;  %s3026_s4 = inlined_call_operand.vmem [shape: f32[32,64], index: 4, kind: input, shape index: {}]   ;;  %s3027_s5 = inlined_call_operand.vmem [shape: f32[1,64], index: 5, kind: input, shape index: {}]   ;;  %s3028_s6 = inlined_call_operand.vmem [shape: f32[32,32], index: 6, kind: input, shape index: {}]   ;;  %s3029_s7 = inlined_call_operand.vmem [shape: f32[1,32], index: 7, kind: input, shape index: {}]   ;;  %s3030_s8 = inlined_call_operand.vmem [shape: f32[1,32], index: 8, kind: input, shape index: {}]   ;;  %s3031_s9 = inlined_call_operand.vmem [shape: f32[1,32], index: 9, kind: input, shape index: {}]   ;;  %s3032_s10 = inlined_call_operand.vmem [shape: f32[32,32], index: 10, kind: input, shape index: {}]   ;;  %s3033_s11 = inlined_call_operand.vmem [shape: f32[1,32], index: 11, kind: input, shape index: {}]   ;;  %s3034_s12 = inlined_call_operand.vmem [shape: f32[32,32], index: 12, kind: input, shape index: {}]   ;;  %s3035_s13 = inlined_call_operand.vmem [shape: f32[1,32], index: 13, kind: input, shape index: {}]   ;;  %s3036_s14 = inlined_call_operand.vmem [shape: f32[1,32], index: 14, kind: input, shape index: {}]   ;;  %s3037_s15 = inlined_call_operand.vmem [shape: f32[1,32], index: 15, kind: input, shape index: {}]   ;;  %s3038_s16 = inlined_call_operand.vmem [shape: f32[32,8], index: 16, kind: input, shape index: {}]   ;;  %s3039_s17 = inlined_call_operand.vmem [shape: f32[1,8], index: 17, kind: input, shape index: {}]   ;;  %s3040_s18 = inlined_call_operand.hbm [shape: f32[6,4,32], index: 18, kind: output, shape index: {0}]   ;;  %s3041_s19 = inlined_call_operand.vmem [shape: f32[6,4,8], index: 19, kind: output, shape index: {1}]  }
   0x1   :  { %3048 = sst [smem:[#allocation10_spill]] %s3022_s0 }
   0x2   :  { %3049 = sst [smem:[#allocation11_spill]] %s3023_s1 }
   0x3   :  { %3050 = sst [smem:[#allocation12_spill]] %s3024_s2 }
   0x4   :  { %3051 = sst [smem:[#allocation13_spill]] %s3025_s3 }
   0x5   :  { %3052 = sst [smem:[#allocation14_spill]] %s3026_s4 }
   0x6   :  { %3053 = sst [smem:[#allocation15_spill]] %s3027_s5 }
   0x7   :  { %3054 = sst [smem:[#allocation16_spill]] %s3028_s6 }
   0x8   :  { %25 = vsyncpa [#allocation3], 0 }
   0x9   :  { %27 = vsyncpa [#allocation3 + $0x1], 0  ;;  %s2701_s0 = smov 0   ;;  %s2703_s30 = smov 0  }
   0xa   :  { %s2705_s20 = smov 0   ;;  %s2707_s21 = smov 0  }
   0xb LB: > { %3055 = sst [smem:[#allocation5_spill]] %s2576_s0  ;;  %s2722_s1 = sadd.s32 4294967295, %s2588_s21   ;;  %s2588_s21 = sphi %s2707_s21, %s3071_s21   ;;  %s2584_s20 = sphi %s2705_s20, %s3073_s20   ;;  %s2580_s30 = sphi %s2703_s30, %s3075_s30   ;;  %s2576_s0 = sphi %s2701_s0, %s3074_s0  }
   0xc   : > { %3056 = sst [smem:[#allocation6_spill]] %s2584_s20  ;;  %s2214_s22 = sadd.s32 4294967294, %s2588_s21  }
   0xd   : > { %s2726_s2 = sadd.s32 1, %s2588_s21   ;;  %s428_s23 = sadd.s32 1, %s2584_s20 }
   0xe   : > { %3057 = sst [smem:[#allocation7_spill]] %s2726_s2  ;;  %s425_s24 = ssub.s32 %s2588_s21, %s2726_s2 }
   0xf   : > { %p438_p0 = scmp.ne.s32.totalorder %s2584_s20, %s2580_s30  ;;  %p426_p1 = scmp.eq.s32.totalorder %s425_s24, 0 }
  0x10   : > { %p439_p2 = scmp.eq.s32.totalorder %s2722_s1, 5  ;;  %p444_p3 = scmp.ne.s32.totalorder %s2580_s30, %s2576_s0 }
  0x11   : > { %p445_p4 = scmp.eq.s32.totalorder %s2214_s22, 5  ;;  %p2217_p7 = scmp.ge.s32.totalorder %s2588_s21, 1 }
  0x12   : > { %s2737_s25 = scalar_select %p426_p1, %s2584_s20, %s428_s23  }
  0x13   : > { %p2739_p5 = por %p439_p2, %p438_p0  ;;  %p2743_p6 = por %p445_p4, %p444_p3 }
  0x14   : > { %3058 = sst [smem:[#allocation8_spill]] %s2737_s25  ;;  %p551_p8 = scmp.lt.s32.totalorder %s2588_s21, 7 }
  0x15   : > { %s3060_s26 = scalar_select %p2743_p6, 1, 0 }
  0x16   : > { %p552_p9 = pnand %p2217_p7, %p551_p8 }
  0x17   : > { %3061 = sst [smem:[#allocation9_spill]] %s3060_s26  ;;  %s3062_s4 = sld [smem:[#allocation14_spill]] (!%p552_p9)  ;;  %v2590_v3 = vmov (!%p552_p9), 0.0|0.0   ;;  %vm2591_vm0 = vmmov (!%p552_p9), 0   ;;  %v2592_v11 = vmov (!%p552_p9), 0.0   ;;  %vm649_vm1 = vcmask (!%p552_p9), 261120  }
  0x18   : > { %555 = sbr.rel (%p552_p9) target bundleno = 3474 (0xd92), region = 92  ;;  %s3063_s25 = sld [smem:[#allocation12_spill]] (!%p552_p9)  ;;  %2431 = vmatprep.subr.bf16.mxu1 (!%p552_p9), %v2590_v3  ;;  %2425 = vmatprep.subr.bf16.mxu0 (!%p552_p9), %v2590_v3  ;;  %vm810_vm2 = vcmask (!%p552_p9), 64512   ;;  %vm887_vm3 = vcmask (!%p552_p9), 27648   ;;  %vm904_vm4 = vcmask (!%p552_p9), 1043456   ;;  %vm900_vm5 = vcmask (!%p552_p9), 31744  }
  0x19   : > { %p614_p10 = scmp.lt.s32.totalorder (!%p552_p9), %s2722_s1, 5  ;;  %2329 = vmatprep.mubr.msk.f32.mxu1 (!%p552_p9), %vm2591_vm0, %v2592_v11  ;;  %2318 = vmatprep.mubr.msk.f32.mxu0 (!%p552_p9), %vm2591_vm0, %v2592_v11  ;;  %s3064_s27 = sld [smem:[#allocation11_spill]] (!%p552_p9)  ;;  %vm1775_vm6 = vcmask (!%p552_p9), 257024  }
  0x1a   : > { %s3065_s23 = sld [smem:[#allocation10_spill]] (!%p552_p9)  ;;  %s3066_s5 = sld [smem:[#allocation15_spill]] (!%p552_p9) }
  0x1b   : > { %s2593_s29 = smov (!%p552_p9), 120   ;;  %s2594_s22 = smov (!%p552_p9), 96  }
  0x1c   : > { %s3068_s6 = sld [smem:[#allocation16_spill]] (!%p552_p9)  ;;  %s2597_s26 = smov (!%p552_p9), 80  }
  0x1d   : > { %v633_v0 = vld [vmem:[%s3062_s4] sm:$0xff] (!%p552_p9)  ;;  %v634_v1 = vld [vmem:[%s3062_s4 + $0x8] sm:$0xff] (!%p552_p9)  ;;  %v635_v6 = vld [vmem:[%s3062_s4 + $0x10] sm:$0xff] (!%p552_p9) }
  0x1e   : > { %v628_v2 = vld [vmem:[%s3063_s25] sm:$0xff] (!%p552_p9)  ;;  %v2432_v4 = vpack.c.bf16 (!%p552_p9), %v634_v1, %v633_v0  ;;  %v629_v5 = vld [vmem:[%s3063_s25 + $0x8] sm:$0xff] (!%p552_p9)  ;;  %v636_v7 = vld [vmem:[%s3062_s4 + $0x18] sm:$0xff] (!%p552_p9) }
  0x1f   : > { %v2426_v8 = vpack.c.bf16 %v629_v5, %v628_v2  ;;  %v630_v9 = vld [vmem:[%s3063_s25 + $0x10] sm:$0xff]  ;;  %v631_v10 = vld [vmem:[%s3063_s25 + $0x18] sm:$0xff]  ;;  %v2435_v12 = vpack.c.bf16 %v636_v7, %v635_v6  ;;  %s615_s20 = scalar_select %p614_p10, %s2722_s1, 5 }
  0x20   : > { %2433 = vmatpush3.bf16.msra.mxu1 %v2432_v4  ;;  %v2429_v13 = vpack.c.bf16 %v631_v10, %v630_v9  ;;  %v2224_v16 = vld [vmem:[%s3066_s5] ss:$0 sm:$0xff] }
  0x21   : > { %2427 = vmatpush3.bf16.msra.mxu0 %v2426_v8  ;;  %2434 = vmatprep.subr.bf16.mxu1 %v2590_v3  ;;  %s2783_s2 = sshll.u32 %s615_s20, 2  ;;  %v2226_v9 = vld [vmem:[%s3029_s7] ss:$0 sm:$0xff]  ;;  %s605_s20 = sand.u32 1, %s2580_s30  }
  0x22   : > { %2428 = vmatprep.subr.bf16.mxu0 %v2590_v3  ;;  %s621_s28 = scalar_lea.vmem %s3064_s27, %s2783_s2  ;;  %s617_s24 = scalar_lea.vmem %s3065_s23, %s2783_s2  ;;  %v638_v36 = vld [vmem:[%s3068_s6] sm:$0xff]  ;;  %v639_v55 = vld [vmem:[%s3068_s6 + $0x8] sm:$0xff] }
  0x23   : > { %v627_v14 = vld [vmem:[%s621_s28] sm:$0xf]  ;;  %s3067_s28 = sld [smem:[#allocation13_spill]]  ;;  %s2595_s23 = smov 88  }
  0x24   : > { %2436 = vmatpush3.bf16.msra.mxu1 %v2435_v12  ;;  %v2793_v15 = vld [vmem:[%s617_s24] sm:$0xf]  ;;  %s2596_s24 = smov 112   ;;  %s2598_s27 = smov 104  }
  0x25   : > { %2430 = vmatpush3.bf16.msra.mxu0 %v2429_v13  ;;  %2332 = vmatprep.subr.mxu1 %v2592_v11 }
  0x26   : > { %2342 = vmatprep.subr.mxu0 %v2592_v11 }
  0x27   : > { %2330 = vmatmul.mubr.msk.f32.vlgmr.msra.gmra.mrb[0].mxu1 %vm649_vm1, %v627_v14 }
  0x28   : > { %2319 = vmatmul.mubr.msk.f32.vlgmr.msra.gmra.mrb[0].mxu0 %vm649_vm1, %v2793_v15  ;;  %2334 = vmatprep.mubr.msk.f32.mxu1 %vm2591_vm0, %v2592_v11 }
  0x29   : > { %2344 = vmatprep.mubr.msk.f32.mxu0 %vm2591_vm0, %v2592_v11  ;;  %v2222_v17 = vld [vmem:[%s3067_s28] ss:$0 sm:$0xff]  ;;  %2343 = vmatpush3.msra.mxu0 %v638_v36  ;;  %s2600_s28 = smov [#allocation2]  }
  0x2a   : > { %2352 = vmatprep.subr.mxu0 %v2592_v11 }
  0xfa   : > { %v799_v18 = vpop.f32.mrb[0].mxu1 }
  0xfb   : > { %v2810_v19 = vadd.f32 %v2224_v16, %v799_v18  ;;  %v719_v20 = vpop.f32.mrb[0].mxu0  ;;  %v2331_v21 = vpop.f32.mrb[1].mxu1  ;;  %v640_v16 = vld [vmem:[%s3068_s6 + $0x10] sm:$0xff] }
  0xfc   : > { %v720_v22 = vadd.f32 %v2222_v17, %v719_v20  ;;  %v2320_v23 = vpop.f32.mrb[1].mxu0 }
  0xfd   : > { %1054 = vrot.lane.b32.xlu1 %v2810_v19, %s2593_s29  ;;  %2333 = vmatpush3.xpose.msk.msra.mxu1 %vm810_vm2, %v2810_v19 }
  0xfe   : > { %v2815_v24 = vmul.f32 0.35355338, %v720_v22  ;;  %2337 = vmatprep.subr.mxu1 %v2592_v11 }
 0x100   : > { %2335 = vmatmul.mubr.msk.f32.vlgmr.msra.gmra.mrb[2].mxu1 %vm810_vm2, %v2815_v24 }
 0x101   : > { %1052 = vrot.lane.b32.xlu1 %v2815_v24, %s2593_s29  ;;  %2339 = vmatprep.mubr.msk.f32.mxu1 %vm2591_vm0, %v2592_v11  ;;  %s2530_s29 = sshll.u32 %s2600_s28, 4  ;;  %s2531_s29 = int_to_ptr.vmem [resolvable:$false] %s2530_s29 }
 0x16f   : > { %v1055_v32 = vpop.permute.xlu1 %1054 }
 0x173   : > { %v1053_v35 = vpop.permute.xlu1 %1052 }
 0x1d3   : > { %v883_v25 = vpop.f32.mrb[2].mxu1 }
 0x1d4   : > { %v2336_v26 = vpop.f32.mrb[3].mxu1  ;;  %v888_v27 = vsel %vm887_vm3, %v883_v25, -inf }
 0x1d5   : > { %889 = vmax.xlane.f32.xlu0 %v888_v27 }
 0x1eb   : > { %898 = vrot.lane.b32.xlu0 %v2810_v19, %s2594_s22  ;;  %s2599_s22 = smov 72  }
 0x262   : > { %v890_v28 = vpop.xlane.xlu0 %889 }
 0x263   : > { %v891_v29 = vsub.f32 %v883_v25, %v890_v28 }
 0x265   : > { %v892_v30 = vmul.f32 1.442695, %v891_v29 }
 0x266   : > { %v899_v31 = vpop.permute.xlu0 %898 }
 0x267   : > { %2504 = vpow2.f32 %v892_v30  ;;  %2338 = vmatpush3.msk.msra.mxu1 %vm904_vm4, %v899_v31 }
 0x268   : > { %2347 = vmatprep.subr.mxu1 %v2592_v11 }
 0x271   : > { %v2505_v33 = vpop.eup %2504 }
 0x272   : > { %2340 = vmatmul.mubr.msk.f32.vlgmr.msra.gmra.mrb[4].mxu1 %vm900_vm5, %v2505_v33  ;;  %v894_v34 = vsel %vm887_vm3, %v2505_v33, 0.0 }
 0x273   : > { %2348 = vmatpush3.xpose.msk.msra.mxu1 %vm810_vm2, %v1055_v32  ;;  %895 = vadd.xlane.f32.xlu1 %v894_v34  ;;  %v641_v34 = vld [vmem:[%s3068_s6 + $0x18] sm:$0xff] }
 0x274   : > { %2349 = vmatprep.mubr.msk.f32.mxu1 %vm2591_vm0, %v2592_v11  ;;  %2357 = vmatprep.subr.mxu1 %v2592_v11 }
 0x276   : > { %2350 = vmatmul.mubr.msk.f32.vlgmr.msra.gmra.mrb[6].mxu1 %vm810_vm2, %v1053_v35 }
 0x277   : > { %2359 = vmatprep.mubr.msk.f32.mxu1 %vm2591_vm0, %v2592_v11  ;;  %2358 = vmatpush3.msra.mxu1 %v639_v55 }
 0x278   : > { %2367 = vmatprep.subr.mxu1 %v2592_v11 }
 0x284   : > { %1140 = vrot.lane.b32.xlu1 %v2810_v19, %s2595_s23  ;;  %s2258_s23 = sshll.u32 %s2722_s1, 6 }
 0x285   : > { %s2979_s0 = scalar_lea.hbm %s3040_s18, %s2258_s23 }
 0x288   : > { %1292 = vrot.lane.b32.xlu1 %v2815_v24, %s2596_s24 }
 0x300   : > { %v896_v37 = vpop.xlane.xlu1 %895 }
 0x301   : > { %2506 = vrcp.f32 %v896_v37 }
 0x304   : > { %v1141_v42 = vpop.permute.xlu1 %1140 }
 0x308   : > { %v1293_v52 = vpop.permute.xlu1 %1292 }
 0x30b   : > { %v2507_v38 = vpop.eup %2506 }
 0x345   : > { %v973_v39 = vpop.f32.mrb[4].mxu1 }
 0x346   : > { %v977_v40 = vmul.f32 %v2507_v38, %v973_v39  ;;  %v2341_v41 = vpop.f32.mrb[5].mxu1 }
 0x348   : > { %2345 = vmatmul.mubr.msk.f32.vlgmr.msra.gmra.mrb[2].mxu0 %vm810_vm2, %v977_v40 }
 0x349   : > { %2353 = vmatpush3.msk.msra.mxu0 %vm904_vm4, %v1141_v42  ;;  %v1126_v43 = vpop.f32.mrb[6].mxu1  ;;  %2354 = vmatprep.mubr.msk.f32.mxu0 %vm2591_vm0, %v2592_v11 }
 0x34a   : > { %v2351_v44 = vpop.f32.mrb[7].mxu1  ;;  %v1130_v45 = vsel %vm887_vm3, %v1126_v43, -inf  ;;  %2362 = vmatprep.subr.mxu0 %v2592_v11 }
 0x34b   : > { %1131 = vmax.xlane.f32.xlu0 %v1130_v45 }
 0x361   : > { %1294 = vrot.lane.b32.xlu0 %v2810_v19, %s2596_s24 }
 0x3d8   : > { %v1132_v46 = vpop.xlane.xlu0 %1131 }
 0x3d9   : > { %v1133_v47 = vsub.f32 %v1126_v43, %v1132_v46 }
 0x3db   : > { %v1134_v48 = vmul.f32 1.442695, %v1133_v47 }
 0x3dc   : > { %v1295_v50 = vpop.permute.xlu0 %1294 }
 0x3dd   : > { %2508 = vpow2.f32 %v1134_v48 }
 0x3e7   : > { %v2509_v49 = vpop.eup %2508 }
 0x3e8   : > { %2355 = vmatmul.mubr.msk.f32.vlgmr.msra.gmra.mrb[4].mxu0 %vm900_vm5, %v2509_v49  ;;  %v1136_v51 = vsel %vm887_vm3, %v2509_v49, 0.0 }
 0x3e9   : > { %2363 = vmatpush3.xpose.msk.msra.mxu0 %vm810_vm2, %v1295_v50  ;;  %1137 = vadd.xlane.f32.xlu1 %v1136_v51  ;;  %v1804_v50 = vld [vmem:[%s3032_s10] sm:$0xff]  ;;  %v1805_v51 = vld [vmem:[%s3032_s10 + $0x8] sm:$0xff] }
 0x3ea   : > { %2364 = vmatprep.mubr.msk.f32.mxu0 %vm2591_vm0, %v2592_v11  ;;  %2372 = vmatprep.subr.mxu0 %v2592_v11 }
 0x3ec   : > { %2365 = vmatmul.mubr.msk.f32.vlgmr.msra.gmra.mrb[6].mxu0 %vm810_vm2, %v1293_v52  ;;  %v2438_v52 = vpack.c.bf16 %v1805_v51, %v1804_v50 }
 0x3ed   : > { %2374 = vmatprep.mubr.msk.f32.mxu0 %vm2591_vm0, %v2592_v11  ;;  %2373 = vmatpush3.msra.mxu0 %v640_v16 }
 0x3ee   : > { %2382 = vmatprep.subr.mxu0 %v2592_v11 }
 0x3fa   : > { %1380 = vrot.lane.b32.xlu1 %v2810_v19, %s2597_s26  ;;  %s2099_s26 = scalar_lea.sflag [#allocation3], %s605_s20 }
 0x3fe   : > { %1532 = vrot.lane.b32.xlu1 %v2815_v24, %s2598_s27 }
 0x41b   : > { %v1047_v53 = vpop.f32.mrb[2].mxu0 }
 0x41c   : > { %v2346_v54 = vpop.f32.mrb[3].mxu0  ;;  %v1051_v10 = vadd.f32 %v2226_v9, %v1047_v53  ;;  %v1807_v53 = vld [vmem:[%s3032_s10 + $0x18] sm:$0xff] }
 0x476   : > { %v1138_v56 = vpop.xlane.xlu1 %1137 }
 0x477   : > { %2510 = vrcp.f32 %v1138_v56 }
 0x47a   : > { %v1381_v61 = vpop.permute.xlu1 %1380 }
 0x47e   : > { %v1533_v8 = vpop.permute.xlu1 %1532 }
 0x481   : > { %v2511_v57 = vpop.eup %2510 }
 0x4bb   : > { %v1213_v58 = vpop.f32.mrb[4].mxu0 }
 0x4bc   : > { %v1217_v59 = vmul.f32 %v2511_v57, %v1213_v58  ;;  %v2356_v60 = vpop.f32.mrb[5].mxu0 }
 0x4be   : > { %2360 = vmatmul.mubr.msk.f32.vlgmr.msra.gmra.mrb[8].mxu1 %vm810_vm2, %v1217_v59  ;;  %v2247_v59 = vld [vmem:[%s3030_s8] ss:$0 sm:$0xff] }
 0x4bf   : > { %2368 = vmatpush3.msk.msra.mxu1 %vm904_vm4, %v1381_v61  ;;  %v1366_v62 = vpop.f32.mrb[6].mxu0  ;;  %2369 = vmatprep.mubr.msk.f32.mxu1 %vm2591_vm0, %v2592_v11  ;;  %v2248_v61 = vld [vmem:[%s3031_s9] ss:$0 sm:$0xff] }
 0x4c0   : > { %v2366_v63 = vpop.f32.mrb[7].mxu0  ;;  %v1370_v0 = vsel %vm887_vm3, %v1366_v62, -inf  ;;  %2377 = vmatprep.subr.mxu1 %v2592_v11 }
 0x4c1   : > { %1371 = vmax.xlane.f32.xlu0 %v1370_v0  ;;  %v1809_v0 = vld [vmem:[%s3034_s12] sm:$0xff] }
 0x4d7   : > { %1534 = vrot.lane.b32.xlu0 %v2810_v19, %s2598_s27  ;;  %s2218_s27 = sshll.u32 %s605_s20, 2 }
 0x54e   : > { %v1372_v1 = vpop.xlane.xlu0 %1371 }
 0x54f   : > { %v1373_v2 = vsub.f32 %v1366_v62, %v1372_v1  ;;  %v1810_v1 = vld [vmem:[%s3034_s12 + $0x8] sm:$0xff] }
 0x551   : > { %v1374_v4 = vmul.f32 1.442695, %v1373_v2  ;;  %v1811_v2 = vld [vmem:[%s3034_s12 + $0x10] sm:$0xff] }
 0x552   : > { %v1535_v6 = vpop.permute.xlu0 %1534 }
 0x553   : > { %2512 = vpow2.f32 %v1374_v4  ;;  %v2444_v4 = vpack.c.bf16 %v1810_v1, %v1809_v0 }
 0x55d   : > { %v2513_v5 = vpop.eup %2512 }
 0x55e   : > { %2370 = vmatmul.mubr.msk.f32.vlgmr.msra.gmra.mrb[10].mxu1 %vm900_vm5, %v2513_v5  ;;  %v1376_v7 = vsel %vm887_vm3, %v2513_v5, 0.0  ;;  %v1812_v5 = vld [vmem:[%s3034_s12 + $0x18] sm:$0xff] }
 0x55f   : > { %2378 = vmatpush3.xpose.msk.msra.mxu1 %vm810_vm2, %v1535_v6  ;;  %1377 = vadd.xlane.f32.xlu1 %v1376_v7  ;;  %v2447_v6 = vpack.c.bf16 %v1812_v5, %v1811_v2 }
 0x560   : > { %2379 = vmatprep.mubr.msk.f32.mxu1 %vm2591_vm0, %v2592_v11  ;;  %2387 = vmatprep.subr.mxu1 %v2592_v11 }
 0x562   : > { %2380 = vmatmul.mubr.msk.f32.vlgmr.msra.gmra.mrb[12].mxu1 %vm810_vm2, %v1533_v8 }
 0x563   : > { %2389 = vmatprep.mubr.msk.f32.mxu1 %vm2591_vm0, %v2592_v11  ;;  %2388 = vmatpush3.msra.mxu1 %v641_v34 }
 0x564   : > { %2443 = vmatprep.subr.bf16.mxu1 %v2590_v3 }
 0x570   : > { %1620 = vrot.lane.b32.xlu1 %v2810_v19, %s2599_s22  ;;  %s607_s22 = scalar_lea.vmem [#allocation2], %s2218_s27  ;;  %s2532_s27 = scalar_lea.vmem %s2531_s29, 128 }
 0x571   : > { %s2116_s24 = sshll.u32 %s607_s22, 4  ;;  %s2117_s24 = int_to_ptr.vmem [resolvable:$true] %s2116_s24 }
 0x572   : > { %s2526_s6 = scalar_lea.vmem %s2117_s24, 64  ;;  %p2533_p0 = scmp.lt.s32.totalorder %s2117_s24, %s2531_s29 }
 0x573   : > { %p2527_p11 = scmp.ne.s32.totalorder %s2117_s24, %s2526_s6  ;;  %p2534_p1 = scmp.lt.s32.totalorder %s2532_s27, %s2526_s6 }
 0x575   : > { %p2528_p12 = pnand %p2527_p11, %p2739_p5  ;;  %p2535_p2 = por %p2534_p1, %p2533_p0 }
 0x577   : > { %p2529_p13 = pneg %p2528_p12 }
 0x579   : > { %p2536_p3 = pnand %p2535_p2, %p2529_p13 }
 0x591   : > { %v1287_v12 = vpop.f32.mrb[8].mxu1 }
 0x592   : > { %v1291_v13 = vadd.f32 %v1287_v12, %v1051_v10  ;;  %v2361_v14 = vpop.f32.mrb[9].mxu1 }
 0x5ec   : > { %v1378_v17 = vpop.xlane.xlu1 %1377 }
 0x5ed   : > { %2514 = vrcp.f32 %v1378_v17 }
 0x5f0   : > { %v1621_v22 = vpop.permute.xlu1 %1620 }
 0x5f7   : > { %v2515_v18 = vpop.eup %2514 }
 0x631   : > { %v1453_v20 = vpop.f32.mrb[10].mxu1 }
 0x632   : > { %v1457_v19 = vmul.f32 %v2515_v18, %v1453_v20  ;;  %v2371_v21 = vpop.f32.mrb[11].mxu1 }
 0x633   : > { %v2251_v21 = vld [vmem:[%s3035_s13] ss:$0 sm:$0xff] }
 0x634   : > { %2375 = vmatmul.mubr.msk.f32.vlgmr.msra.gmra.mrb[8].mxu0 %vm810_vm2, %v1457_v19 }
 0x635   : > { %2383 = vmatpush3.msk.msra.mxu0 %vm904_vm4, %v1621_v22  ;;  %v1606_v23 = vpop.f32.mrb[12].mxu1  ;;  %2384 = vmatprep.mubr.msk.f32.mxu0 %vm2591_vm0, %v2592_v11 }
 0x636   : > { %v2381_v24 = vpop.f32.mrb[13].mxu1  ;;  %v1610_v25 = vsel %vm887_vm3, %v1606_v23, -inf  ;;  %2437 = vmatprep.subr.bf16.mxu0 %v2590_v3 }
 0x637   : > { %1611 = vmax.xlane.f32.xlu0 %v1610_v25 }
 0x6c4   : > { %v1612_v26 = vpop.xlane.xlu0 %1611 }
 0x6c5   : > { %v1613_v27 = vsub.f32 %v1606_v23, %v1612_v26 }
 0x6c7   : > { %v1614_v28 = vmul.f32 1.442695, %v1613_v27 }
 0x6c9   : > { %2516 = vpow2.f32 %v1614_v28 }
 0x6d3   : > { %v2517_v29 = vpop.eup %2516 }
 0x6d4   : > { %2385 = vmatmul.mubr.msk.f32.vlgmr.msra.gmra.mrb[10].mxu0 %vm900_vm5, %v2517_v29  ;;  %v1616_v30 = vsel %vm887_vm3, %v2517_v29, 0.0 }
 0x6d5   : > { %1617 = vadd.xlane.f32.xlu0 %v1616_v30  ;;  %2400 = vmatprep.mubr.msk.f32.mxu0 %vm2591_vm0, %v2592_v11 }
 0x6d6   : > { %2439 = vmatpush3.bf16.msra.mxu0 %v2438_v52 }
 0x6d7   : > { %2440 = vmatprep.subr.bf16.mxu0 %v2590_v3 }
 0x707   : > { %v1527_v31 = vpop.f32.mrb[8].mxu0 }
 0x708   : > { %v1531_v32 = vadd.f32 %v1527_v31, %v1291_v13  ;;  %v2376_v33 = vpop.f32.mrb[9].mxu0 }
 0x709   : > { %v2013_v33 = vld [vmem:[%s3038_s16 + $0x8] sm:$0xff] }
 0x762   : > { %v1618_v35 = vpop.xlane.xlu0 %1617 }
 0x763   : > { %2518 = vrcp.f32 %v1618_v35  ;;  %v2014_v35 = vld [vmem:[%s3038_s16 + $0x10] sm:$0xff] }
 0x76d   : > { %v2519_v36 = vpop.eup %2518 }
 0x7a7   : > { %v1693_v37 = vpop.f32.mrb[10].mxu0 }
 0x7a8   : > { %v1697_v38 = vmul.f32 %v2519_v36, %v1693_v37  ;;  %v2386_v39 = vpop.f32.mrb[11].mxu0  ;;  %v2015_v36 = vld [vmem:[%s3038_s16 + $0x18] sm:$0xff] }
 0x7a9   : > { %v2453_v37 = vpack.c.bf16 %v2015_v36, %v2014_v35 }
 0x7aa   : > { %2390 = vmatmul.mubr.msk.f32.vlgmr.msra.gmra.mrb[14].mxu1 %vm810_vm2, %v1697_v38 }
 0x7ab   : > { %2411 = vmatprep.mubr.msk.f32.mxu1 %vm2591_vm0, %v2592_v11  ;;  %2445 = vmatpush3.bf16.msra.mxu1 %v2444_v4 }
 0x7ac   : > { %2446 = vmatprep.subr.bf16.mxu1 %v2590_v3 }
 0x7af   : > { %2448 = vmatpush3.bf16.msra.mxu1 %v2447_v6 }
 0x87d   : > { %v1767_v40 = vpop.f32.mrb[14].mxu1 }
 0x87e   : > { %v1771_v41 = vadd.f32 %v1767_v40, %v1531_v32  ;;  %v2391_v42 = vpop.f32.mrb[15].mxu1  ;;  %v2012_v32 = vld [vmem:[%s3038_s16] sm:$0xff] }
 0x87f   : > { %v2450_v34 = vpack.c.bf16 %v2013_v33, %v2012_v32 }
 0x880   : > { %v1772_v43 = vadd.f32 %v1771_v41, %v2793_v15  ;;  %v1806_v15 = vld [vmem:[%s3032_s10 + $0x10] sm:$0xff] }
 0x881   : > { %v2441_v54 = vpack.c.bf16 %v1807_v53, %v1806_v15 }
 0x882   : > { %v1776_v44 = vsel %vm1775_vm6, %v1772_v43, 0.0 }
 0x883   : > { %1777 = vadd.xlane.f32.xlu0 %v1776_v44  ;;  %2442 = vmatpush3.bf16.msra.mxu0 %v2441_v54 }
 0x884   : > { %2449 = vmatprep.subr.bf16.mxu0 %v2590_v3 }
 0x910   : > { %v1778_v45 = vpop.xlane.xlu0 %1777 }
 0x911   : > { %v1780_v46 = vmul.f32 0.03125, %v1778_v45 }
 0x913   : > { %v1781_v47 = vsub.f32 %v1772_v43, %v1780_v46  ;;  %v2254_v43 = vld [vmem:[%s3037_s15] ss:$0 sm:$0xff] }
 0x915   : > { %v1782_v48 = vmul.f32 %v1781_v47, %v1781_v47 }
 0x917   : > { %v1783_v49 = vsel %vm1775_vm6, %v1782_v48, 0.0 }
 0x918   : > { %1784 = vadd.xlane.f32.xlu0 %v1783_v49 }
 0x9a5   : > { %v1785_v55 = vpop.xlane.xlu0 %1784 }
 0x9a6   : > { %v1786_v56 = vmul.f32 0.03125, %v1785_v55 }
 0x9a8   : > { %v1787_v57 = vadd.f32 1e-05, %v1786_v56 }
 0x9aa   : > { %2520 = vrsqrt.f32 %v1787_v57 }
 0x9b4   : > { %v2521_v58 = vpop.eup %2520 }
 0x9b5   : > { %v1789_v60 = vmul.f32 %v2521_v58, %v1781_v47 }
 0x9b7   : > { %v1796_v62 = vmul.f32 %v2247_v59, %v1789_v60 }
 0x9b9   : > { %v1803_v63 = vadd.f32 %v2248_v61, %v1796_v62 }
 0x9bb   : > { %2401 = vmatmul.mubr.msk.f32.vlgmr.msra.gmra.mrb[12].mxu0 %vm649_vm1, %v1803_v63 }
 0x9bc   : > { %2422 = vmatprep.mubr.msk.f32.mxu0 %vm2591_vm0, %v2592_v11  ;;  %v2249_v11 = vld [vmem:[%s3033_s11] ss:$0 sm:$0xff]  ;;  %2451 = vmatpush3.bf16.msra.mxu0 %v2450_v34 }
 0x9bd   : > { %2452 = vmatprep.subr.bf16.mxu0 %v2590_v3  ;;  %v2253_v3 = vld [vmem:[%s3036_s14] ss:$0 sm:$0xff] }
 0x9c0   : > { %2454 = vmatpush3.bf16.msra.mxu0 %v2453_v37 }
 0xa8e   : > { %v1889_v7 = vpop.f32.mrb[12].mxu0 }
 0xa8f   : > { %v1890_v8 = vadd.f32 %v2249_v11, %v1889_v7  ;;  %v2402_v9 = vpop.f32.mrb[13].mxu0 }
 0xa91   : > { %v1894_v10 = vmul.f32 0.044715, %v1890_v8  ;;  %v1893_v18 = vmul.f32 0.5, %v1890_v8 }
 0xa93   : > { %v1895_v12 = vmul.f32 %v1894_v10, %v1890_v8 }
 0xa95   : > { %v1896_v13 = vmul.f32 %v1895_v12, %v1890_v8 }
 0xa97   : > { %v1897_v14 = vadd.f32 %v1896_v13, %v1890_v8 }
 0xa99   : > { %v1898_v16 = vmul.f32 0.7978846, %v1897_v14 }
 0xa9b   : > { %2522 = vtanh.f32 %v1898_v16 }
 0xaa5   : > { %v2523_v17 = vpop.eup %2522 }
 0xaa6   : > { %v1900_v20 = vadd.f32 1.0, %v2523_v17 }
 0xaa8   : > { %v1901_v19 = vmul.f32 %v1900_v20, %v1893_v18 }
 0xaaa   : > { %2412 = vmatmul.mubr.msk.f32.vlgmr.msra.gmra.mrb[16].mxu1 %vm649_vm1, %v1901_v19 }
 0xb7d   : > { %v1977_v22 = vpop.f32.mrb[16].mxu1 }
 0xb7e   : > { %v1978_v23 = vadd.f32 %v2251_v21, %v1977_v22  ;;  %v2413_v24 = vpop.f32.mrb[17].mxu1 }
 0xb80   : > { %v1981_v25 = vadd.f32 %v1978_v23, %v1803_v63 }
 0xb82   : > { %v1984_v26 = vsel %vm1775_vm6, %v1981_v25, 0.0 }
 0xb83   : > { %1985 = vadd.xlane.f32.xlu0 %v1984_v26 }
 0xc10   : > { %v1986_v27 = vpop.xlane.xlu0 %1985 }
 0xc11   : > { %v1987_v28 = vmul.f32 0.03125, %v1986_v27 }
 0xc13   : > { %v1988_v29 = vsub.f32 %v1981_v25, %v1987_v28 }
 0xc15   : > { %v1989_v30 = vmul.f32 %v1988_v29, %v1988_v29 }
 0xc17   : > { %v1990_v31 = vsel %vm1775_vm6, %v1989_v30, 0.0 }
 0xc18   : > { %1991 = vadd.xlane.f32.xlu1 %v1990_v31 }
 0xca5   : > { %v1992_v38 = vpop.xlane.xlu1 %1991 }
 0xca6   : > { %v1993_v39 = vmul.f32 0.03125, %v1992_v38 }
 0xca8   : > { %v1994_v40 = vadd.f32 1e-05, %v1993_v39 }
 0xcaa   : > { %2524 = vrsqrt.f32 %v1994_v40 }
 0xcb4   : > { %v2525_v41 = vpop.eup %2524 }
 0xcb5   : > { %v1996_v42 = vmul.f32 %v2525_v41, %v1988_v29 }
 0xcb7   : > { %v2003_v44 = vmul.f32 %v2253_v3, %v1996_v42 }
 0xcb9   : > { %v2010_v45 = vadd.f32 %v2254_v43, %v2003_v44 }
 0xcbb   : > { %2423 = vmatmul.mubr.msk.f32.vlgmr.msra.gmra.mrb[14].mxu0 %vm649_vm1, %v2010_v45  ;;  %2011 = vst.msk [vmem:[%s607_s22] sm:$0xf] %vm1775_vm6, %v2010_v45 }
 0xcbc   : > { %2539 = shalt.err (!%p2536_p3)
}
 0xcbd   : > { %s2540_s4 = scalar_lea.hbm %s2979_s0, 64  ;;  %s2544_s20 = scalar_lea.hbm %s3040_s18, 384 }
 0xcbe   : > { %p2541_p4 = scmp.ne.s32.totalorder %s2979_s0, %s2540_s4  ;;  %p2545_p9 = scmp.lt.u32.totalorder %s2979_s0, %s3040_s18 }
 0xcbf   : > { %p2546_p10 = scmp.lt.u32.totalorder %s2544_s20, %s2540_s4  ;;  %p2548_p12 = scmp.lt.u32.totalorder %s2540_s4, %s2979_s0 }
 0xcc0   : > { %p2542_p7 = pnand %p2541_p4, %p2739_p5 }
 0xcc1   : > { %p2547_p11 = por %p2546_p10, %p2545_p9 }
 0xcc2   : > { %p2543_p8 = pneg %p2542_p7 }
 0xcc3   : > { %p2549_p13 = por %p2548_p12, %p2547_p11 }
 0xcc5   : > { %p2550_p0 = pnand %p2549_p13, %p2543_p8 }
 0xcc7   : > { %2553 = shalt.err (!%p2550_p0)
}
 0xcc8   : > { %2455 = dma.vmem_to_hbm [thread:$0]  (%p2739_p5), %s2117_s24, 64, %s2979_s0, %s2099_s26   ;;  %v2255_v46 = vld [vmem:[%s3039_s17] ss:$0 sm:$0xff]  ;;  %vm2096_vm7 = vcmask 60416  }
 0xcc9   : > { %s625_s5 = scalar_lea.vmem %s3041_s19, %s2783_s2 }
 0xd8e   : > { %v2092_v47 = vpop.f32.mrb[14].mxu0 }
 0xd8f   : > { %v2093_v48 = vadd.f32 %v2255_v46, %v2092_v47  ;;  %v2424_v49 = vpop.f32.mrb[15].mxu0 }
 0xd91   : > { %2097 = vst.msk [vmem:[%s625_s5] sm:$0xf] %vm2096_vm7, %v2093_v48 }
 0xd92 PF: > { %s3069_s4 = sld [smem:[#allocation5_spill]]  ;;  %p2461_p1 = scmp.ge.s32.totalorder %s2588_s21, 2 }
 0xd94   : > { %p2458_p5 = pnand %p2461_p1, %p2743_p6 }
 0xd98   : > { %s2131_s1 = sand.u32 1, %s3069_s4  }
 0xd99   : > { %s2132_s24 = scalar_lea.sflag [#allocation3], %s2131_s1 }
 0xd9a   : > { %2571 = dma.done.wait (!%p2458_p5), %s2132_s24, 64  }
 0xd9b   : > { %2573 = vsyncadd (!%p2458_p5), %s2132_s24, 4294967232  ;;  %s3071_s21 = sld [smem:[#allocation7_spill]]  ;;  %s3072_s26 = sld [smem:[#allocation6_spill]] }
 0xd9c   : > { %s3073_s20 = sld [smem:[#allocation8_spill]]  ;;  %s3074_s0 = smov %s2580_s30 }
 0xda1   : > { %p30_p2 = scmp.ge.s32.totalorder %s3071_s21, 8   ;;  %s3075_s30 = smov %s3072_s26 }
 0xda3   :  { %32 = sbr.rel (!%p30_p2) target bundleno = 11 (0xb), region = 142 }
 0xdaa   :  { %2144 = vsyncpa [#allocation3], 1 }
 0xdab   :  { %2146 = vsyncpa [#allocation3 + $0x1], 1 }

</bundles_post_ra>
